<compile_context>
chip_gen: v5e
topology: v5e:2x2
jax: 0.10.0
libtpu: 0.0.40
codegen_flags: <defaults>
</compile_context>

<pallas_src>
import functools

import jax
import jax.numpy as jnp
from jax import lax
from jax.experimental import pallas as pl
from jax.experimental.pallas import tpu as pltpu


# --------------------------------------------------------------------------
# BlockSpec helpers
# --------------------------------------------------------------------------
def _row_spec(tile, d):
    # Row-tiled (points along sublanes, features along lanes).
    return pl.BlockSpec((tile, d), lambda i: (i, 0))


def _rep_spec(shape):
    # Full-array block, identical for every grid step (stays VMEM-resident).
    nd = len(shape)
    return pl.BlockSpec(shape, lambda i: (0,) * nd)


# --------------------------------------------------------------------------
# Kernels
# --------------------------------------------------------------------------
def _trunk_kernel(pix_ref, xy_ref, w1_ref, b1_ref, w2_ref, b2_ref,
                  wef_ref, wex_ref, be_ref, wb_ref, bb_ref, o_ref):
    """InputEmbed (pointwise conv stack on sampled pixels) + fc_bottleneck."""
    f = jnp.dot(pix_ref[...], w1_ref[...],
                preferred_element_type=jnp.float32) + b1_ref[...]
    f = jnp.maximum(f, 0.0)
    f = jnp.dot(f, w2_ref[...],
                preferred_element_type=jnp.float32) + b2_ref[...]
    f = jnp.maximum(f, 0.0)
    # embed weight is split (features / xy) in the wrapper -> no in-kernel concat
    e = (jnp.dot(f, wef_ref[...], preferred_element_type=jnp.float32)
         + jnp.dot(xy_ref[...], wex_ref[...], preferred_element_type=jnp.float32)
         + be_ref[...])
    x = jnp.dot(e, wb_ref[...],
                preferred_element_type=jnp.float32) + bb_ref[...]
    o_ref[...] = x.astype(o_ref.dtype)


def _layer_kernel(xf_ref, xt_ref, nn_ref,
                  g1_ref, be1_ref, wq_ref, bq_ref, wk_ref, bk_ref,
                  wv_ref, bv_ref, wo_ref, bo_ref,
                  g2_ref, be2_ref, w1_ref, b1_ref, w2_ref, b2_ref,
                  o_ref, *, eps):
    """One fused transformer block: LN -> QKV -> kNN attention -> O -> residual
    -> LN -> MLP -> residual.  Attention uses VMEM-resident K/V of all points
    and a duplicate-counting neighbour mask (no (N,K,D) gather)."""

    def layernorm(x, g_ref, b_ref):
        mu = jnp.mean(x, axis=-1, keepdims=True)
        var = jnp.mean((x - mu) * (x - mu), axis=-1, keepdims=True)
        return (x - mu) * lax.rsqrt(var + eps) * g_ref[...] + b_ref[...]

    x_all = xf_ref[...]                       # (Npad, D)  full point set
    x_tile = xt_ref[...]                      # (T, D)     rows of this grid step

    h_all = layernorm(x_all, g1_ref, be1_ref)
    h_tile = layernorm(x_tile, g1_ref, be1_ref)

    k_all = jnp.dot(h_all, wk_ref[...],
                    preferred_element_type=jnp.float32) + bk_ref[...]
    v_all = jnp.dot(h_all, wv_ref[...],
                    preferred_element_type=jnp.float32) + bv_ref[...]
    # 1/sqrt(d) is already folded into wq/bq by the wrapper.
    q = jnp.dot(h_tile, wq_ref[...],
                preferred_element_type=jnp.float32) + bq_ref[...]

    # Dense (T, Npad) scores on the MXU, then restrict to the K neighbours.
    s = jnp.einsum("td,nd->tn", q, k_all,
                   preferred_element_type=jnp.float32)            # (T, Npad)
    idx = nn_ref[...]                                             # (T, K) int32
    col = lax.broadcasted_iota(jnp.int32, s.shape, 1)
    cnt = jnp.zeros(s.shape, jnp.float32)
    for kk in range(idx.shape[1]):                                # K is small; unrolled
        cnt = cnt + (col == idx[:, kk:kk + 1]).astype(jnp.float32)

    s = jnp.where(cnt > 0.0, s, jnp.float32(-1e30))
    m = jnp.max(s, axis=-1, keepdims=True)
    p = jnp.exp(s - m) * cnt                                      # duplicates counted
    denom = jnp.sum(p, axis=-1, keepdims=True)
    p = p * pl.reciprocal(denom, approx=True)
    attn = jnp.dot(p, v_all, preferred_element_type=jnp.float32)  # (T, D)

    x1 = x_tile + jnp.dot(attn, wo_ref[...],
                          preferred_element_type=jnp.float32) + bo_ref[...]
    h2 = layernorm(x1, g2_ref, be2_ref)
    mlp = jnp.dot(h2, w1_ref[...],
                  preferred_element_type=jnp.float32) + b1_ref[...]
    mlp = jnp.maximum(mlp, 0.0)
    mlp = jnp.dot(mlp, w2_ref[...],
                  preferred_element_type=jnp.float32) + b2_ref[...]
    o_ref[...] = (x1 + mlp).astype(o_ref.dtype)


def _head_kernel(x_ref, w1_ref, b1_ref, w2_ref, b2_ref, wl_ref, bl_ref, o_ref):
    """fc3 (Linear-ReLU-Linear-ReLU) + last_linear, fused."""
    r = jnp.dot(x_ref[...], w1_ref[...],
                preferred_element_type=jnp.float32) + b1_ref[...]
    r = jnp.maximum(r, 0.0)
    r = jnp.dot(r, w2_ref[...],
                preferred_element_type=jnp.float32) + b2_ref[...]
    r = jnp.maximum(r, 0.0)
    out = jnp.dot(r, wl_ref[...],
                  preferred_element_type=jnp.float32) + bl_ref[...]
    o_ref[...] = out.astype(o_ref.dtype)


# --------------------------------------------------------------------------
# Wrappers (one pallas_call each)
# --------------------------------------------------------------------------
def trunk_forward(pix, xy, p, *, tile_m):
    n, c = pix.shape
    f1 = p["conv1_w"].shape[1]
    f2 = p["conv2_w"].shape[1]
    e = p["embed_w"].shape[1]
    d = p["bottleneck_w"].shape[1]
    wef = p["embed_w"][:f2]
    wex = p["embed_w"][f2:]
    return pl.pallas_call(
        _trunk_kernel,
        out_shape=jax.ShapeDtypeStruct((n, d), jnp.float32),
        grid=(n // tile_m,),
        in_specs=[
            _row_spec(tile_m, c),
            _row_spec(tile_m, xy.shape[1]),
            _rep_spec((c, f1)), _rep_spec((1, f1)),
            _rep_spec((f1, f2)), _rep_spec((1, f2)),
            _rep_spec((f2, e)), _rep_spec((2, e)), _rep_spec((1, e)),
            _rep_spec((e, d)), _rep_spec((1, d)),
        ],
        out_specs=_row_spec(tile_m, d),
        compiler_params=pltpu.CompilerParams(dimension_semantics=("parallel",)),
    )(pix, xy,
      p["conv1_w"], p["conv1_b"].reshape(1, -1),
      p["conv2_w"], p["conv2_b"].reshape(1, -1),
      wef, wex, p["embed_b"].reshape(1, -1),
      p["bottleneck_w"], p["bottleneck_b"].reshape(1, -1))


def layer_forward(x, nn_idx, lp, *, tile_m, eps=1e-5):
    n_pad, d = x.shape
    kk = nn_idx.shape[1]
    dh = lp["mlp_w1"].shape[1]
    scale = 1.0 / float(d) ** 0.5
    wq = lp["wq"] * scale                      # fold softmax scale into Wq
    bq = (lp["bq"] * scale).reshape(1, -1)
    return pl.pallas_call(
        functools.partial(_layer_kernel, eps=eps),
        out_shape=jax.ShapeDtypeStruct((n_pad, d), jnp.float32),
        grid=(n_pad // tile_m,),
        in_specs=[
            _rep_spec((n_pad, d)),             # x, full (VMEM-resident K/V source)
            _row_spec(tile_m, d),              # x, this row tile
            _row_spec(tile_m, kk),             # neighbour indices for this tile
            _rep_spec((1, d)), _rep_spec((1, d)),          # ln1
            _rep_spec((d, d)), _rep_spec((1, d)),          # q
            _rep_spec((d, d)), _rep_spec((1, d)),          # k
            _rep_spec((d, d)), _rep_spec((1, d)),          # v
            _rep_spec((d, d)), _rep_spec((1, d)),          # o
            _rep_spec((1, d)), _rep_spec((1, d)),          # ln2
            _rep_spec((d, dh)), _rep_spec((1, dh)),        # mlp1
            _rep_spec((dh, d)), _rep_spec((1, d)),         # mlp2
        ],
        out_specs=_row_spec(tile_m, d),
        compiler_params=pltpu.CompilerParams(dimension_semantics=("parallel",)),
    )(x, x, nn_idx,
      lp["ln1_g"].reshape(1, -1), lp["ln1_b"].reshape(1, -1),
      wq, bq,
      lp["wk"], lp["bk"].reshape(1, -1),
      lp["wv"], lp["bv"].reshape(1, -1),
      lp["wo"], lp["bo"].reshape(1, -1),
      lp["ln2_g"].reshape(1, -1), lp["ln2_b"].reshape(1, -1),
      lp["mlp_w1"], lp["mlp_b1"].reshape(1, -1),
      lp["mlp_w2"], lp["mlp_b2"].reshape(1, -1))


def head_forward(x, p, *, tile_m):
    n_pad, d = x.shape
    d2 = p["fc3_w1"].shape[1]
    n_c = p["last_w"].shape[1]
    return pl.pallas_call(
        _head_kernel,
        out_shape=jax.ShapeDtypeStruct((n_pad, n_c), jnp.float32),
        grid=(n_pad // tile_m,),
        in_specs=[
            _row_spec(tile_m, d),
            _rep_spec((d, d2)), _rep_spec((1, d2)),
            _rep_spec((d2, d2)), _rep_spec((1, d2)),
            _rep_spec((d2, n_c)), _rep_spec((1, n_c)),
        ],
        out_specs=_row_spec(tile_m, n_c),
        compiler_params=pltpu.CompilerParams(dimension_semantics=("parallel",)),
    )(x,
      p["fc3_w1"], p["fc3_b1"].reshape(1, -1),
      p["fc3_w2"], p["fc3_b2"].reshape(1, -1),
      p["last_w"], p["last_b"].reshape(1, -1))


# --------------------------------------------------------------------------
# Parameter construction (deterministic, synthetic)
# --------------------------------------------------------------------------
def init_params(key, *, c_img=3, f1=8, f2=16, input_embed_dim=32, inter_dim=32,
                depth=2, n_c=36):
    keys = iter(jax.random.split(key, 128))

    def lin(din, dout):
        w = jax.random.normal(next(keys), (din, dout), jnp.float32) * 0.02
        b = jnp.zeros((dout,), jnp.float32)
        return w, b

    p = {}
    p["conv1_w"], p["conv1_b"] = lin(c_img, f1)
    p["conv2_w"], p["conv2_b"] = lin(f1, f2)
    p["embed_w"], p["embed_b"] = lin(f2 + 2, input_embed_dim)
    p["bottleneck_w"], p["bottleneck_b"] = lin(input_embed_dim, inter_dim)
    layers = []
    for _ in range(depth):
        layer = {}
        layer["ln1_g"] = jnp.ones((inter_dim,), jnp.float32)
        layer["ln1_b"] = jnp.zeros((inter_dim,), jnp.float32)
        layer["wq"], layer["bq"] = lin(inter_dim, inter_dim)
        layer["wk"], layer["bk"] = lin(inter_dim, inter_dim)
        layer["wv"], layer["bv"] = lin(inter_dim, inter_dim)
        layer["wo"], layer["bo"] = lin(inter_dim, inter_dim)
        layer["ln2_g"] = jnp.ones((inter_dim,), jnp.float32)
        layer["ln2_b"] = jnp.zeros((inter_dim,), jnp.float32)
        layer["mlp_w1"], layer["mlp_b1"] = lin(inter_dim, inter_dim * 2)
        layer["mlp_w2"], layer["mlp_b2"] = lin(inter_dim * 2, inter_dim)
        layers.append(layer)
    p["layers"] = layers
    p["fc3_w1"], p["fc3_b1"] = lin(inter_dim, inter_dim * 2)
    p["fc3_w2"], p["fc3_b2"] = lin(inter_dim * 2, inter_dim * 2)
    p["last_w"], p["last_b"] = lin(inter_dim * 2, n_c)
    return p


# --------------------------------------------------------------------------
# Forward pass
# --------------------------------------------------------------------------
def cad_transformer_forward(params, image, xy, nns, *, tile_m=64):
    # image: (1, C, H, W) NCHW, xy: (1, N, 2) in [-1, 1], nns: (1, N, K) int32
    b, c, h, w = image.shape
    assert b == 1, "synthetic kernel supports batch=1 (as in CADTransformer usage)"
    n = xy.shape[1]

    xy0 = xy[0]
    nn_idx = jnp.clip(nns[0], 0, n - 1).astype(jnp.int32)   # guard padded/invalid ids

    # Nearest-neighbour pixel sampling at xy.  Because the InputEmbed stand-in is
    # a pointwise (1x1-conv) stack, sampling commutes with the convs, so only the
    # N sampled pixels ever enter the kernels (never the full HxW feature map).
    px = jnp.clip(jnp.round((xy0[:, 0] + 1.0) * 0.5 * (w - 1)), 0, w - 1).astype(jnp.int32)
    py = jnp.clip(jnp.round((xy0[:, 1] + 1.0) * 0.5 * (h - 1)), 0, h - 1).astype(jnp.int32)
    img_hwc = jnp.transpose(image[0], (1, 2, 0))             # (H, W, C)
    pix = img_hwc[py, px]                                    # (N, C)

    # Pad the point dimension to a multiple of tile_m (padded rows are sliced off).
    n_pad = ((n + tile_m - 1) // tile_m) * tile_m
    pad = n_pad - n
    if pad:
        pix = jnp.pad(pix, ((0, pad), (0, 0)))
        xy0 = jnp.pad(xy0, ((0, pad), (0, 0)))
        nn_idx = jnp.pad(nn_idx, ((0, pad), (0, 0)))

    # InputEmbed + fc_bottleneck (fused).
    x = trunk_forward(pix, xy0, params, tile_m=tile_m)

    # Transformer blocks (one fused pallas_call per block; attention weights are
    # not materialized — they were never consumed by the original forward).
    for lp in params["layers"]:
        x = layer_forward(x, nn_idx, lp, tile_m=tile_m)

    # fc3 + last_linear (fused).
    res = head_forward(x, params, tile_m=tile_m)
    return res[:n][None]                                     # (1, N, n_c)


# --------------------------------------------------------------------------
if __name__ == "__main__":
    key = jax.random.PRNGKey(0)
    k_img, k_xy, k_nns, k_par = jax.random.split(key, 4)

    B, C, H, W = 1, 3, 16, 16
    N_PTS, K_NN = 128, 8
    NUM_CLASS = 36
    TILE_M = 64                                   # 2 parallel grid steps (v7x dual-TC)

    image = jax.random.normal(k_img, (B, C, H, W), jnp.float32)
    xy = jax.random.uniform(k_xy, (B, N_PTS, 2), jnp.float32, minval=-1.0, maxval=1.0)
    nns = jax.random.randint(k_nns, (B, N_PTS, K_NN), 0, N_PTS, dtype=jnp.int32)

    params = init_params(k_par, c_img=C, input_embed_dim=32, inter_dim=32,
                         depth=2, n_c=NUM_CLASS)

    fwd = jax.jit(functools.partial(cad_transformer_forward, tile_m=TILE_M))
    out = fwd(params, image, xy, nns)
    out = jax.block_until_ready(out)

    assert out.shape == (B, N_PTS, NUM_CLASS), out.shape
    assert bool(jnp.all(jnp.isfinite(out)))
    print("KERNEL_OK")
</pallas_src>

<mosaic_0001>
module attributes {stable_mosaic.version = 11 : i64} {
  func.func @_trunk_kernel(%arg0: i32, %arg1: memref<64x3xf32, #tpu.memory_space<vmem>>, %arg2: memref<64x2xf32, #tpu.memory_space<vmem>>, %arg3: memref<3x8xf32, #tpu.memory_space<vmem>>, %arg4: memref<1x8xf32, #tpu.memory_space<vmem>>, %arg5: memref<8x16xf32, #tpu.memory_space<vmem>>, %arg6: memref<1x16xf32, #tpu.memory_space<vmem>>, %arg7: memref<16x32xf32, #tpu.memory_space<vmem>>, %arg8: memref<2x32xf32, #tpu.memory_space<vmem>>, %arg9: memref<1x32xf32, #tpu.memory_space<vmem>>, %arg10: memref<32x32xf32, #tpu.memory_space<vmem>>, %arg11: memref<1x32xf32, #tpu.memory_space<vmem>>, %arg12: memref<64x32xf32, #tpu.memory_space<vmem>>) attributes {dimension_semantics = [#tpu.dimension_semantics<parallel>], iteration_bounds = array<i64: 2>, scalar_prefetch = 0 : i64, scratch_operands = 0 : i64, tpu.core_type = #tpu.core_type<tc>, window_params = [{transform_indices = @transform_0, window_bounds = array<i64: 64, 3>}, {transform_indices = @transform_1, window_bounds = array<i64: 64, 2>}, {pipeline_mode = #tpu.pipeline_mode<synchronous>, transform_indices = @transform_2, window_bounds = array<i64: 3, 8>}, {pipeline_mode = #tpu.pipeline_mode<synchronous>, transform_indices = @transform_3, window_bounds = array<i64: 1, 8>}, {pipeline_mode = #tpu.pipeline_mode<synchronous>, transform_indices = @transform_4, window_bounds = array<i64: 8, 16>}, {pipeline_mode = #tpu.pipeline_mode<synchronous>, transform_indices = @transform_5, window_bounds = array<i64: 1, 16>}, {pipeline_mode = #tpu.pipeline_mode<synchronous>, transform_indices = @transform_6, window_bounds = array<i64: 16, 32>}, {pipeline_mode = #tpu.pipeline_mode<synchronous>, transform_indices = @transform_7, window_bounds = array<i64: 2, 32>}, {pipeline_mode = #tpu.pipeline_mode<synchronous>, transform_indices = @transform_8, window_bounds = array<i64: 1, 32>}, {pipeline_mode = #tpu.pipeline_mode<synchronous>, transform_indices = @transform_9, window_bounds = array<i64: 32, 32>}, {pipeline_mode = #tpu.pipeline_mode<synchronous>, transform_indices = @transform_10, window_bounds = array<i64: 1, 32>}, {transform_indices = @transform_11, window_bounds = array<i64: 64, 32>}]} {
    %c0 = arith.constant 0 : index
    %c0_0 = arith.constant 0 : index
    %0 = vector.load %arg1[%c0, %c0_0] : memref<64x3xf32, #tpu.memory_space<vmem>>, vector<64x3xf32>
    %c0_1 = arith.constant 0 : index
    %c0_2 = arith.constant 0 : index
    %1 = vector.load %arg3[%c0_1, %c0_2] : memref<3x8xf32, #tpu.memory_space<vmem>>, vector<3x8xf32>
    %cst = arith.constant dense<0.000000e+00> : vector<64x8xf32>
    %2 = tpu.matmul %0, %1, %cst {dimension_numbers = #tpu.dot_dimension_numbers<[1], [0], [0], [1], [0, 0, 1, 1], [], []>} : vector<64x3xf32>, vector<3x8xf32>, vector<64x8xf32> -> vector<64x8xf32>
    %c0_3 = arith.constant 0 : index
    %c0_4 = arith.constant 0 : index
    %3 = vector.load %arg4[%c0_3, %c0_4] : memref<1x8xf32, #tpu.memory_space<vmem>>, vector<1x8xf32>
    %4 = vector.broadcast %3 : vector<1x8xf32> to vector<64x8xf32>
    %5 = arith.addf %2, %4 : vector<64x8xf32>
    %cst_5 = arith.constant 0.000000e+00 : f32
    %6 = vector.broadcast %cst_5 : f32 to vector<64x8xf32>
    %7 = arith.maximumf %5, %6 : vector<64x8xf32>
    %c0_6 = arith.constant 0 : index
    %c0_7 = arith.constant 0 : index
    %8 = vector.load %arg5[%c0_6, %c0_7] : memref<8x16xf32, #tpu.memory_space<vmem>>, vector<8x16xf32>
    %cst_8 = arith.constant dense<0.000000e+00> : vector<64x16xf32>
    %9 = tpu.matmul %7, %8, %cst_8 {dimension_numbers = #tpu.dot_dimension_numbers<[1], [0], [0], [1], [0, 0, 1, 1], [], []>} : vector<64x8xf32>, vector<8x16xf32>, vector<64x16xf32> -> vector<64x16xf32>
    %c0_9 = arith.constant 0 : index
    %c0_10 = arith.constant 0 : index
    %10 = vector.load %arg6[%c0_9, %c0_10] : memref<1x16xf32, #tpu.memory_space<vmem>>, vector<1x16xf32>
    %11 = vector.broadcast %10 : vector<1x16xf32> to vector<64x16xf32>
    %12 = arith.addf %9, %11 : vector<64x16xf32>
    %cst_11 = arith.constant 0.000000e+00 : f32
    %13 = vector.broadcast %cst_11 : f32 to vector<64x16xf32>
    %14 = arith.maximumf %12, %13 : vector<64x16xf32>
    %c0_12 = arith.constant 0 : index
    %c0_13 = arith.constant 0 : index
    %15 = vector.load %arg7[%c0_12, %c0_13] : memref<16x32xf32, #tpu.memory_space<vmem>>, vector<16x32xf32>
    %cst_14 = arith.constant dense<0.000000e+00> : vector<64x32xf32>
    %16 = tpu.matmul %14, %15, %cst_14 {dimension_numbers = #tpu.dot_dimension_numbers<[1], [0], [0], [1], [0, 0, 1, 1], [], []>} : vector<64x16xf32>, vector<16x32xf32>, vector<64x32xf32> -> vector<64x32xf32>
    %c0_15 = arith.constant 0 : index
    %c0_16 = arith.constant 0 : index
    %17 = vector.load %arg2[%c0_15, %c0_16] : memref<64x2xf32, #tpu.memory_space<vmem>>, vector<64x2xf32>
    %c0_17 = arith.constant 0 : index
    %c0_18 = arith.constant 0 : index
    %18 = vector.load %arg8[%c0_17, %c0_18] : memref<2x32xf32, #tpu.memory_space<vmem>>, vector<2x32xf32>
    %cst_19 = arith.constant dense<0.000000e+00> : vector<64x32xf32>
    %19 = tpu.matmul %17, %18, %cst_19 {dimension_numbers = #tpu.dot_dimension_numbers<[1], [0], [0], [1], [0, 0, 1, 1], [], []>} : vector<64x2xf32>, vector<2x32xf32>, vector<64x32xf32> -> vector<64x32xf32>
    %20 = arith.addf %16, %19 : vector<64x32xf32>
    %c0_20 = arith.constant 0 : index
    %c0_21 = arith.constant 0 : index
    %21 = vector.load %arg9[%c0_20, %c0_21] : memref<1x32xf32, #tpu.memory_space<vmem>>, vector<1x32xf32>
    %22 = vector.broadcast %21 : vector<1x32xf32> to vector<64x32xf32>
    %23 = arith.addf %20, %22 : vector<64x32xf32>
    %c0_22 = arith.constant 0 : index
    %c0_23 = arith.constant 0 : index
    %24 = vector.load %arg10[%c0_22, %c0_23] : memref<32x32xf32, #tpu.memory_space<vmem>>, vector<32x32xf32>
    %cst_24 = arith.constant dense<0.000000e+00> : vector<64x32xf32>
    %25 = tpu.matmul %23, %24, %cst_24 {dimension_numbers = #tpu.dot_dimension_numbers<[1], [0], [0], [1], [0, 0, 1, 1], [], []>} : vector<64x32xf32>, vector<32x32xf32>, vector<64x32xf32> -> vector<64x32xf32>
    %c0_25 = arith.constant 0 : index
    %c0_26 = arith.constant 0 : index
    %26 = vector.load %arg11[%c0_25, %c0_26] : memref<1x32xf32, #tpu.memory_space<vmem>>, vector<1x32xf32>
    %27 = vector.broadcast %26 : vector<1x32xf32> to vector<64x32xf32>
    %28 = arith.addf %25, %27 : vector<64x32xf32>
    %c0_27 = arith.constant 0 : index
    %c0_28 = arith.constant 0 : index
    %29 = vector.load %arg12[%c0_27, %c0_28] : memref<64x32xf32, #tpu.memory_space<vmem>>, vector<64x32xf32>
    tpu.vector_store %arg12[%c0_27, %c0_28], %28 {strides = array<i32>} : memref<64x32xf32, #tpu.memory_space<vmem>>, vector<64x32xf32>,
    return
  }
  func.func @transform_0(%arg0: i32) -> (i32, i32) {
    %c0_i32 = arith.constant 0 : i32
    %c0_i32_0 = arith.constant 0 : i32
    return %arg0, %c0_i32 : i32, i32
  }
  func.func @transform_1(%arg0: i32) -> (i32, i32) {
    %c0_i32 = arith.constant 0 : i32
    %c0_i32_0 = arith.constant 0 : i32
    return %arg0, %c0_i32 : i32, i32
  }
  func.func @transform_2(%arg0: i32) -> (i32, i32) {
    %c0_i32 = arith.constant 0 : i32
    %c0_i32_0 = arith.constant 0 : i32
    %c0_i32_1 = arith.constant 0 : i32
    return %c0_i32, %c0_i32_0 : i32, i32
  }
  func.func @transform_3(%arg0: i32) -> (i32, i32) {
    %c0_i32 = arith.constant 0 : i32
    %c0_i32_0 = arith.constant 0 : i32
    %c0_i32_1 = arith.constant 0 : i32
    return %c0_i32, %c0_i32_0 : i32, i32
  }
  func.func @transform_4(%arg0: i32) -> (i32, i32) {
    %c0_i32 = arith.constant 0 : i32
    %c0_i32_0 = arith.constant 0 : i32
    %c0_i32_1 = arith.constant 0 : i32
    return %c0_i32, %c0_i32_0 : i32, i32
  }
  func.func @transform_5(%arg0: i32) -> (i32, i32) {
    %c0_i32 = arith.constant 0 : i32
    %c0_i32_0 = arith.constant 0 : i32
    %c0_i32_1 = arith.constant 0 : i32
    return %c0_i32, %c0_i32_0 : i32, i32
  }
  func.func @transform_6(%arg0: i32) -> (i32, i32) {
    %c0_i32 = arith.constant 0 : i32
    %c0_i32_0 = arith.constant 0 : i32
    %c0_i32_1 = arith.constant 0 : i32
    return %c0_i32, %c0_i32_0 : i32, i32
  }
  func.func @transform_7(%arg0: i32) -> (i32, i32) {
    %c0_i32 = arith.constant 0 : i32
    %c0_i32_0 = arith.constant 0 : i32
    %c0_i32_1 = arith.constant 0 : i32
    return %c0_i32, %c0_i32_0 : i32, i32
  }
  func.func @transform_8(%arg0: i32) -> (i32, i32) {
    %c0_i32 = arith.constant 0 : i32
    %c0_i32_0 = arith.constant 0 : i32
    %c0_i32_1 = arith.constant 0 : i32
    return %c0_i32, %c0_i32_0 : i32, i32
  }
  func.func @transform_9(%arg0: i32) -> (i32, i32) {
    %c0_i32 = arith.constant 0 : i32
    %c0_i32_0 = arith.constant 0 : i32
    %c0_i32_1 = arith.constant 0 : i32
    return %c0_i32, %c0_i32_0 : i32, i32
  }
  func.func @transform_10(%arg0: i32) -> (i32, i32) {
    %c0_i32 = arith.constant 0 : i32
    %c0_i32_0 = arith.constant 0 : i32
    %c0_i32_1 = arith.constant 0 : i32
    return %c0_i32, %c0_i32_0 : i32, i32
  }
  func.func @transform_11(%arg0: i32) -> (i32, i32) {
    %c0_i32 = arith.constant 0 : i32
    %c0_i32_0 = arith.constant 0 : i32
    return %arg0, %c0_i32 : i32, i32
  }
}

module attributes {stable_mosaic.version = 11 : i64} {
  func.func @_head_kernel(%arg0: i32, %arg1: memref<64x32xf32, #tpu.memory_space<vmem>>, %arg2: memref<32x64xf32, #tpu.memory_space<vmem>>, %arg3: memref<1x64xf32, #tpu.memory_space<vmem>>, %arg4: memref<64x64xf32, #tpu.memory_space<vmem>>, %arg5: memref<1x64xf32, #tpu.memory_space<vmem>>, %arg6: memref<64x36xf32, #tpu.memory_space<vmem>>, %arg7: memref<1x36xf32, #tpu.memory_space<vmem>>, %arg8: memref<64x36xf32, #tpu.memory_space<vmem>>) attributes {dimension_semantics = [#tpu.dimension_semantics<parallel>], iteration_bounds = array<i64: 2>, scalar_prefetch = 0 : i64, scratch_operands = 0 : i64, tpu.core_type = #tpu.core_type<tc>, window_params = [{transform_indices = @transform_0, window_bounds = array<i64: 64, 32>}, {pipeline_mode = #tpu.pipeline_mode<synchronous>, transform_indices = @transform_1, window_bounds = array<i64: 32, 64>}, {pipeline_mode = #tpu.pipeline_mode<synchronous>, transform_indices = @transform_2, window_bounds = array<i64: 1, 64>}, {pipeline_mode = #tpu.pipeline_mode<synchronous>, transform_indices = @transform_3, window_bounds = array<i64: 64, 64>}, {pipeline_mode = #tpu.pipeline_mode<synchronous>, transform_indices = @transform_4, window_bounds = array<i64: 1, 64>}, {pipeline_mode = #tpu.pipeline_mode<synchronous>, transform_indices = @transform_5, window_bounds = array<i64: 64, 36>}, {pipeline_mode = #tpu.pipeline_mode<synchronous>, transform_indices = @transform_6, window_bounds = array<i64: 1, 36>}, {transform_indices = @transform_7, window_bounds = array<i64: 64, 36>}]} {
    %c0 = arith.constant 0 : index
    %c0_0 = arith.constant 0 : index
    %0 = vector.load %arg1[%c0, %c0_0] : memref<64x32xf32, #tpu.memory_space<vmem>>, vector<64x32xf32>
    %c0_1 = arith.constant 0 : index
    %c0_2 = arith.constant 0 : index
    %1 = vector.load %arg2[%c0_1, %c0_2] : memref<32x64xf32, #tpu.memory_space<vmem>>, vector<32x64xf32>
    %cst = arith.constant dense<0.000000e+00> : vector<64x64xf32>
    %2 = tpu.matmul %0, %1, %cst {dimension_numbers = #tpu.dot_dimension_numbers<[1], [0], [0], [1], [0, 0, 1, 1], [], []>} : vector<64x32xf32>, vector<32x64xf32>, vector<64x64xf32> -> vector<64x64xf32>
    %c0_3 = arith.constant 0 : index
    %c0_4 = arith.constant 0 : index
    %3 = vector.load %arg3[%c0_3, %c0_4] : memref<1x64xf32, #tpu.memory_space<vmem>>, vector<1x64xf32>
    %4 = vector.broadcast %3 : vector<1x64xf32> to vector<64x64xf32>
    %5 = arith.addf %2, %4 : vector<64x64xf32>
    %cst_5 = arith.constant 0.000000e+00 : f32
    %6 = vector.broadcast %cst_5 : f32 to vector<64x64xf32>
    %7 = arith.maximumf %5, %6 : vector<64x64xf32>
    %c0_6 = arith.constant 0 : index
    %c0_7 = arith.constant 0 : index
    %8 = vector.load %arg4[%c0_6, %c0_7] : memref<64x64xf32, #tpu.memory_space<vmem>>, vector<64x64xf32>
    %cst_8 = arith.constant dense<0.000000e+00> : vector<64x64xf32>
    %9 = tpu.matmul %7, %8, %cst_8 {dimension_numbers = #tpu.dot_dimension_numbers<[1], [0], [0], [1], [0, 0, 1, 1], [], []>} : vector<64x64xf32>, vector<64x64xf32>, vector<64x64xf32> -> vector<64x64xf32>
    %c0_9 = arith.constant 0 : index
    %c0_10 = arith.constant 0 : index
    %10 = vector.load %arg5[%c0_9, %c0_10] : memref<1x64xf32, #tpu.memory_space<vmem>>, vector<1x64xf32>
    %11 = vector.broadcast %10 : vector<1x64xf32> to vector<64x64xf32>
    %12 = arith.addf %9, %11 : vector<64x64xf32>
    %cst_11 = arith.constant 0.000000e+00 : f32
    %13 = vector.broadcast %cst_11 : f32 to vector<64x64xf32>
    %14 = arith.maximumf %12, %13 : vector<64x64xf32>
    %c0_12 = arith.constant 0 : index
    %c0_13 = arith.constant 0 : index
    %15 = vector.load %arg6[%c0_12, %c0_13] : memref<64x36xf32, #tpu.memory_space<vmem>>, vector<64x36xf32>
    %cst_14 = arith.constant dense<0.000000e+00> : vector<64x36xf32>
    %16 = tpu.matmul %14, %15, %cst_14 {dimension_numbers = #tpu.dot_dimension_numbers<[1], [0], [0], [1], [0, 0, 1, 1], [], []>} : vector<64x64xf32>, vector<64x36xf32>, vector<64x36xf32> -> vector<64x36xf32>
    %c0_15 = arith.constant 0 : index
    %c0_16 = arith.constant 0 : index
    %17 = vector.load %arg7[%c0_15, %c0_16] : memref<1x36xf32, #tpu.memory_space<vmem>>, vector<1x36xf32>
    %18 = vector.broadcast %17 : vector<1x36xf32> to vector<64x36xf32>
    %19 = arith.addf %16, %18 : vector<64x36xf32>
    %c0_17 = arith.constant 0 : index
    %c0_18 = arith.constant 0 : index
    %20 = vector.load %arg8[%c0_17, %c0_18] : memref<64x36xf32, #tpu.memory_space<vmem>>, vector<64x36xf32>
    tpu.vector_store %arg8[%c0_17, %c0_18], %19 {strides = array<i32>} : memref<64x36xf32, #tpu.memory_space<vmem>>, vector<64x36xf32>,
    return
  }
  func.func @transform_0(%arg0: i32) -> (i32, i32) {
    %c0_i32 = arith.constant 0 : i32
    %c0_i32_0 = arith.constant 0 : i32
    return %arg0, %c0_i32 : i32, i32
  }
  func.func @transform_1(%arg0: i32) -> (i32, i32) {
    %c0_i32 = arith.constant 0 : i32
    %c0_i32_0 = arith.constant 0 : i32
    %c0_i32_1 = arith.constant 0 : i32
    return %c0_i32, %c0_i32_0 : i32, i32
  }
  func.func @transform_2(%arg0: i32) -> (i32, i32) {
    %c0_i32 = arith.constant 0 : i32
    %c0_i32_0 = arith.constant 0 : i32
    %c0_i32_1 = arith.constant 0 : i32
    return %c0_i32, %c0_i32_0 : i32, i32
  }
  func.func @transform_3(%arg0: i32) -> (i32, i32) {
    %c0_i32 = arith.constant 0 : i32
    %c0_i32_0 = arith.constant 0 : i32
    %c0_i32_1 = arith.constant 0 : i32
    return %c0_i32, %c0_i32_0 : i32, i32
  }
  func.func @transform_4(%arg0: i32) -> (i32, i32) {
    %c0_i32 = arith.constant 0 : i32
    %c0_i32_0 = arith.constant 0 : i32
    %c0_i32_1 = arith.constant 0 : i32
    return %c0_i32, %c0_i32_0 : i32, i32
  }
  func.func @transform_5(%arg0: i32) -> (i32, i32) {
    %c0_i32 = arith.constant 0 : i32
    %c0_i32_0 = arith.constant 0 : i32
    %c0_i32_1 = arith.constant 0 : i32
    return %c0_i32, %c0_i32_0 : i32, i32
  }
  func.func @transform_6(%arg0: i32) -> (i32, i32) {
    %c0_i32 = arith.constant 0 : i32
    %c0_i32_0 = arith.constant 0 : i32
    %c0_i32_1 = arith.constant 0 : i32
    return %c0_i32, %c0_i32_0 : i32, i32
  }
  func.func @transform_7(%arg0: i32) -> (i32, i32) {
    %c0_i32 = arith.constant 0 : i32
    %c0_i32_0 = arith.constant 0 : i32
    return %arg0, %c0_i32 : i32, i32
  }
}

module attributes {stable_mosaic.version = 11 : i64} {
  func.func @_layer_kernel(%arg0: i32, %arg1: memref<128x32xf32, #tpu.memory_space<vmem>>, %arg2: memref<64x32xf32, #tpu.memory_space<vmem>>, %arg3: memref<64x8xi32, #tpu.memory_space<vmem>>, %arg4: memref<1x32xf32, #tpu.memory_space<vmem>>, %arg5: memref<1x32xf32, #tpu.memory_space<vmem>>, %arg6: memref<32x32xf32, #tpu.memory_space<vmem>>, %arg7: memref<1x32xf32, #tpu.memory_space<vmem>>, %arg8: memref<32x32xf32, #tpu.memory_space<vmem>>, %arg9: memref<1x32xf32, #tpu.memory_space<vmem>>, %arg10: memref<32x32xf32, #tpu.memory_space<vmem>>, %arg11: memref<1x32xf32, #tpu.memory_space<vmem>>, %arg12: memref<32x32xf32, #tpu.memory_space<vmem>>, %arg13: memref<1x32xf32, #tpu.memory_space<vmem>>, %arg14: memref<1x32xf32, #tpu.memory_space<vmem>>, %arg15: memref<1x32xf32, #tpu.memory_space<vmem>>, %arg16: memref<32x64xf32, #tpu.memory_space<vmem>>, %arg17: memref<1x64xf32, #tpu.memory_space<vmem>>, %arg18: memref<64x32xf32, #tpu.memory_space<vmem>>, %arg19: memref<1x32xf32, #tpu.memory_space<vmem>>, %arg20: memref<64x32xf32, #tpu.memory_space<vmem>>) attributes {dimension_semantics = [#tpu.dimension_semantics<parallel>], iteration_bounds = array<i64: 2>, scalar_prefetch = 0 : i64, scratch_operands = 0 : i64, tpu.core_type = #tpu.core_type<tc>, window_params = [{pipeline_mode = #tpu.pipeline_mode<synchronous>, transform_indices = @transform_0, window_bounds = array<i64: 128, 32>}, {transform_indices = @transform_1, window_bounds = array<i64: 64, 32>}, {transform_indices = @transform_2, window_bounds = array<i64: 64, 8>}, {pipeline_mode = #tpu.pipeline_mode<synchronous>, transform_indices = @transform_3, window_bounds = array<i64: 1, 32>}, {pipeline_mode = #tpu.pipeline_mode<synchronous>, transform_indices = @transform_4, window_bounds = array<i64: 1, 32>}, {pipeline_mode = #tpu.pipeline_mode<synchronous>, transform_indices = @transform_5, window_bounds = array<i64: 32, 32>}, {pipeline_mode = #tpu.pipeline_mode<synchronous>, transform_indices = @transform_6, window_bounds = array<i64: 1, 32>}, {pipeline_mode = #tpu.pipeline_mode<synchronous>, transform_indices = @transform_7, window_bounds = array<i64: 32, 32>}, {pipeline_mode = #tpu.pipeline_mode<synchronous>, transform_indices = @transform_8, window_bounds = array<i64: 1, 32>}, {pipeline_mode = #tpu.pipeline_mode<synchronous>, transform_indices = @transform_9, window_bounds = array<i64: 32, 32>}, {pipeline_mode = #tpu.pipeline_mode<synchronous>, transform_indices = @transform_10, window_bounds = array<i64: 1, 32>}, {pipeline_mode = #tpu.pipeline_mode<synchronous>, transform_indices = @transform_11, window_bounds = array<i64: 32, 32>}, {pipeline_mode = #tpu.pipeline_mode<synchronous>, transform_indices = @transform_12, window_bounds = array<i64: 1, 32>}, {pipeline_mode = #tpu.pipeline_mode<synchronous>, transform_indices = @transform_13, window_bounds = array<i64: 1, 32>}, {pipeline_mode = #tpu.pipeline_mode<synchronous>, transform_indices = @transform_14, window_bounds = array<i64: 1, 32>}, {pipeline_mode = #tpu.pipeline_mode<synchronous>, transform_indices = @transform_15, window_bounds = array<i64: 32, 64>}, {pipeline_mode = #tpu.pipeline_mode<synchronous>, transform_indices = @transform_16, window_bounds = array<i64: 1, 64>}, {pipeline_mode = #tpu.pipeline_mode<synchronous>, transform_indices = @transform_17, window_bounds = array<i64: 64, 32>}, {pipeline_mode = #tpu.pipeline_mode<synchronous>, transform_indices = @transform_18, window_bounds = array<i64: 1, 32>}, {transform_indices = @transform_19, window_bounds = array<i64: 64, 32>}]} {
    %c0 = arith.constant 0 : index
    %c0_0 = arith.constant 0 : index
    %0 = vector.load %arg1[%c0, %c0_0] : memref<128x32xf32, #tpu.memory_space<vmem>>, vector<128x32xf32>
    %c0_1 = arith.constant 0 : index
    %c0_2 = arith.constant 0 : index
    %1 = vector.load %arg2[%c0_1, %c0_2] : memref<64x32xf32, #tpu.memory_space<vmem>>, vector<64x32xf32>
    %cst = arith.constant dense<0.000000e+00> : vector<128xf32>
    %2 = vector.multi_reduction <add>, %0, %cst [1] : vector<128x32xf32> to vector<128xf32>
    %3 = vector.shape_cast %2 : vector<128xf32> to vector<128x1xf32>
    %cst_3 = arith.constant 3.200000e+01 : f32
    %4 = vector.broadcast %cst_3 : f32 to vector<128x1xf32>
    %5 = arith.divf %3, %4 : vector<128x1xf32>
    %6 = vector.broadcast %5 : vector<128x1xf32> to vector<128x32xf32>
    %7 = arith.subf %0, %6 : vector<128x32xf32>
    %8 = vector.broadcast %5 : vector<128x1xf32> to vector<128x32xf32>
    %9 = arith.subf %0, %8 : vector<128x32xf32>
    %10 = arith.mulf %7, %9 : vector<128x32xf32>
    %cst_4 = arith.constant dense<0.000000e+00> : vector<128xf32>
    %11 = vector.multi_reduction <add>, %10, %cst_4 [1] : vector<128x32xf32> to vector<128xf32>
    %12 = vector.shape_cast %11 : vector<128xf32> to vector<128x1xf32>
    %cst_5 = arith.constant 3.200000e+01 : f32
    %13 = vector.broadcast %cst_5 : f32 to vector<128x1xf32>
    %14 = arith.divf %12, %13 : vector<128x1xf32>
    %15 = vector.broadcast %5 : vector<128x1xf32> to vector<128x32xf32>
    %16 = arith.subf %0, %15 : vector<128x32xf32>
    %cst_6 = arith.constant 9.99999974E-6 : f32
    %17 = vector.broadcast %cst_6 : f32 to vector<128x1xf32>
    %18 = arith.addf %14, %17 : vector<128x1xf32>
    %19 = math.rsqrt %18 : vector<128x1xf32>
    %20 = vector.broadcast %19 : vector<128x1xf32> to vector<128x32xf32>
    %21 = arith.mulf %16, %20 : vector<128x32xf32>
    %c0_7 = arith.constant 0 : index
    %c0_8 = arith.constant 0 : index
    %22 = vector.load %arg4[%c0_7, %c0_8] : memref<1x32xf32, #tpu.memory_space<vmem>>, vector<1x32xf32>
    %23 = vector.broadcast %22 : vector<1x32xf32> to vector<128x32xf32>
    %24 = arith.mulf %21, %23 : vector<128x32xf32>
    %c0_9 = arith.constant 0 : index
    %c0_10 = arith.constant 0 : index
    %25 = vector.load %arg5[%c0_9, %c0_10] : memref<1x32xf32, #tpu.memory_space<vmem>>, vector<1x32xf32>
    %26 = vector.broadcast %25 : vector<1x32xf32> to vector<128x32xf32>
    %27 = arith.addf %24, %26 : vector<128x32xf32>
    %cst_11 = arith.constant dense<0.000000e+00> : vector<64xf32>
    %28 = vector.multi_reduction <add>, %1, %cst_11 [1] : vector<64x32xf32> to vector<64xf32>
    %29 = vector.shape_cast %28 : vector<64xf32> to vector<64x1xf32>
    %cst_12 = arith.constant 3.200000e+01 : f32
    %30 = vector.broadcast %cst_12 : f32 to vector<64x1xf32>
    %31 = arith.divf %29, %30 : vector<64x1xf32>
    %32 = vector.broadcast %31 : vector<64x1xf32> to vector<64x32xf32>
    %33 = arith.subf %1, %32 : vector<64x32xf32>
    %34 = vector.broadcast %31 : vector<64x1xf32> to vector<64x32xf32>
    %35 = arith.subf %1, %34 : vector<64x32xf32>
    %36 = arith.mulf %33, %35 : vector<64x32xf32>
    %cst_13 = arith.constant dense<0.000000e+00> : vector<64xf32>
    %37 = vector.multi_reduction <add>, %36, %cst_13 [1] : vector<64x32xf32> to vector<64xf32>
    %38 = vector.shape_cast %37 : vector<64xf32> to vector<64x1xf32>
    %cst_14 = arith.constant 3.200000e+01 : f32
    %39 = vector.broadcast %cst_14 : f32 to vector<64x1xf32>
    %40 = arith.divf %38, %39 : vector<64x1xf32>
    %41 = vector.broadcast %31 : vector<64x1xf32> to vector<64x32xf32>
    %42 = arith.subf %1, %41 : vector<64x32xf32>
    %cst_15 = arith.constant 9.99999974E-6 : f32
    %43 = vector.broadcast %cst_15 : f32 to vector<64x1xf32>
    %44 = arith.addf %40, %43 : vector<64x1xf32>
    %45 = math.rsqrt %44 : vector<64x1xf32>
    %46 = vector.broadcast %45 : vector<64x1xf32> to vector<64x32xf32>
    %47 = arith.mulf %42, %46 : vector<64x32xf32>
    %c0_16 = arith.constant 0 : index
    %c0_17 = arith.constant 0 : index
    %48 = vector.load %arg4[%c0_16, %c0_17] : memref<1x32xf32, #tpu.memory_space<vmem>>, vector<1x32xf32>
    %49 = vector.broadcast %48 : vector<1x32xf32> to vector<64x32xf32>
    %50 = arith.mulf %47, %49 : vector<64x32xf32>
    %c0_18 = arith.constant 0 : index
    %c0_19 = arith.constant 0 : index
    %51 = vector.load %arg5[%c0_18, %c0_19] : memref<1x32xf32, #tpu.memory_space<vmem>>, vector<1x32xf32>
    %52 = vector.broadcast %51 : vector<1x32xf32> to vector<64x32xf32>
    %53 = arith.addf %50, %52 : vector<64x32xf32>
    %c0_20 = arith.constant 0 : index
    %c0_21 = arith.constant 0 : index
    %54 = vector.load %arg8[%c0_20, %c0_21] : memref<32x32xf32, #tpu.memory_space<vmem>>, vector<32x32xf32>
    %cst_22 = arith.constant dense<0.000000e+00> : vector<128x32xf32>
    %55 = tpu.matmul %27, %54, %cst_22 {dimension_numbers = #tpu.dot_dimension_numbers<[1], [0], [0], [1], [0, 0, 1, 1], [], []>} : vector<128x32xf32>, vector<32x32xf32>, vector<128x32xf32> -> vector<128x32xf32>
    %c0_23 = arith.constant 0 : index
    %c0_24 = arith.constant 0 : index
    %56 = vector.load %arg9[%c0_23, %c0_24] : memref<1x32xf32, #tpu.memory_space<vmem>>, vector<1x32xf32>
    %57 = vector.broadcast %56 : vector<1x32xf32> to vector<128x32xf32>
    %58 = arith.addf %55, %57 : vector<128x32xf32>
    %c0_25 = arith.constant 0 : index
    %c0_26 = arith.constant 0 : index
    %59 = vector.load %arg10[%c0_25, %c0_26] : memref<32x32xf32, #tpu.memory_space<vmem>>, vector<32x32xf32>
    %cst_27 = arith.constant dense<0.000000e+00> : vector<128x32xf32>
    %60 = tpu.matmul %27, %59, %cst_27 {dimension_numbers = #tpu.dot_dimension_numbers<[1], [0], [0], [1], [0, 0, 1, 1], [], []>} : vector<128x32xf32>, vector<32x32xf32>, vector<128x32xf32> -> vector<128x32xf32>
    %c0_28 = arith.constant 0 : index
    %c0_29 = arith.constant 0 : index
    %61 = vector.load %arg11[%c0_28, %c0_29] : memref<1x32xf32, #tpu.memory_space<vmem>>, vector<1x32xf32>
    %62 = vector.broadcast %61 : vector<1x32xf32> to vector<128x32xf32>
    %63 = arith.addf %60, %62 : vector<128x32xf32>
    %c0_30 = arith.constant 0 : index
    %c0_31 = arith.constant 0 : index
    %64 = vector.load %arg6[%c0_30, %c0_31] : memref<32x32xf32, #tpu.memory_space<vmem>>, vector<32x32xf32>
    %cst_32 = arith.constant dense<0.000000e+00> : vector<64x32xf32>
    %65 = tpu.matmul %53, %64, %cst_32 {dimension_numbers = #tpu.dot_dimension_numbers<[1], [0], [0], [1], [0, 0, 1, 1], [], []>} : vector<64x32xf32>, vector<32x32xf32>, vector<64x32xf32> -> vector<64x32xf32>
    %c0_33 = arith.constant 0 : index
    %c0_34 = arith.constant 0 : index
    %66 = vector.load %arg7[%c0_33, %c0_34] : memref<1x32xf32, #tpu.memory_space<vmem>>, vector<1x32xf32>
    %67 = vector.broadcast %66 : vector<1x32xf32> to vector<64x32xf32>
    %68 = arith.addf %65, %67 : vector<64x32xf32>
    "tpu.trace_start"() <{level = 10 : i32, message = "td,nd->tn"}> : () -> ()
    %cst_35 = arith.constant dense<0.000000e+00> : vector<64x128xf32>
    %69 = tpu.matmul %68, %58, %cst_35 {dimension_numbers = #tpu.dot_dimension_numbers<[1], [1], [0], [0], [0, 0, 1, 0], [], []>} : vector<64x32xf32>, vector<128x32xf32>, vector<64x128xf32> -> vector<64x128xf32>
    "tpu.trace_stop"() : () -> ()
    %c0_36 = arith.constant 0 : index
    %c0_37 = arith.constant 0 : index
    %70 = vector.load %arg3[%c0_36, %c0_37] : memref<64x8xi32, #tpu.memory_space<vmem>>, vector<64x8xi32>
    %71 = tpu.iota {dimensions = array<i32: 1>} : vector<64x128xi32>
    %cst_38 = arith.constant 0.000000e+00 : f32
    %72 = vector.broadcast %cst_38 : f32 to vector<64x128xf32>
    %73 = vector.extract_strided_slice %70 {offsets = [0, 0], sizes = [64, 1], strides = [1, 1]} : vector<64x8xi32> to vector<64x1xi32>
    %74 = vector.broadcast %73 : vector<64x1xi32> to vector<64x128xi32>
    %75 = arith.cmpi eq, %71, %74 : vector<64x128xi32>
    %76 = arith.extui %75 : vector<64x128xi1> to vector<64x128xi32>
    %77 = arith.sitofp %76 : vector<64x128xi32> to vector<64x128xf32>
    %78 = arith.addf %72, %77 : vector<64x128xf32>
    %79 = vector.extract_strided_slice %70 {offsets = [0, 1], sizes = [64, 1], strides = [1, 1]} : vector<64x8xi32> to vector<64x1xi32>
    %80 = vector.broadcast %79 : vector<64x1xi32> to vector<64x128xi32>
    %81 = arith.cmpi eq, %71, %80 : vector<64x128xi32>
    %82 = arith.extui %81 : vector<64x128xi1> to vector<64x128xi32>
    %83 = arith.sitofp %82 : vector<64x128xi32> to vector<64x128xf32>
    %84 = arith.addf %78, %83 : vector<64x128xf32>
    %85 = vector.extract_strided_slice %70 {offsets = [0, 2], sizes = [64, 1], strides = [1, 1]} : vector<64x8xi32> to vector<64x1xi32>
    %86 = vector.broadcast %85 : vector<64x1xi32> to vector<64x128xi32>
    %87 = arith.cmpi eq, %71, %86 : vector<64x128xi32>
    %88 = arith.extui %87 : vector<64x128xi1> to vector<64x128xi32>
    %89 = arith.sitofp %88 : vector<64x128xi32> to vector<64x128xf32>
    %90 = arith.addf %84, %89 : vector<64x128xf32>
    %91 = vector.extract_strided_slice %70 {offsets = [0, 3], sizes = [64, 1], strides = [1, 1]} : vector<64x8xi32> to vector<64x1xi32>
    %92 = vector.broadcast %91 : vector<64x1xi32> to vector<64x128xi32>
    %93 = arith.cmpi eq, %71, %92 : vector<64x128xi32>
    %94 = arith.extui %93 : vector<64x128xi1> to vector<64x128xi32>
    %95 = arith.sitofp %94 : vector<64x128xi32> to vector<64x128xf32>
    %96 = arith.addf %90, %95 : vector<64x128xf32>
    %97 = vector.extract_strided_slice %70 {offsets = [0, 4], sizes = [64, 1], strides = [1, 1]} : vector<64x8xi32> to vector<64x1xi32>
    %98 = vector.broadcast %97 : vector<64x1xi32> to vector<64x128xi32>
    %99 = arith.cmpi eq, %71, %98 : vector<64x128xi32>
    %100 = arith.extui %99 : vector<64x128xi1> to vector<64x128xi32>
    %101 = arith.sitofp %100 : vector<64x128xi32> to vector<64x128xf32>
    %102 = arith.addf %96, %101 : vector<64x128xf32>
    %103 = vector.extract_strided_slice %70 {offsets = [0, 5], sizes = [64, 1], strides = [1, 1]} : vector<64x8xi32> to vector<64x1xi32>
    %104 = vector.broadcast %103 : vector<64x1xi32> to vector<64x128xi32>
    %105 = arith.cmpi eq, %71, %104 : vector<64x128xi32>
    %106 = arith.extui %105 : vector<64x128xi1> to vector<64x128xi32>
    %107 = arith.sitofp %106 : vector<64x128xi32> to vector<64x128xf32>
    %108 = arith.addf %102, %107 : vector<64x128xf32>
    %109 = vector.extract_strided_slice %70 {offsets = [0, 6], sizes = [64, 1], strides = [1, 1]} : vector<64x8xi32> to vector<64x1xi32>
    %110 = vector.broadcast %109 : vector<64x1xi32> to vector<64x128xi32>
    %111 = arith.cmpi eq, %71, %110 : vector<64x128xi32>
    %112 = arith.extui %111 : vector<64x128xi1> to vector<64x128xi32>
    %113 = arith.sitofp %112 : vector<64x128xi32> to vector<64x128xf32>
    %114 = arith.addf %108, %113 : vector<64x128xf32>
    %115 = vector.extract_strided_slice %70 {offsets = [0, 7], sizes = [64, 1], strides = [1, 1]} : vector<64x8xi32> to vector<64x1xi32>
    %116 = vector.broadcast %115 : vector<64x1xi32> to vector<64x128xi32>
    %117 = arith.cmpi eq, %71, %116 : vector<64x128xi32>
    %118 = arith.extui %117 : vector<64x128xi1> to vector<64x128xi32>
    %119 = arith.sitofp %118 : vector<64x128xi32> to vector<64x128xf32>
    %120 = arith.addf %114, %119 : vector<64x128xf32>
    %cst_39 = arith.constant 0.000000e+00 : f32
    %121 = vector.broadcast %cst_39 : f32 to vector<64x128xf32>
    %122 = arith.cmpf ogt, %120, %121 : vector<64x128xf32>
    %cst_40 = arith.constant -1.000000e+30 : f32
    %123 = vector.broadcast %cst_40 : f32 to vector<64x128xf32>
    %124 = arith.select %122, %69, %123 : vector<64x128xi1>, vector<64x128xf32>
    %cst_41 = arith.constant dense<0xFF800000> : vector<64xf32>
    %125 = vector.multi_reduction <maximumf>, %124, %cst_41 [1] : vector<64x128xf32> to vector<64xf32>
    %126 = vector.shape_cast %125 : vector<64xf32> to vector<64x1xf32>
    %127 = vector.broadcast %126 : vector<64x1xf32> to vector<64x128xf32>
    %128 = arith.subf %124, %127 : vector<64x128xf32>
    %129 = math.exp %128 : vector<64x128xf32>
    %130 = arith.mulf %129, %120 : vector<64x128xf32>
    %cst_42 = arith.constant dense<0.000000e+00> : vector<64xf32>
    %131 = vector.multi_reduction <add>, %130, %cst_42 [1] : vector<64x128xf32> to vector<64xf32>
    %132 = vector.shape_cast %131 : vector<64xf32> to vector<64x1xf32>
    %133 = tpu.reciprocal %132 {approx = true} : vector<64x1xf32> -> vector<64x1xf32>
    %134 = vector.broadcast %133 : vector<64x1xf32> to vector<64x128xf32>
    %135 = arith.mulf %130, %134 : vector<64x128xf32>
    %cst_43 = arith.constant dense<0.000000e+00> : vector<64x32xf32>
    %136 = tpu.matmul %135, %63, %cst_43 {dimension_numbers = #tpu.dot_dimension_numbers<[1], [0], [0], [1], [0, 0, 1, 1], [], []>} : vector<64x128xf32>, vector<128x32xf32>, vector<64x32xf32> -> vector<64x32xf32>
    %c0_44 = arith.constant 0 : index
    %c0_45 = arith.constant 0 : index
    %137 = vector.load %arg12[%c0_44, %c0_45] : memref<32x32xf32, #tpu.memory_space<vmem>>, vector<32x32xf32>
    %cst_46 = arith.constant dense<0.000000e+00> : vector<64x32xf32>
    %138 = tpu.matmul %136, %137, %cst_46 {dimension_numbers = #tpu.dot_dimension_numbers<[1], [0], [0], [1], [0, 0, 1, 1], [], []>} : vector<64x32xf32>, vector<32x32xf32>, vector<64x32xf32> -> vector<64x32xf32>
    %139 = arith.addf %1, %138 : vector<64x32xf32>
    %c0_47 = arith.constant 0 : index
    %c0_48 = arith.constant 0 : index
    %140 = vector.load %arg13[%c0_47, %c0_48] : memref<1x32xf32, #tpu.memory_space<vmem>>, vector<1x32xf32>
    %141 = vector.broadcast %140 : vector<1x32xf32> to vector<64x32xf32>
    %142 = arith.addf %139, %141 : vector<64x32xf32>
    %cst_49 = arith.constant dense<0.000000e+00> : vector<64xf32>
    %143 = vector.multi_reduction <add>, %142, %cst_49 [1] : vector<64x32xf32> to vector<64xf32>
    %144 = vector.shape_cast %143 : vector<64xf32> to vector<64x1xf32>
    %cst_50 = arith.constant 3.200000e+01 : f32
    %145 = vector.broadcast %cst_50 : f32 to vector<64x1xf32>
    %146 = arith.divf %144, %145 : vector<64x1xf32>
    %147 = vector.broadcast %146 : vector<64x1xf32> to vector<64x32xf32>
    %148 = arith.subf %142, %147 : vector<64x32xf32>
    %149 = vector.broadcast %146 : vector<64x1xf32> to vector<64x32xf32>
    %150 = arith.subf %142, %149 : vector<64x32xf32>
    %151 = arith.mulf %148, %150 : vector<64x32xf32>
    %cst_51 = arith.constant dense<0.000000e+00> : vector<64xf32>
    %152 = vector.multi_reduction <add>, %151, %cst_51 [1] : vector<64x32xf32> to vector<64xf32>
    %153 = vector.shape_cast %152 : vector<64xf32> to vector<64x1xf32>
    %cst_52 = arith.constant 3.200000e+01 : f32
    %154 = vector.broadcast %cst_52 : f32 to vector<64x1xf32>
    %155 = arith.divf %153, %154 : vector<64x1xf32>
    %156 = vector.broadcast %146 : vector<64x1xf32> to vector<64x32xf32>
    %157 = arith.subf %142, %156 : vector<64x32xf32>
    %cst_53 = arith.constant 9.99999974E-6 : f32
    %158 = vector.broadcast %cst_53 : f32 to vector<64x1xf32>
    %159 = arith.addf %155, %158 : vector<64x1xf32>
    %160 = math.rsqrt %159 : vector<64x1xf32>
    %161 = vector.broadcast %160 : vector<64x1xf32> to vector<64x32xf32>
    %162 = arith.mulf %157, %161 : vector<64x32xf32>
    %c0_54 = arith.constant 0 : index
    %c0_55 = arith.constant 0 : index
    %163 = vector.load %arg14[%c0_54, %c0_55] : memref<1x32xf32, #tpu.memory_space<vmem>>, vector<1x32xf32>
    %164 = vector.broadcast %163 : vector<1x32xf32> to vector<64x32xf32>
    %165 = arith.mulf %162, %164 : vector<64x32xf32>
    %c0_56 = arith.constant 0 : index
    %c0_57 = arith.constant 0 : index
    %166 = vector.load %arg15[%c0_56, %c0_57] : memref<1x32xf32, #tpu.memory_space<vmem>>, vector<1x32xf32>
    %167 = vector.broadcast %166 : vector<1x32xf32> to vector<64x32xf32>
    %168 = arith.addf %165, %167 : vector<64x32xf32>
    %c0_58 = arith.constant 0 : index
    %c0_59 = arith.constant 0 : index
    %169 = vector.load %arg16[%c0_58, %c0_59] : memref<32x64xf32, #tpu.memory_space<vmem>>, vector<32x64xf32>
    %cst_60 = arith.constant dense<0.000000e+00> : vector<64x64xf32>
    %170 = tpu.matmul %168, %169, %cst_60 {dimension_numbers = #tpu.dot_dimension_numbers<[1], [0], [0], [1], [0, 0, 1, 1], [], []>} : vector<64x32xf32>, vector<32x64xf32>, vector<64x64xf32> -> vector<64x64xf32>
    %c0_61 = arith.constant 0 : index
    %c0_62 = arith.constant 0 : index
    %171 = vector.load %arg17[%c0_61, %c0_62] : memref<1x64xf32, #tpu.memory_space<vmem>>, vector<1x64xf32>
    %172 = vector.broadcast %171 : vector<1x64xf32> to vector<64x64xf32>
    %173 = arith.addf %170, %172 : vector<64x64xf32>
    %cst_63 = arith.constant 0.000000e+00 : f32
    %174 = vector.broadcast %cst_63 : f32 to vector<64x64xf32>
    %175 = arith.maximumf %173, %174 : vector<64x64xf32>
    %c0_64 = arith.constant 0 : index
    %c0_65 = arith.constant 0 : index
    %176 = vector.load %arg18[%c0_64, %c0_65] : memref<64x32xf32, #tpu.memory_space<vmem>>, vector<64x32xf32>
    %cst_66 = arith.constant dense<0.000000e+00> : vector<64x32xf32>
    %177 = tpu.matmul %175, %176, %cst_66 {dimension_numbers = #tpu.dot_dimension_numbers<[1], [0], [0], [1], [0, 0, 1, 1], [], []>} : vector<64x64xf32>, vector<64x32xf32>, vector<64x32xf32> -> vector<64x32xf32>
    %c0_67 = arith.constant 0 : index
    %c0_68 = arith.constant 0 : index
    %178 = vector.load %arg19[%c0_67, %c0_68] : memref<1x32xf32, #tpu.memory_space<vmem>>, vector<1x32xf32>
    %179 = vector.broadcast %178 : vector<1x32xf32> to vector<64x32xf32>
    %180 = arith.addf %177, %179 : vector<64x32xf32>
    %181 = arith.addf %142, %180 : vector<64x32xf32>
    %c0_69 = arith.constant 0 : index
    %c0_70 = arith.constant 0 : index
    %182 = vector.load %arg20[%c0_69, %c0_70] : memref<64x32xf32, #tpu.memory_space<vmem>>, vector<64x32xf32>
    tpu.vector_store %arg20[%c0_69, %c0_70], %181 {strides = array<i32>} : memref<64x32xf32, #tpu.memory_space<vmem>>, vector<64x32xf32>,
    return
  }
  func.func @transform_0(%arg0: i32) -> (i32, i32) {
    %c0_i32 = arith.constant 0 : i32
    %c0_i32_0 = arith.constant 0 : i32
    %c0_i32_1 = arith.constant 0 : i32
    return %c0_i32, %c0_i32_0 : i32, i32
  }
  func.func @transform_1(%arg0: i32) -> (i32, i32) {
    %c0_i32 = arith.constant 0 : i32
    %c0_i32_0 = arith.constant 0 : i32
    return %arg0, %c0_i32 : i32, i32
  }
  func.func @transform_2(%arg0: i32) -> (i32, i32) {
    %c0_i32 = arith.constant 0 : i32
    %c0_i32_0 = arith.constant 0 : i32
    return %arg0, %c0_i32 : i32, i32
  }
  func.func @transform_3(%arg0: i32) -> (i32, i32) {
    %c0_i32 = arith.constant 0 : i32
    %c0_i32_0 = arith.constant 0 : i32
    %c0_i32_1 = arith.constant 0 : i32
    return %c0_i32, %c0_i32_0 : i32, i32
  }
  func.func @transform_4(%arg0: i32) -> (i32, i32) {
    %c0_i32 = arith.constant 0 : i32
    %c0_i32_0 = arith.constant 0 : i32
    %c0_i32_1 = arith.constant 0 : i32
    return %c0_i32, %c0_i32_0 : i32, i32
  }
  func.func @transform_5(%arg0: i32) -> (i32, i32) {
    %c0_i32 = arith.constant 0 : i32
    %c0_i32_0 = arith.constant 0 : i32
    %c0_i32_1 = arith.constant 0 : i32
    return %c0_i32, %c0_i32_0 : i32, i32
  }
  func.func @transform_6(%arg0: i32) -> (i32, i32) {
    %c0_i32 = arith.constant 0 : i32
    %c0_i32_0 = arith.constant 0 : i32
    %c0_i32_1 = arith.constant 0 : i32
    return %c0_i32, %c0_i32_0 : i32, i32
  }
  func.func @transform_7(%arg0: i32) -> (i32, i32) {
    %c0_i32 = arith.constant 0 : i32
    %c0_i32_0 = arith.constant 0 : i32
    %c0_i32_1 = arith.constant 0 : i32
    return %c0_i32, %c0_i32_0 : i32, i32
  }
  func.func @transform_8(%arg0: i32) -> (i32, i32) {
    %c0_i32 = arith.constant 0 : i32
    %c0_i32_0 = arith.constant 0 : i32
    %c0_i32_1 = arith.constant 0 : i32
    return %c0_i32, %c0_i32_0 : i32, i32
  }
  func.func @transform_9(%arg0: i32) -> (i32, i32) {
    %c0_i32 = arith.constant 0 : i32
    %c0_i32_0 = arith.constant 0 : i32
    %c0_i32_1 = arith.constant 0 : i32
    return %c0_i32, %c0_i32_0 : i32, i32
  }
  func.func @transform_10(%arg0: i32) -> (i32, i32) {
    %c0_i32 = arith.constant 0 : i32
    %c0_i32_0 = arith.constant 0 : i32
    %c0_i32_1 = arith.constant 0 : i32
    return %c0_i32, %c0_i32_0 : i32, i32
  }
  func.func @transform_11(%arg0: i32) -> (i32, i32) {
    %c0_i32 = arith.constant 0 : i32
    %c0_i32_0 = arith.constant 0 : i32
    %c0_i32_1 = arith.constant 0 : i32
    return %c0_i32, %c0_i32_0 : i32, i32
  }
  func.func @transform_12(%arg0: i32) -> (i32, i32) {
    %c0_i32 = arith.constant 0 : i32
    %c0_i32_0 = arith.constant 0 : i32
    %c0_i32_1 = arith.constant 0 : i32
    return %c0_i32, %c0_i32_0 : i32, i32
  }
  func.func @transform_13(%arg0: i32) -> (i32, i32) {
    %c0_i32 = arith.constant 0 : i32
    %c0_i32_0 = arith.constant 0 : i32
    %c0_i32_1 = arith.constant 0 : i32
    return %c0_i32, %c0_i32_0 : i32, i32
  }
  func.func @transform_14(%arg0: i32) -> (i32, i32) {
    %c0_i32 = arith.constant 0 : i32
    %c0_i32_0 = arith.constant 0 : i32
    %c0_i32_1 = arith.constant 0 : i32
    return %c0_i32, %c0_i32_0 : i32, i32
  }
  func.func @transform_15(%arg0: i32) -> (i32, i32) {
    %c0_i32 = arith.constant 0 : i32
    %c0_i32_0 = arith.constant 0 : i32
    %c0_i32_1 = arith.constant 0 : i32
    return %c0_i32, %c0_i32_0 : i32, i32
  }
  func.func @transform_16(%arg0: i32) -> (i32, i32) {
    %c0_i32 = arith.constant 0 : i32
    %c0_i32_0 = arith.constant 0 : i32
    %c0_i32_1 = arith.constant 0 : i32
    return %c0_i32, %c0_i32_0 : i32, i32
  }
  func.func @transform_17(%arg0: i32) -> (i32, i32) {
    %c0_i32 = arith.constant 0 : i32
    %c0_i32_0 = arith.constant 0 : i32
    %c0_i32_1 = arith.constant 0 : i32
    return %c0_i32, %c0_i32_0 : i32, i32
  }
  func.func @transform_18(%arg0: i32) -> (i32, i32) {
    %c0_i32 = arith.constant 0 : i32
    %c0_i32_0 = arith.constant 0 : i32
    %c0_i32_1 = arith.constant 0 : i32
    return %c0_i32, %c0_i32_0 : i32, i32
  }
  func.func @transform_19(%arg0: i32) -> (i32, i32) {
    %c0_i32 = arith.constant 0 : i32
    %c0_i32_0 = arith.constant 0 : i32
    return %arg0, %c0_i32 : i32, i32
  }
}

</mosaic_0001>

<bundles_post_ra>
// kernel: cad_transformer_forward.4
= control target key start
LH: loop header
LB: loop body
LE: loop exit
PB: predicated region body
PF: predicated region fallthrough
CT: control target
= control target key end

     0   :  { %s1029_s17 = smov 0   ;;  %s1151_s0 = inlined_call_operand.vmem [shape: f32[128,3], index: 0, kind: input, shape index: {}]   ;;  %s1152_s1 = inlined_call_operand.vmem [shape: f32[128,2], index: 1, kind: input, shape index: {}]   ;;  %s1153_s2 = inlined_call_operand.vmem [shape: f32[3,8], index: 2, kind: input, shape index: {}]   ;;  %s1154_s3 = inlined_call_operand.vmem [shape: f32[1,8], index: 3, kind: input, shape index: {}]   ;;  %s1155_s4 = inlined_call_operand.vmem [shape: f32[8,16], index: 4, kind: input, shape index: {}]   ;;  %s1156_s5 = inlined_call_operand.vmem [shape: f32[1,16], index: 5, kind: input, shape index: {}]   ;;  %s1157_s6 = inlined_call_operand.vmem [shape: f32[16,32], index: 6, kind: input, shape index: {}]   ;;  %s1158_s7 = inlined_call_operand.vmem [shape: f32[2,32], index: 7, kind: input, shape index: {}]   ;;  %s1159_s8 = inlined_call_operand.vmem [shape: f32[1,32], index: 8, kind: input, shape index: {}]   ;;  %s1160_s9 = inlined_call_operand.vmem [shape: f32[32,32], index: 9, kind: input, shape index: {}]   ;;  %s1161_s10 = inlined_call_operand.vmem [shape: f32[1,32], index: 10, kind: input, shape index: {}]   ;;  %s1162_s11 = inlined_call_operand.vmem [shape: f32[128,32], index: 11, kind: output, shape index: {}]  }
   0x1 LB: > { %s891_s18 = sadd.s32 4294967295, %s967_s17   ;;  %p895_p0 = scmp.ge.s32.totalorder %s967_s17, 1  ;;  %s967_s17 = sphi %s1029_s17, %s21_s17  }
   0x2   : > { %p349_p1 = scmp.lt.s32.totalorder %s967_s17, 3 }
   0x4   : > { %p350_p2 = pnand %p895_p0, %p349_p1 }
   0x5   : > { %s896_s21 = sshll.u32 (!%p350_p2), %s891_s18, 3 }
   0x6   : > { %353 = sbr.rel (%p350_p2) target bundleno = 596 (0x254), region = 64  ;;  %p395_p3 = scmp.lt.s32.totalorder (!%p350_p2), %s896_s21, 15 }
   0xb   : > { %v420_v0 = vld [vmem:[%s1153_s2] sm:$0x7]  ;;  %vm450_vm0 = vcmask 1042432   ;;  %s1164_s21 = smov (!%p395_p3, %s896_s21), 15  ;;  %vm425_vm1 = vcmask 23552   ;;  %vm508_vm2 = vcmask 64512  }
   0xc   : > { %v503_v1 = vld [vmem:[%s1155_s4] sm:$0xff]  ;;  %902 = vmatpush.msk.msra.mxu0 %vm450_vm0, %v420_v0  ;;  %946 = vmatpush.msk.msra.mxu1 %vm450_vm0, %v420_v0  ;;  %s1043_s24 = sshll.u32 %s1164_s21, 3  ;;  %vm618_vm3 = vcmask 1041408   ;;  %v583_v26 = vld [vmem:[%s1157_s6 + $0x8] sm:$0xff]  ;;  %vm593_vm4 = vcmask 15360   ;;  %vm663_vm5 = vcmask 130048  }
   0xd   : > { %947 = vmatpush.msk.msra.mxu2 %vm450_vm0, %v420_v0  ;;  %948 = vmatpush.msk.msra.mxu3 %vm450_vm0, %v420_v0  ;;  %s398_s27 = scalar_lea.vmem %s1151_s0, %s1043_s24  ;;  %v957_v10 = vld [vmem:[%s1154_s3] ss:$0 sm:$0xff]  ;;  %s1081_s20 = scalar_lea.vmem %s1152_s1, %s1043_s24  ;;  %v744_v59 = vld [vmem:[%s1160_s9 + $0x18] sm:$0xff]  ;;  %v743_v60 = vld [vmem:[%s1160_s9 + $0x10] sm:$0xff]  ;;  %vm749_vm6 = vcmask 261120  }
   0xe   : > { %548 = vmatpush.msrb.mxu1 %v503_v1  ;;  %v412_v2 = vld [vmem:[%s398_s27] sm:$0xff]  ;;  %v414_v3 = vld [vmem:[%s398_s27 + $0x10] sm:$0xff]  ;;  %v413_v6 = vld [vmem:[%s398_s27 + $0x8] sm:$0xff]  ;;  %786 = vmatpush.msrb.mxu0 %v744_v59 }
   0xf   : > { %903 = vmatmul.msk.f32.vlgmr.msra.gmra.mxu0 %vm425_vm1, %v412_v2  ;;  %905 = vmatmul.msk.f32.vlgmr.msra.gmra.mxu1 %vm425_vm1, %v414_v3  ;;  %v416_v4 = vld [vmem:[%s398_s27 + $0x20] sm:$0xff]  ;;  %v418_v5 = vld [vmem:[%s398_s27 + $0x30] sm:$0xff]  ;;  %v415_v7 = vld [vmem:[%s398_s27 + $0x18] sm:$0xff] }
  0x10   : > { %907 = vmatmul.msk.f32.vlgmr.msra.gmra.mxu2 %vm425_vm1, %v416_v4  ;;  %909 = vmatmul.msk.f32.vlgmr.msra.gmra.mxu3 %vm425_vm1, %v418_v5  ;;  %v417_v8 = vld [vmem:[%s398_s27 + $0x28] sm:$0xff]  ;;  %v419_v9 = vld [vmem:[%s398_s27 + $0x38] sm:$0xff]  ;;  %v592_v25 = vld [vmem:[%s1158_s7] sm:$0x3] }
  0x11   : > { %v582_v27 = vld [vmem:[%s1157_s6] sm:$0xff]  ;;  %919 = vmatpush.msk.msrb.mxu2 %vm618_vm3, %v592_v25  ;;  %702 = vmatpush.msrb.mxu3 %v583_v26  ;;  %v585_v39 = vld [vmem:[%s1081_s20 + $0x8] sm:$0xff]  ;;  %v586_v40 = vld [vmem:[%s1081_s20 + $0x10] sm:$0xff] }
  0x12   : > { %v584_v38 = vld [vmem:[%s1081_s20] sm:$0xff]  ;;  %v587_v41 = vld [vmem:[%s1081_s20 + $0x18] sm:$0xff]  ;;  %v589_v50 = vld [vmem:[%s1081_s20 + $0x28] sm:$0xff]  ;;  %787 = vmatpush.msrb.mxu0 %v743_v60 }
  0x13   : > { %703 = vmatpush.msrb.mxu3 %v582_v27  ;;  %v958_v42 = vld [vmem:[%s1156_s5] ss:$0 sm:$0xff]  ;;  %v590_v54 = vld [vmem:[%s1081_s20 + $0x30] sm:$0xff]  ;;  %v591_v58 = vld [vmem:[%s1081_s20 + $0x38] sm:$0xff] }
  0x14   : > { %v588_v46 = vld [vmem:[%s1081_s20 + $0x20] sm:$0xff]  ;;  %v742_v61 = vld [vmem:[%s1160_s9 + $0x8] sm:$0xff]  ;;  %s410_s20 = scalar_lea.vmem %s1162_s11, %s1043_s24 }
  0x15   : > { %788 = vmatpush.msrb.mxu0 %v742_v61 }
  0x17   : > { %904 = vmatmul.msk.f32.gmra.mxu0 %vm425_vm1, %v413_v6  ;;  %906 = vmatmul.msk.f32.gmra.mxu1 %vm425_vm1, %v415_v7 }
  0x18   : > { %908 = vmatmul.msk.f32.gmra.mxu2 %vm425_vm1, %v417_v8  ;;  %910 = vmatmul.msk.f32.gmra.mxu3 %vm425_vm1, %v419_v9 }
  0x20   : > { %920 = vmatmul.msk.f32.vlgmr.msrb.gmra.mxu2 %vm593_vm4, %v584_v38 }
  0x28   : > { %921 = vmatmul.msk.f32.gmra.mxu2 %vm593_vm4, %v585_v39 }
  0x30   : > { %922 = vmatmul.msk.f32.gmra.mxu2 %vm593_vm4, %v586_v40 }
  0x38   : > { %923 = vmatmul.msk.f32.gmra.mxu2 %vm593_vm4, %v587_v41 }
  0x40   : > { %924 = vmatmul.msk.f32.gmra.mxu2 %vm593_vm4, %v588_v46 }
  0x48   : > { %925 = vmatmul.msk.f32.gmra.mxu2 %vm593_vm4, %v589_v50 }
  0x50   : > { %926 = vmatmul.msk.f32.gmra.mxu2 %vm593_vm4, %v590_v54 }
  0x58   : > { %927 = vmatmul.msk.f32.gmra.mxu2 %vm593_vm4, %v591_v58 }
  0x8c   : > { %v471_v11 = vpop.f32.mrf.mxu0  ;;  %v477_v15 = vpop.f32.mrf.mxu1 }
  0x8d   : > { %v472_v12 = vadd.f32 %v957_v10, %v471_v11  ;;  %v478_v18 = vadd.f32 %v957_v10, %v477_v15 }
  0x8f   : > { %v495_v13 = vmax.f32 %v472_v12, 0.0  ;;  %v497_v19 = vmax.f32 %v478_v18, 0.0 }
  0x91   : > { %911 = vmatmul.msk.f32.vlgmr.msrb.gmra.mxu1 %vm508_vm2, %v495_v13  ;;  %v959_v13 = vld [vmem:[%s1159_s8] ss:$0 sm:$0xff] }
  0x93   : > { %v483_v22 = vpop.f32.mrf.mxu2  ;;  %v489_v31 = vpop.f32.mrf.mxu3 }
  0x94   : > { %v474_v14 = vpop.f32.mrf.mxu0  ;;  %v480_v20 = vpop.f32.mrf.mxu1  ;;  %v484_v24 = vadd.f32 %v957_v10, %v483_v22  ;;  %v490_v33 = vadd.f32 %v957_v10, %v489_v31 }
  0x95   : > { %v475_v16 = vadd.f32 %v957_v10, %v474_v14  ;;  %v481_v21 = vadd.f32 %v957_v10, %v480_v20 }
  0x96   : > { %v499_v28 = vmax.f32 %v484_v24, 0.0  ;;  %v501_v34 = vmax.f32 %v490_v33, 0.0 }
  0x97   : > { %v496_v17 = vmax.f32 %v475_v16, 0.0  ;;  %v498_v23 = vmax.f32 %v481_v21, 0.0 }
  0x99   : > { %912 = vmatmul.msk.f32.gmra.mxu1 %vm508_vm2, %v496_v17 }
  0x9b   : > { %v486_v29 = vpop.f32.mrf.mxu2  ;;  %v492_v35 = vpop.f32.mrf.mxu3 }
  0x9c   : > { %v487_v30 = vadd.f32 %v957_v10, %v486_v29  ;;  %v493_v36 = vadd.f32 %v957_v10, %v492_v35  ;;  %v741_v10 = vld [vmem:[%s1160_s9] sm:$0xff] }
  0x9d   : > { %789 = vmatpush.msrb.mxu0 %v741_v10 }
  0x9e   : > { %v500_v32 = vmax.f32 %v487_v30, 0.0  ;;  %v502_v37 = vmax.f32 %v493_v36, 0.0 }
  0xa1   : > { %913 = vmatmul.msk.f32.gmra.mxu1 %vm508_vm2, %v497_v19 }
  0xa3   : > { %v639_v11 = vpop.f32.mrf.mxu2 }
  0xa9   : > { %914 = vmatmul.msk.f32.gmra.mxu1 %vm508_vm2, %v498_v23 }
  0xab   : > { %v642_v12 = vpop.f32.mrf.mxu2 }
  0xb1   : > { %915 = vmatmul.msk.f32.gmra.mxu1 %vm508_vm2, %v499_v28 }
  0xb3   : > { %v645_v17 = vpop.f32.mrf.mxu2 }
  0xb9   : > { %916 = vmatmul.msk.f32.gmra.mxu1 %vm508_vm2, %v500_v32 }
  0xbb   : > { %v648_v21 = vpop.f32.mrf.mxu2 }
  0xc1   : > { %917 = vmatmul.msk.f32.gmra.mxu1 %vm508_vm2, %v501_v34 }
  0xc3   : > { %v651_v26 = vpop.f32.mrf.mxu2 }
  0xc9   : > { %918 = vmatmul.msk.f32.gmra.mxu1 %vm508_vm2, %v502_v37 }
  0xcb   : > { %v654_v31 = vpop.f32.mrf.mxu2 }
  0xd3   : > { %v657_v36 = vpop.f32.mrf.mxu2 }
  0xdb   : > { %v660_v40 = vpop.f32.mrf.mxu2 }
 0x10e   : > { %v550_v43 = vpop.f32.mrf.mxu1 }
 0x10f   : > { %v551_v44 = vadd.f32 %v958_v42, %v550_v43 }
 0x111   : > { %v574_v45 = vmax.f32 %v551_v44, 0.0  ;;  %v960_v44 = vld [vmem:[%s1161_s10] ss:$0 sm:$0xff] }
 0x113   : > { %928 = vmatmul.msk.f32.vlgmr.msrb.gmra.mxu3 %vm663_vm5, %v574_v45 }
 0x116   : > { %v553_v47 = vpop.f32.mrf.mxu1 }
 0x117   : > { %v554_v48 = vadd.f32 %v958_v42, %v553_v47 }
 0x119   : > { %v575_v49 = vmax.f32 %v554_v48, 0.0 }
 0x11b   : > { %929 = vmatmul.msk.f32.gmra.mxu3 %vm663_vm5, %v575_v49 }
 0x11e   : > { %v556_v51 = vpop.f32.mrf.mxu1 }
 0x11f   : > { %v557_v52 = vadd.f32 %v958_v42, %v556_v51 }
 0x121   : > { %v576_v53 = vmax.f32 %v557_v52, 0.0 }
 0x123   : > { %930 = vmatmul.msk.f32.gmra.mxu3 %vm663_vm5, %v576_v53 }
 0x126   : > { %v559_v55 = vpop.f32.mrf.mxu1 }
 0x127   : > { %v560_v56 = vadd.f32 %v958_v42, %v559_v55 }
 0x129   : > { %v577_v57 = vmax.f32 %v560_v56, 0.0 }
 0x12b   : > { %931 = vmatmul.msk.f32.gmra.mxu3 %vm663_vm5, %v577_v57 }
 0x12e   : > { %v562_v62 = vpop.f32.mrf.mxu1 }
 0x12f   : > { %v563_v63 = vadd.f32 %v958_v42, %v562_v62 }
 0x131   : > { %v578_v0 = vmax.f32 %v563_v63, 0.0 }
 0x133   : > { %932 = vmatmul.msk.f32.gmra.mxu3 %vm663_vm5, %v578_v0 }
 0x136   : > { %v565_v1 = vpop.f32.mrf.mxu1 }
 0x137   : > { %v566_v2 = vadd.f32 %v958_v42, %v565_v1 }
 0x139   : > { %v579_v3 = vmax.f32 %v566_v2, 0.0 }
 0x13b   : > { %933 = vmatmul.msk.f32.gmra.mxu3 %vm663_vm5, %v579_v3 }
 0x13e   : > { %v568_v4 = vpop.f32.mrf.mxu1 }
 0x13f   : > { %v569_v5 = vadd.f32 %v958_v42, %v568_v4 }
 0x141   : > { %v580_v6 = vmax.f32 %v569_v5, 0.0 }
 0x143   : > { %934 = vmatmul.msk.f32.gmra.mxu3 %vm663_vm5, %v580_v6 }
 0x146   : > { %v571_v7 = vpop.f32.mrf.mxu1 }
 0x147   : > { %v572_v8 = vadd.f32 %v958_v42, %v571_v7 }
 0x149   : > { %v581_v9 = vmax.f32 %v572_v8, 0.0 }
 0x14b   : > { %935 = vmatmul.msk.f32.gmra.mxu3 %vm663_vm5, %v581_v9 }
 0x196   : > { %v705_v14 = vpop.f32.mrf.mxu3 }
 0x197   : > { %v706_v15 = vadd.f32 %v705_v14, %v639_v11 }
 0x199   : > { %v733_v16 = vadd.f32 %v959_v13, %v706_v15 }
 0x19b   : > { %936 = vmatmul.msk.f32.vlgmr.msrb.gmra.mxu0 %vm749_vm6, %v733_v16 }
 0x19e   : > { %v708_v18 = vpop.f32.mrf.mxu3 }
 0x19f   : > { %v709_v19 = vadd.f32 %v708_v18, %v642_v12 }
 0x1a1   : > { %v734_v20 = vadd.f32 %v959_v13, %v709_v19 }
 0x1a3   : > { %937 = vmatmul.msk.f32.gmra.mxu0 %vm749_vm6, %v734_v20 }
 0x1a6   : > { %v711_v22 = vpop.f32.mrf.mxu3 }
 0x1a7   : > { %v712_v23 = vadd.f32 %v711_v22, %v645_v17 }
 0x1a9   : > { %v735_v24 = vadd.f32 %v959_v13, %v712_v23 }
 0x1ab   : > { %938 = vmatmul.msk.f32.gmra.mxu0 %vm749_vm6, %v735_v24 }
 0x1ae   : > { %v714_v25 = vpop.f32.mrf.mxu3 }
 0x1af   : > { %v715_v27 = vadd.f32 %v714_v25, %v648_v21 }
 0x1b1   : > { %v736_v28 = vadd.f32 %v959_v13, %v715_v27 }
 0x1b3   : > { %939 = vmatmul.msk.f32.gmra.mxu0 %vm749_vm6, %v736_v28 }
 0x1b6   : > { %v717_v29 = vpop.f32.mrf.mxu3 }
 0x1b7   : > { %v718_v30 = vadd.f32 %v717_v29, %v651_v26 }
 0x1b9   : > { %v737_v32 = vadd.f32 %v959_v13, %v718_v30 }
 0x1bb   : > { %940 = vmatmul.msk.f32.gmra.mxu0 %vm749_vm6, %v737_v32 }
 0x1be   : > { %v720_v33 = vpop.f32.mrf.mxu3 }
 0x1bf   : > { %v721_v34 = vadd.f32 %v720_v33, %v654_v31 }
 0x1c1   : > { %v738_v35 = vadd.f32 %v959_v13, %v721_v34 }
 0x1c3   : > { %941 = vmatmul.msk.f32.gmra.mxu0 %vm749_vm6, %v738_v35 }
 0x1c6   : > { %v723_v37 = vpop.f32.mrf.mxu3 }
 0x1c7   : > { %v724_v38 = vadd.f32 %v723_v37, %v657_v36 }
 0x1c9   : > { %v739_v39 = vadd.f32 %v959_v13, %v724_v38 }
 0x1cb   : > { %942 = vmatmul.msk.f32.gmra.mxu0 %vm749_vm6, %v739_v39 }
 0x1ce   : > { %v726_v41 = vpop.f32.mrf.mxu3 }
 0x1cf   : > { %v727_v42 = vadd.f32 %v726_v41, %v660_v40 }
 0x1d1   : > { %v740_v43 = vadd.f32 %v959_v13, %v727_v42 }
 0x1d3   : > { %943 = vmatmul.msk.f32.gmra.mxu0 %vm749_vm6, %v740_v43 }
 0x218   : > { %v791_v45 = vpop.f32.mrf.mxu0 }
 0x219   : > { %v792_v46 = vadd.f32 %v960_v44, %v791_v45 }
 0x21b   : > { %815 = vst.msk [vmem:[%s410_s20] sm:$0xff] %vm749_vm6, %v792_v46 }
 0x220   : > { %v794_v47 = vpop.f32.mrf.mxu0 }
 0x221   : > { %v795_v48 = vadd.f32 %v960_v44, %v794_v47 }
 0x223   : > { %816 = vst.msk [vmem:[%s410_s20 + $0x8] sm:$0xff] %vm749_vm6, %v795_v48 }
 0x228   : > { %v797_v49 = vpop.f32.mrf.mxu0 }
 0x229   : > { %v798_v50 = vadd.f32 %v960_v44, %v797_v49 }
 0x22b   : > { %817 = vst.msk [vmem:[%s410_s20 + $0x10] sm:$0xff] %vm749_vm6, %v798_v50 }
 0x230   : > { %v800_v51 = vpop.f32.mrf.mxu0 }
 0x231   : > { %v801_v52 = vadd.f32 %v960_v44, %v800_v51 }
 0x233   : > { %818 = vst.msk [vmem:[%s410_s20 + $0x18] sm:$0xff] %vm749_vm6, %v801_v52 }
 0x238   : > { %v803_v53 = vpop.f32.mrf.mxu0 }
 0x239   : > { %v804_v54 = vadd.f32 %v960_v44, %v803_v53 }
 0x23b   : > { %819 = vst.msk [vmem:[%s410_s20 + $0x20] sm:$0xff] %vm749_vm6, %v804_v54 }
 0x240   : > { %v806_v55 = vpop.f32.mrf.mxu0 }
 0x241   : > { %v807_v56 = vadd.f32 %v960_v44, %v806_v55 }
 0x243   : > { %820 = vst.msk [vmem:[%s410_s20 + $0x28] sm:$0xff] %vm749_vm6, %v807_v56 }
 0x248   : > { %v809_v57 = vpop.f32.mrf.mxu0 }
 0x249   : > { %v810_v58 = vadd.f32 %v960_v44, %v809_v57 }
 0x24b   : > { %821 = vst.msk [vmem:[%s410_s20 + $0x30] sm:$0xff] %vm749_vm6, %v810_v58 }
 0x250   : > { %v812_v59 = vpop.f32.mrf.mxu0 }
 0x251   : > { %v813_v60 = vadd.f32 %v960_v44, %v812_v59 }
 0x253   : > { %822 = vst.msk [vmem:[%s410_s20 + $0x38] sm:$0xff] %vm749_vm6, %v813_v60 }
 0x254 PF: > { %s21_s17 = sadd.s32 1, %s967_s17  }
 0x255   : > { %p18_p4 = scmp.ge.s32.totalorder %s21_s17, 4  }
 0x257   :  { %20 = sbr.rel (!%p18_p4) target bundleno = 1 (0x1), region = 97 }

// kernel: cad_transformer_forward.7
= control target key start
LH: loop header
LB: loop body
LE: loop exit
PB: predicated region body
PF: predicated region fallthrough
CT: control target
= control target key end

     0   :  { %s710_s24 = smov 0   ;;  %s845_s0 = inlined_call_operand.vmem [shape: f32[128,32], index: 0, kind: input, shape index: {}]   ;;  %s846_s1 = inlined_call_operand.vmem [shape: f32[32,64], index: 1, kind: input, shape index: {}]   ;;  %s847_s2 = inlined_call_operand.vmem [shape: f32[1,64], index: 2, kind: input, shape index: {}]   ;;  %s848_s3 = inlined_call_operand.vmem [shape: f32[64,64], index: 3, kind: input, shape index: {}]   ;;  %s849_s4 = inlined_call_operand.vmem [shape: f32[1,64], index: 4, kind: input, shape index: {}]   ;;  %s850_s5 = inlined_call_operand.vmem [shape: f32[64,36], index: 5, kind: input, shape index: {}]   ;;  %s851_s6 = inlined_call_operand.vmem [shape: f32[1,36], index: 6, kind: input, shape index: {}]   ;;  %s852_s7 = inlined_call_operand.vmem [shape: f32[128,36], index: 7, kind: output, shape index: {}]  }
   0x1 LB: > { %s600_s25 = sadd.s32 4294967295, %s668_s24   ;;  %p604_p0 = scmp.ge.s32.totalorder %s668_s24, 1  ;;  %s668_s24 = sphi %s710_s24, %s17_s24  }
   0x2   : > { %p238_p1 = scmp.lt.s32.totalorder %s668_s24, 3 }
   0x4   : > { %p239_p2 = pnand %p604_p0, %p238_p1 }
   0x5   : > { %s605_s30 = sshll.u32 (!%p239_p2), %s600_s25, 3 }
   0x6   : > { %242 = sbr.rel (%p239_p2) target bundleno = 476 (0x1dc), region = 48  ;;  %p271_p3 = scmp.lt.s32.totalorder (!%p239_p2), %s605_s30, 15 }
   0xb   : > { %v293_v0 = vld [vmem:[%s846_s1 + $0x18] sm:$0xff]  ;;  %v292_v1 = vld [vmem:[%s846_s1 + $0x10] sm:$0xff]  ;;  %v291_v2 = vld [vmem:[%s846_s1 + $0x8] sm:$0xff]  ;;  %s854_s30 = smov (!%p271_p3, %s605_s30), 15  ;;  %vm298_vm0 = vcmask 261120   ;;  %vm384_vm1 = vcmask 523264  }
   0xc   : > { %335 = vmatpush.msra.mxu0 %v293_v0  ;;  %v290_v3 = vld [vmem:[%s846_s1] sm:$0xff]  ;;  %s606_s12 = sshll.u32 %s854_s30, 3  ;;  %v379_v8 = vld [vmem:[%s848_s3 + $0x38] sm:$0xff]  ;;  %v378_v9 = vld [vmem:[%s848_s3 + $0x30] sm:$0xff]  ;;  %vm535_vm2 = vcmask 293888  }
   0xd   : > { %s738_s15 = scalar_lea.vmem %s845_s0, %s606_s12  ;;  %417 = vmatpush.msra.mxu1 %v379_v8  ;;  %635 = vmatpush.msra.mxu3 %v379_v8  ;;  %v377_v10 = vld [vmem:[%s848_s3 + $0x28] sm:$0xff]  ;;  %v376_v11 = vld [vmem:[%s848_s3 + $0x20] sm:$0xff]  ;;  %v375_v13 = vld [vmem:[%s848_s3 + $0x18] sm:$0xff]  ;;  %s280_s16 = scalar_lea.vmem %s852_s7, %s606_s12 }
   0xe   : > { %336 = vmatpush.msra.mxu0 %v292_v1  ;;  %v282_v4 = vld [vmem:[%s738_s15] sm:$0xff]  ;;  %v283_v5 = vld [vmem:[%s738_s15 + $0x8] sm:$0xff]  ;;  %v284_v6 = vld [vmem:[%s738_s15 + $0x10] sm:$0xff] }
   0xf   : > { %v285_v7 = vld [vmem:[%s738_s15 + $0x18] sm:$0xff]  ;;  %418 = vmatpush.msra.mxu1 %v378_v9  ;;  %636 = vmatpush.msra.mxu3 %v378_v9  ;;  %v286_v12 = vld [vmem:[%s738_s15 + $0x20] sm:$0xff]  ;;  %v287_v14 = vld [vmem:[%s738_s15 + $0x28] sm:$0xff] }
  0x10   : > { %337 = vmatpush.msra.mxu0 %v291_v2  ;;  %v288_v15 = vld [vmem:[%s738_s15 + $0x30] sm:$0xff]  ;;  %v289_v16 = vld [vmem:[%s738_s15 + $0x38] sm:$0xff]  ;;  %v373_v18 = vld [vmem:[%s848_s3 + $0x8] sm:$0xff] }
  0x11   : > { %419 = vmatpush.msra.mxu1 %v377_v10  ;;  %637 = vmatpush.msra.mxu3 %v377_v10  ;;  %v374_v17 = vld [vmem:[%s848_s3 + $0x10] sm:$0xff]  ;;  %v372_v19 = vld [vmem:[%s848_s3] sm:$0xff]  ;;  %v465_v33 = vld [vmem:[%s850_s5 + $0x38] sm:$0xff] }
  0x12   : > { %338 = vmatpush.msra.mxu0 %v290_v3  ;;  %v659_v20 = vld [vmem:[%s847_s2] ss:$0 sm:$0xff]  ;;  %v464_v34 = vld [vmem:[%s850_s5 + $0x30] sm:$0xff]  ;;  %502 = vmatpush.msra.mxu2 %v465_v33  ;;  %v463_v35 = vld [vmem:[%s850_s5 + $0x28] sm:$0xff] }
  0x13   : > { %609 = vmatmul.msk.f32.vlgmr.msra.gmra.mxu0 %vm298_vm0, %v282_v4  ;;  %420 = vmatpush.msra.mxu1 %v376_v11  ;;  %v462_v38 = vld [vmem:[%s850_s5 + $0x20] sm:$0xff]  ;;  %v461_v40 = vld [vmem:[%s850_s5 + $0x18] sm:$0xff]  ;;  %v460_v50 = vld [vmem:[%s850_s5 + $0x10] sm:$0xff] }
  0x14   : > { %638 = vmatpush.msra.mxu3 %v376_v11  ;;  %503 = vmatpush.msra.mxu2 %v464_v34  ;;  %v459_v51 = vld [vmem:[%s850_s5 + $0x8] sm:$0xff]  ;;  %v458_v52 = vld [vmem:[%s850_s5] sm:$0xff] }
  0x15   : > { %421 = vmatpush.msra.mxu1 %v375_v13  ;;  %v660_v53 = vld [vmem:[%s849_s4] ss:$0 sm:$0xff] }
  0x16   : > { %639 = vmatpush.msra.mxu3 %v375_v13  ;;  %504 = vmatpush.msra.mxu2 %v463_v35 }
  0x17   : > { %422 = vmatpush.msra.mxu1 %v374_v17 }
  0x18   : > { %640 = vmatpush.msra.mxu3 %v374_v17  ;;  %505 = vmatpush.msra.mxu2 %v462_v38 }
  0x19   : > { %423 = vmatpush.msra.mxu1 %v373_v18 }
  0x1a   : > { %641 = vmatpush.msra.mxu3 %v373_v18  ;;  %506 = vmatpush.msra.mxu2 %v461_v40 }
  0x1b   : > { %610 = vmatmul.msk.f32.gmra.mxu0 %vm298_vm0, %v283_v5  ;;  %424 = vmatpush.msra.mxu1 %v372_v19 }
  0x1c   : > { %642 = vmatpush.msra.mxu3 %v372_v19  ;;  %507 = vmatpush.msra.mxu2 %v460_v50 }
  0x1e   : > { %643 = vmatpush.msrb.mxu3 %v465_v33  ;;  %508 = vmatpush.msra.mxu2 %v459_v51 }
  0x20   : > { %644 = vmatpush.msrb.mxu3 %v464_v34  ;;  %509 = vmatpush.msra.mxu2 %v458_v52 }
  0x22   : > { %645 = vmatpush.msrb.mxu3 %v463_v35 }
  0x23   : > { %611 = vmatmul.msk.f32.gmra.mxu0 %vm298_vm0, %v284_v6 }
  0x24   : > { %646 = vmatpush.msrb.mxu3 %v462_v38 }
  0x26   : > { %647 = vmatpush.msrb.mxu3 %v461_v40 }
  0x28   : > { %648 = vmatpush.msrb.mxu3 %v460_v50 }
  0x2a   : > { %649 = vmatpush.msrb.mxu3 %v459_v51 }
  0x2b   : > { %612 = vmatmul.msk.f32.gmra.mxu0 %vm298_vm0, %v285_v7 }
  0x2c   : > { %650 = vmatpush.msrb.mxu3 %v458_v52 }
  0x33   : > { %613 = vmatmul.msk.f32.gmra.mxu0 %vm298_vm0, %v286_v12 }
  0x3b   : > { %614 = vmatmul.msk.f32.gmra.mxu0 %vm298_vm0, %v287_v14  ;;  %v661_v14 = vld [vmem:[%s851_s6] ss:$0 sm:$0xff] }
  0x43   : > { %615 = vmatmul.msk.f32.gmra.mxu0 %vm298_vm0, %v288_v15 }
  0x4b   : > { %616 = vmatmul.msk.f32.gmra.mxu0 %vm298_vm0, %v289_v16 }
  0x90   : > { %v340_v21 = vpop.f32.mrf.mxu0 }
  0x91   : > { %v341_v22 = vadd.f32 %v659_v20, %v340_v21 }
  0x93   : > { %v364_v23 = vmax.f32 %v341_v22, 0.0 }
  0x95   : > { %617 = vmatmul.msk.f32.vlgmr.msra.gmra.mxu1 %vm384_vm1, %v364_v23 }
  0x98   : > { %v343_v24 = vpop.f32.mrf.mxu0 }
  0x99   : > { %v344_v25 = vadd.f32 %v659_v20, %v343_v24 }
  0x9b   : > { %v365_v26 = vmax.f32 %v344_v25, 0.0 }
  0x9d   : > { %618 = vmatmul.msk.f32.gmra.mxu1 %vm384_vm1, %v365_v26 }
  0xa0   : > { %v346_v27 = vpop.f32.mrf.mxu0 }
  0xa1   : > { %v347_v28 = vadd.f32 %v659_v20, %v346_v27 }
  0xa3   : > { %v366_v29 = vmax.f32 %v347_v28, 0.0 }
  0xa5   : > { %619 = vmatmul.msk.f32.gmra.mxu1 %vm384_vm1, %v366_v29 }
  0xa8   : > { %v349_v30 = vpop.f32.mrf.mxu0 }
  0xa9   : > { %v350_v31 = vadd.f32 %v659_v20, %v349_v30 }
  0xab   : > { %v367_v32 = vmax.f32 %v350_v31, 0.0 }
  0xad   : > { %620 = vmatmul.msk.f32.gmra.mxu1 %vm384_vm1, %v367_v32 }
  0xb0   : > { %v352_v36 = vpop.f32.mrf.mxu0 }
  0xb1   : > { %v353_v37 = vadd.f32 %v659_v20, %v352_v36 }
  0xb3   : > { %v368_v39 = vmax.f32 %v353_v37, 0.0 }
  0xb5   : > { %621 = vmatmul.msk.f32.gmra.mxu1 %vm384_vm1, %v368_v39 }
  0xb8   : > { %v355_v41 = vpop.f32.mrf.mxu0 }
  0xb9   : > { %v356_v42 = vadd.f32 %v659_v20, %v355_v41 }
  0xbb   : > { %v369_v43 = vmax.f32 %v356_v42, 0.0 }
  0xbd   : > { %622 = vmatmul.msk.f32.gmra.mxu1 %vm384_vm1, %v369_v43 }
  0xc0   : > { %v358_v44 = vpop.f32.mrf.mxu0 }
  0xc1   : > { %v359_v45 = vadd.f32 %v659_v20, %v358_v44 }
  0xc3   : > { %v370_v46 = vmax.f32 %v359_v45, 0.0 }
  0xc5   : > { %623 = vmatmul.msk.f32.vlgmr.msra.gmra.mxu3 %vm384_vm1, %v370_v46 }
  0xc8   : > { %v361_v47 = vpop.f32.mrf.mxu0 }
  0xc9   : > { %v362_v48 = vadd.f32 %v659_v20, %v361_v47 }
  0xcb   : > { %v371_v49 = vmax.f32 %v362_v48, 0.0 }
  0xcd   : > { %624 = vmatmul.msk.f32.gmra.mxu3 %vm384_vm1, %v371_v49 }
 0x112   : > { %v426_v54 = vpop.f32.mrf.mxu1 }
 0x113   : > { %v427_v55 = vadd.f32 %v660_v53, %v426_v54 }
 0x115   : > { %v450_v56 = vmax.f32 %v427_v55, 0.0 }
 0x117   : > { %625 = vmatmul.msk.f32.vlgmr.msra.gmra.mxu2 %vm384_vm1, %v450_v56 }
 0x11a   : > { %v429_v57 = vpop.f32.mrf.mxu1 }
 0x11b   : > { %v430_v58 = vadd.f32 %v660_v53, %v429_v57 }
 0x11d   : > { %v451_v59 = vmax.f32 %v430_v58, 0.0 }
 0x11f   : > { %626 = vmatmul.msk.f32.gmra.mxu2 %vm384_vm1, %v451_v59 }
 0x122   : > { %v432_v60 = vpop.f32.mrf.mxu1 }
 0x123   : > { %v433_v61 = vadd.f32 %v660_v53, %v432_v60 }
 0x125   : > { %v452_v62 = vmax.f32 %v433_v61, 0.0 }
 0x127   : > { %627 = vmatmul.msk.f32.gmra.mxu2 %vm384_vm1, %v452_v62 }
 0x12a   : > { %v435_v63 = vpop.f32.mrf.mxu1 }
 0x12b   : > { %v436_v0 = vadd.f32 %v660_v53, %v435_v63 }
 0x12d   : > { %v453_v1 = vmax.f32 %v436_v0, 0.0 }
 0x12f   : > { %628 = vmatmul.msk.f32.gmra.mxu2 %vm384_vm1, %v453_v1 }
 0x132   : > { %v438_v2 = vpop.f32.mrf.mxu1 }
 0x133   : > { %v439_v3 = vadd.f32 %v660_v53, %v438_v2 }
 0x135   : > { %v454_v4 = vmax.f32 %v439_v3, 0.0 }
 0x137   : > { %629 = vmatmul.msk.f32.gmra.mxu2 %vm384_vm1, %v454_v4 }
 0x13a   : > { %v441_v5 = vpop.f32.mrf.mxu1 }
 0x13b   : > { %v442_v6 = vadd.f32 %v660_v53, %v441_v5 }
 0x13d   : > { %v455_v7 = vmax.f32 %v442_v6, 0.0 }
 0x13f   : > { %630 = vmatmul.msk.f32.gmra.mxu2 %vm384_vm1, %v455_v7 }
 0x148   : > { %v444_v8 = vpop.f32.mrf.mxu3 }
 0x149   : > { %v445_v9 = vadd.f32 %v660_v53, %v444_v8 }
 0x14b   : > { %v456_v10 = vmax.f32 %v445_v9, 0.0 }
 0x14d   : > { %631 = vmatmul.msk.f32.vlgmr.msrb.gmra.mxu3 %vm384_vm1, %v456_v10 }
 0x150   : > { %v447_v11 = vpop.f32.mrf.mxu3 }
 0x151   : > { %v448_v12 = vadd.f32 %v660_v53, %v447_v11 }
 0x153   : > { %v457_v13 = vmax.f32 %v448_v12, 0.0 }
 0x155   : > { %632 = vmatmul.msk.f32.gmra.mxu3 %vm384_vm1, %v457_v13 }
 0x19a   : > { %v511_v15 = vpop.f32.mrf.mxu2 }
 0x19b   : > { %v512_v16 = vadd.f32 %v661_v14, %v511_v15 }
 0x19d   : > { %536 = vst.msk [vmem:[%s280_s16] sm:$0xff] %vm535_vm2, %v512_v16 }
 0x1a2   : > { %v514_v17 = vpop.f32.mrf.mxu2 }
 0x1a3   : > { %v515_v18 = vadd.f32 %v661_v14, %v514_v17 }
 0x1a5   : > { %537 = vst.msk [vmem:[%s280_s16 + $0x8] sm:$0xff] %vm535_vm2, %v515_v18 }
 0x1aa   : > { %v517_v19 = vpop.f32.mrf.mxu2 }
 0x1ab   : > { %v518_v20 = vadd.f32 %v661_v14, %v517_v19 }
 0x1ad   : > { %538 = vst.msk [vmem:[%s280_s16 + $0x10] sm:$0xff] %vm535_vm2, %v518_v20 }
 0x1b2   : > { %v520_v21 = vpop.f32.mrf.mxu2 }
 0x1b3   : > { %v521_v22 = vadd.f32 %v661_v14, %v520_v21 }
 0x1b5   : > { %539 = vst.msk [vmem:[%s280_s16 + $0x18] sm:$0xff] %vm535_vm2, %v521_v22 }
 0x1ba   : > { %v523_v23 = vpop.f32.mrf.mxu2 }
 0x1bb   : > { %v524_v24 = vadd.f32 %v661_v14, %v523_v23 }
 0x1bd   : > { %540 = vst.msk [vmem:[%s280_s16 + $0x20] sm:$0xff] %vm535_vm2, %v524_v24 }
 0x1c2   : > { %v526_v25 = vpop.f32.mrf.mxu2 }
 0x1c3   : > { %v527_v26 = vadd.f32 %v661_v14, %v526_v25 }
 0x1c5   : > { %541 = vst.msk [vmem:[%s280_s16 + $0x28] sm:$0xff] %vm535_vm2, %v527_v26 }
 0x1d0   : > { %v529_v27 = vpop.f32.mrf.mxu3 }
 0x1d1   : > { %v530_v28 = vadd.f32 %v661_v14, %v529_v27 }
 0x1d3   : > { %542 = vst.msk [vmem:[%s280_s16 + $0x30] sm:$0xff] %vm535_vm2, %v530_v28 }
 0x1d8   : > { %v532_v29 = vpop.f32.mrf.mxu3 }
 0x1d9   : > { %v533_v30 = vadd.f32 %v661_v14, %v532_v29 }
 0x1db   : > { %543 = vst.msk [vmem:[%s280_s16 + $0x38] sm:$0xff] %vm535_vm2, %v533_v30 }
 0x1dc PF: > { %s17_s24 = sadd.s32 1, %s668_s24  }
 0x1dd   : > { %p14_p4 = scmp.ge.s32.totalorder %s17_s24, 4  }
 0x1df   :  { %16 = sbr.rel (!%p14_p4) target bundleno = 1 (0x1), region = 78 }

// kernel: cad_transformer_forward.5
= control target key start
LH: loop header
LB: loop body
LE: loop exit
PB: predicated region body
PF: predicated region fallthrough
CT: control target
= control target key end

     0   :  { %s4837_s0 = inlined_call_operand.vmem [shape: f32[128,32], index: 0, kind: input, shape index: {}, may-alias: {0,1}]   ;;  %s4838_s1 = inlined_call_operand.vmem [shape: f32[128,32], index: 1, kind: input, shape index: {}, may-alias: {0,1}]   ;;  %s4839_s2 = inlined_call_operand.vmem [shape: s32[128,8], index: 2, kind: input, shape index: {}]   ;;  %s4840_s3 = inlined_call_operand.vmem [shape: f32[1,32], index: 3, kind: input, shape index: {}]   ;;  %s4841_s4 = inlined_call_operand.vmem [shape: f32[1,32], index: 4, kind: input, shape index: {}]   ;;  %s4842_s5 = inlined_call_operand.vmem [shape: f32[32,32], index: 5, kind: input, shape index: {}]   ;;  %s4843_s6 = inlined_call_operand.vmem [shape: f32[1,32], index: 6, kind: input, shape index: {}]   ;;  %s4844_s7 = inlined_call_operand.vmem [shape: f32[32,32], index: 7, kind: input, shape index: {}]   ;;  %s4845_s8 = inlined_call_operand.vmem [shape: f32[1,32], index: 8, kind: input, shape index: {}]   ;;  %s4846_s9 = inlined_call_operand.vmem [shape: f32[32,32], index: 9, kind: input, shape index: {}]   ;;  %s4847_s10 = inlined_call_operand.vmem [shape: f32[1,32], index: 10, kind: input, shape index: {}]   ;;  %s4848_s11 = inlined_call_operand.vmem [shape: f32[32,32], index: 11, kind: input, shape index: {}]   ;;  %s4849_s12 = inlined_call_operand.vmem [shape: f32[1,32], index: 12, kind: input, shape index: {}]   ;;  %s4850_s13 = inlined_call_operand.vmem [shape: f32[1,32], index: 13, kind: input, shape index: {}]   ;;  %s4851_s14 = inlined_call_operand.vmem [shape: f32[1,32], index: 14, kind: input, shape index: {}]   ;;  %s4852_s15 = inlined_call_operand.vmem [shape: f32[32,64], index: 15, kind: input, shape index: {}]   ;;  %s4853_s16 = inlined_call_operand.vmem [shape: f32[1,64], index: 16, kind: input, shape index: {}]   ;;  %s4854_s17 = inlined_call_operand.vmem [shape: f32[64,32], index: 17, kind: input, shape index: {}]   ;;  %s4855_s18 = inlined_call_operand.vmem [shape: f32[1,32], index: 18, kind: input, shape index: {}]   ;;  %s4856_s19 = inlined_call_operand.vmem [shape: f32[128,32], index: 19, kind: output, shape index: {}]  }
   0x1   :  { %4867 = sst [smem:[#allocation2_spill]] %s4837_s0  ;;  %s3241_s0 = smov 0  }
   0x2   :  { %4868 = sst [smem:[#allocation3_spill]] %s4838_s1 }
   0x3   :  { %4869 = sst [smem:[#allocation4_spill]] %s4839_s2 }
   0x4   :  { %4870 = sst [smem:[#allocation5_spill]] %s4840_s3 }
   0x5 LB: > { %s2751_s30 = sadd.s32 4294967295, %s3129_s0   ;;  %p2755_p0 = scmp.ge.s32.totalorder %s3129_s0, 1  ;;  %s3129_s0 = sphi %s3241_s0, %s29_s0  }
   0x6   : > { %p549_p1 = scmp.lt.s32.totalorder %s3129_s0, 3 }
   0x8   : > { %p550_p2 = pnand %p2755_p0, %p549_p1 }
   0x9   : > { %s4871_s1 = sld [smem:[#allocation2_spill]] (!%p550_p2)  ;;  %s3473_s24 = sshll.u32 (!%p550_p2), %s2751_s30, 3 }
   0xa   : > { %553 = sbr.rel (%p550_p2) target bundleno = 2041 (0x7f9), region = 96  ;;  %s4872_s22 = sld [smem:[#allocation5_spill]] (!%p550_p2) }
   0xb   : > { %p611_p3 = scmp.lt.s32.totalorder (!%p550_p2), %s3473_s24, 15  ;;  %s4877_s26 = sld [smem:[#allocation3_spill]] (!%p550_p2) }
   0xc   : > { %s4894_s20 = sld [smem:[#allocation4_spill]] (!%p550_p2) }
   0xf   : > { %v630_v0 = vld [vmem:[%s4871_s1 + $0x10] sm:$0xff]  ;;  %vm652_vm0 = vcmask 261120   ;;  %v628_v1 = vld [vmem:[%s4871_s1] sm:$0xff]  ;;  %v629_v5 = vld [vmem:[%s4871_s1 + $0x8] sm:$0xff]  ;;  %v3131_v14 = vmov 32.0   ;;  %s4912_s24 = smov (!%p611_p3, %s3473_s24), 15 }
  0x10   : > { %v659_v2 = vsel %vm652_vm0, %v630_v0, 0.0  ;;  %v653_v3 = vsel %vm652_vm0, %v628_v1, 0.0  ;;  %v632_v4 = vld [vmem:[%s4871_s1 + $0x20] sm:$0xff]  ;;  %v631_v6 = vld [vmem:[%s4871_s1 + $0x18] sm:$0xff]  ;;  %v3270_v8 = vld [vmem:[%s4871_s1 + $0x28] sm:$0xff]  ;;  %v656_v9 = vsel %vm652_vm0, %v629_v5, 0.0  ;;  %3015 = vrcp.f32 %v3131_v14 }
  0x11   : > { %660 = vadd.xlane.f32.xlu1 %v659_v2  ;;  %654 = vadd.xlane.f32.xlu0 %v653_v3  ;;  %v665_v7 = vsel %vm652_vm0, %v632_v4, 0.0  ;;  %v662_v10 = vsel %vm652_vm0, %v631_v6, 0.0  ;;  %v668_v11 = vsel %vm652_vm0, %v3270_v8, 0.0  ;;  %v3279_v12 = vld [vmem:[%s4871_s1 + $0x30] sm:$0xff]  ;;  %v3302_v35 = vld [vmem:[%s4871_s1 + $0x38] sm:$0xff]  ;;  %v3309_v37 = vld [vmem:[%s4871_s1 + $0x48] sm:$0xff] }
  0x12   : > { %666 = vadd.xlane.f32.xlu2 %v665_v7  ;;  %v671_v13 = vsel %vm652_vm0, %v3279_v12, 0.0  ;;  %v674_v40 = vsel %vm652_vm0, %v3302_v35, 0.0  ;;  %v680_v42 = vsel %vm652_vm0, %v3309_v37, 0.0  ;;  %v3326_v46 = vld [vmem:[%s4871_s1 + $0x40] sm:$0xff]  ;;  %v3331_v47 = vld [vmem:[%s4871_s1 + $0x70] sm:$0xff]  ;;  %v3351_v56 = vld [vmem:[%s4871_s1 + $0x78] sm:$0xff] }
  0x13   : > { %v677_v50 = vsel %vm652_vm0, %v3326_v46, 0.0  ;;  %v695_v52 = vsel %vm652_vm0, %v3331_v47, 0.0  ;;  %v3346_v55 = vld [vmem:[%s4871_s1 + $0x50] sm:$0xff]  ;;  %v698_v60 = vsel %vm652_vm0, %v3351_v56, 0.0  ;;  %v1245_v14 = vld [vmem:[%s4844_s7 + $0x8] sm:$0xff]  ;;  %s3542_s30 = sshll.u32 %s4912_s24, 3 }
  0x14   : > { %v683_v58 = vsel %vm652_vm0, %v3346_v55, 0.0  ;;  %s3558_s27 = scalar_lea.vmem %s4877_s26, %s3542_s30  ;;  %s3882_s21 = scalar_lea.vmem %s4894_s20, %s3542_s30 }
  0x15   : > { %s4807_s20 = scalar_lea.vmem %s4856_s19, %s3542_s30 }
  0x16   : > { %v3016_v15 = vpop.eup %3015 }
  0x17   : > { %v702_v16 = vmul.f32 32.0, %v3016_v15  ;;  %vm706_vm1 = vweird.f32 %v3016_v15 }
  0x19   : > { %657 = vadd.xlane.f32.xlu0 %v656_v9  ;;  %663 = vadd.xlane.f32.xlu1 %v662_v10  ;;  %v703_v17 = vsub.f32 1.0, %v702_v16  ;;  %v1247_v10 = vld [vmem:[%s4844_s7 + $0x18] sm:$0xff]  ;;  %v1244_v16 = vld [vmem:[%s4844_s7] sm:$0xff] }
  0x1a   : > { %669 = vadd.xlane.f32.xlu2 %v668_v11  ;;  %v1368_v11 = vld [vmem:[%s4846_s9 + $0x18] sm:$0xff]  ;;  %1312 = vmatpush.msra.mxu0 %v1247_v10 }
  0x1b   : > { %v704_v18 = vmul.f32 %v3016_v15, %v703_v17  ;;  %1385 = vmatpush.msra.mxu1 %v1368_v11  ;;  %2916 = vmatpush.msra.mxu2 %v1247_v10  ;;  %v1365_v17 = vld [vmem:[%s4846_s9] sm:$0xff] }
  0x1d   : > { %v705_v19 = vadd.f32 %v3016_v15, %v704_v18 }
  0x1f   : > { %v3283_v20 = vsel %vm706_vm1, %v3016_v15, %v705_v19  ;;  %v1366_v15 = vld [vmem:[%s4846_s9 + $0x8] sm:$0xff] }
  0x21   : > { %672 = vadd.xlane.f32.xlu1 %v671_v13  ;;  %v1367_v13 = vld [vmem:[%s4846_s9 + $0x10] sm:$0xff] }
  0x22   : > { %1386 = vmatpush.msra.mxu1 %v1367_v13 }
  0x24   : > { %1387 = vmatpush.msra.mxu1 %v1366_v15 }
  0x26   : > { %1388 = vmatpush.msra.mxu1 %v1365_v17 }
  0x84   : > { %v661_v21 = vpop.xlane.xlu1 %660  ;;  %v655_v22 = vpop.xlane.xlu0 %654 }
  0x85   : > { %v710_v23 = vmul.f32 %v3283_v20, %v661_v21  ;;  %v708_v24 = vmul.f32 %v3283_v20, %v655_v22  ;;  %v667_v38 = vpop.xlane.xlu2 %666 }
  0x86   : > { %v712_v44 = vmul.f32 %v3283_v20, %v667_v38 }
  0x87   : > { %v3287_v25 = vsub.f32 %v630_v0, %v710_v23  ;;  %v3289_v26 = vsub.f32 %v628_v1, %v708_v24  ;;  %v3367_v0 = vld [vmem:[%s4871_s1 + $0x58] sm:$0xff] }
  0x88   : > { %v3333_v48 = vsub.f32 %v632_v4, %v712_v44  ;;  %v686_v2 = vsel %vm652_vm0, %v3367_v0, 0.0 }
  0x89   : > { %v742_v27 = vmul.f32 %v3287_v25, %v3287_v25  ;;  %v740_v28 = vmul.f32 %v3289_v26, %v3289_v26 }
  0x8a   : > { %v744_v54 = vmul.f32 %v3333_v48, %v3333_v48 }
  0x8b   : > { %v762_v29 = vsel %vm652_vm0, %v742_v27, 0.0  ;;  %v756_v30 = vsel %vm652_vm0, %v740_v28, 0.0 }
  0x8c   : > { %763 = vadd.xlane.f32.xlu1 %v762_v29  ;;  %757 = vadd.xlane.f32.xlu0 %v756_v30  ;;  %v658_v31 = vpop.xlane.xlu0 %657  ;;  %v664_v32 = vpop.xlane.xlu1 %663  ;;  %v768_v59 = vsel %vm652_vm0, %v744_v54, 0.0 }
  0x8d   : > { %v709_v33 = vmul.f32 %v3283_v20, %v658_v31  ;;  %v711_v34 = vmul.f32 %v3283_v20, %v664_v32  ;;  %v670_v51 = vpop.xlane.xlu2 %669 }
  0x8e   : > { %v713_v53 = vmul.f32 %v3283_v20, %v670_v51 }
  0x8f   : > { %v3304_v36 = vsub.f32 %v629_v5, %v709_v33  ;;  %v3311_v39 = vsub.f32 %v631_v6, %v711_v34  ;;  %v3380_v5 = vld [vmem:[%s4871_s1 + $0x60] sm:$0xff] }
  0x90   : > { %v3354_v57 = vsub.f32 %v3270_v8, %v713_v53  ;;  %v689_v6 = vsel %vm652_vm0, %v3380_v5, 0.0  ;;  %v3388_v8 = vld [vmem:[%s4871_s1 + $0x68] sm:$0xff] }
  0x91   : > { %v741_v41 = vmul.f32 %v3304_v36, %v3304_v36  ;;  %v743_v45 = vmul.f32 %v3311_v39, %v3311_v39  ;;  %v692_v9 = vsel %vm652_vm0, %v3388_v8, 0.0 }
  0x92   : > { %v745_v63 = vmul.f32 %v3354_v57, %v3354_v57 }
  0x93   : > { %v759_v43 = vsel %vm652_vm0, %v741_v41, 0.0  ;;  %v765_v49 = vsel %vm652_vm0, %v743_v45, 0.0 }
  0x94   : > { %675 = vadd.xlane.f32.xlu0 %v674_v40  ;;  %760 = vadd.xlane.f32.xlu2 %v759_v43  ;;  %v673_v61 = vpop.xlane.xlu1 %672  ;;  %v771_v3 = vsel %vm652_vm0, %v745_v63, 0.0 }
  0x95   : > { %681 = vadd.xlane.f32.xlu1 %v680_v42  ;;  %v714_v62 = vmul.f32 %v3283_v20, %v673_v61 }
  0x97   : > { %v3370_v1 = vsub.f32 %v3279_v12, %v714_v62  ;;  %v1246_v12 = vld [vmem:[%s4844_s7 + $0x10] sm:$0xff] }
  0x98   : > { %1313 = vmatpush.msra.mxu0 %v1246_v12  ;;  %2917 = vmatpush.msra.mxu2 %v1246_v12 }
  0x99   : > { %v746_v4 = vmul.f32 %v3370_v1, %v3370_v1 }
  0x9a   : > { %1314 = vmatpush.msra.mxu0 %v1245_v14  ;;  %2918 = vmatpush.msra.mxu2 %v1245_v14 }
  0x9b   : > { %v774_v7 = vsel %vm652_vm0, %v746_v4, 0.0 }
  0x9c   : > { %766 = vadd.xlane.f32.xlu0 %v765_v49  ;;  %678 = vadd.xlane.f32.xlu2 %v677_v50 }
  0x9d   : > { %696 = vadd.xlane.f32.xlu1 %v695_v52  ;;  %1315 = vmatpush.msra.mxu0 %v1244_v16 }
  0x9e   : > { %2919 = vmatpush.msra.mxu2 %v1244_v16 }
  0xa0   : > { %2920 = vmatpush.msrb.mxu2 %v1368_v11 }
  0xa2   : > { %2921 = vmatpush.msrb.mxu2 %v1367_v13 }
  0xa4   : > { %684 = vadd.xlane.f32.xlu0 %v683_v58  ;;  %769 = vadd.xlane.f32.xlu2 %v768_v59 }
  0xa5   : > { %699 = vadd.xlane.f32.xlu1 %v698_v60  ;;  %2922 = vmatpush.msrb.mxu2 %v1366_v15 }
  0xa7   : > { %2923 = vmatpush.msrb.mxu2 %v1365_v17  ;;  %v3465_v17 = vld [vmem:[%s4841_s4] ss:$0 sm:$0xff] }
  0xac   : > { %687 = vadd.xlane.f32.xlu0 %v686_v2  ;;  %772 = vadd.xlane.f32.xlu2 %v771_v3 }
  0xb4   : > { %690 = vadd.xlane.f32.xlu0 %v689_v6  ;;  %775 = vadd.xlane.f32.xlu2 %v774_v7 }
  0xbc   : > { %693 = vadd.xlane.f32.xlu2 %v692_v9 }
  0xff   : > { %v764_v18 = vpop.xlane.xlu1 %763  ;;  %v758_v19 = vpop.xlane.xlu0 %757 }
 0x100   : > { %v806_v21 = vmul.f32 %v764_v18, %v3283_v20  ;;  %v804_v22 = vmul.f32 %v758_v19, %v3283_v20 }
 0x102   : > { %v3418_v23 = vadd.f32 1e-05, %v806_v21  ;;  %v820_v24 = vadd.f32 1e-05, %v804_v22 }
 0x104   : > { %3017 = vrsqrt.f32 %v3418_v23  ;;  %vm842_vm3 = vweird.f32 %v820_v24  ;;  %vm862_vm7 = vweird.f32 %v3418_v23 }
 0x105   : > { %3019 = vrsqrt.f32 %v820_v24 }
 0x107   : > { %v761_v27 = vpop.xlane.xlu2 %760  ;;  %v676_v28 = vpop.xlane.xlu0 %675 }
 0x108   : > { %v805_v29 = vmul.f32 %v761_v27, %v3283_v20  ;;  %v715_v30 = vmul.f32 %v3283_v20, %v676_v28  ;;  %v682_v31 = vpop.xlane.xlu1 %681 }
 0x109   : > { %v717_v32 = vmul.f32 %v3283_v20, %v682_v31 }
 0x10a   : > { %v3424_v33 = vpop.eup %3017  ;;  %v821_v34 = vadd.f32 1e-05, %v805_v29  ;;  %v3427_v38 = vsub.f32 %v3302_v35, %v715_v30 }
 0x10b   : > { %v3020_v40 = vpop.eup %3019  ;;  %v857_v41 = vmul.f32 %v3424_v33, %v3418_v23  ;;  %v3432_v43 = vsub.f32 %v3309_v37, %v717_v32  ;;  %vm863_vm8 = vweird.f32 %v3424_v33 }
 0x10c   : > { %v837_v42 = vmul.f32 %v3020_v40, %v820_v24  ;;  %3021 = vrsqrt.f32 %v821_v34  ;;  %v747_v44 = vmul.f32 %v3427_v38, %v3427_v38  ;;  %vm843_vm2 = vweird.f32 %v3020_v40  ;;  %vm3513_vm10 = vmor %vm862_vm7, %vm863_vm8 }
 0x10d   : > { %v858_v49 = vmul.f32 %v3424_v33, %v857_v41  ;;  %v749_v59 = vmul.f32 %v3432_v43, %v3432_v43  ;;  %vm844_vm4 = vmor %vm842_vm3, %vm843_vm2  ;;  %vm852_vm5 = vweird.f32 %v821_v34 }
 0x10e   : > { %v838_v45 = vmul.f32 %v3020_v40, %v837_v42  ;;  %v777_v51 = vsel %vm652_vm0, %v747_v44, 0.0 }
 0x10f   : > { %v679_v50 = vpop.xlane.xlu2 %678  ;;  %v767_v35 = vpop.xlane.xlu0 %766  ;;  %778 = vadd.xlane.f32.xlu1 %v777_v51  ;;  %v859_v2 = vmul.f32 0.5, %v858_v49  ;;  %v783_v10 = vsel %vm652_vm0, %v749_v59, 0.0 }
 0x110   : > { %v839_v52 = vmul.f32 0.5, %v838_v45  ;;  %v716_v53 = vmul.f32 %v3283_v20, %v679_v50  ;;  %v807_v54 = vmul.f32 %v767_v35, %v3283_v20  ;;  %v697_v58 = vpop.xlane.xlu1 %696 }
 0x111   : > { %v722_v37 = vmul.f32 %v3283_v20, %v697_v58  ;;  %v860_v13 = vsub.f32 1.5, %v859_v2 }
 0x112   : > { %v3022_v60 = vpop.eup %3021  ;;  %v840_v61 = vsub.f32 1.5, %v839_v52  ;;  %v3444_v62 = vsub.f32 %v3326_v46, %v716_v53  ;;  %v3446_v63 = vadd.f32 1e-05, %v807_v54  ;;  %v3458_v46 = vld [vmem:[%s4872_s22] ss:$0 sm:$0xff] }
 0x113   : > { %v847_v3 = vmul.f32 %v3022_v60, %v821_v34  ;;  %v3450_v6 = vsub.f32 %v3331_v47, %v722_v37  ;;  %vm853_vm6 = vweird.f32 %v3022_v60  ;;  %v861_v32 = vmul.f32 %v3424_v33, %v860_v13 }
 0x114   : > { %v841_v4 = vmul.f32 %v3020_v40, %v840_v61  ;;  %3023 = vrsqrt.f32 %v3446_v63  ;;  %v748_v7 = vmul.f32 %v3444_v62, %v3444_v62  ;;  %vm3483_vm9 = vmor %vm852_vm5, %vm853_vm6  ;;  %vm872_vm12 = vweird.f32 %v3446_v63 }
 0x115   : > { %v848_v9 = vmul.f32 %v3022_v60, %v847_v3  ;;  %v754_v22 = vmul.f32 %v3450_v6, %v3450_v6  ;;  %v865_v35 = vsel %vm3513_vm10, %v3424_v33, %v861_v32 }
 0x116   : > { %v845_v11 = vsel %vm844_vm4, %v3020_v40, %v841_v4  ;;  %v780_v12 = vsel %vm652_vm0, %v748_v7, 0.0  ;;  %v998_v4 = vmul.f32 %v865_v35, %v3287_v25  ;;  %v3606_v35 = vld [vmem:[%s3558_s27 + $0x18] sm:$0xff] }
 0x117   : > { %v849_v47 = vmul.f32 0.5, %v848_v9  ;;  %781 = vadd.xlane.f32.xlu0 %v780_v12  ;;  %v770_v14 = vpop.xlane.xlu2 %769  ;;  %v685_v15 = vpop.xlane.xlu0 %684  ;;  %v996_v16 = vmul.f32 %v845_v11, %v3289_v26  ;;  %784 = vadd.xlane.f32.xlu1 %v783_v10  ;;  %v798_v44 = vsel %vm652_vm0, %v754_v22, 0.0 }
 0x118   : > { %v808_v18 = vmul.f32 %v770_v14, %v3283_v20  ;;  %v718_v19 = vmul.f32 %v3283_v20, %v685_v15  ;;  %v700_v21 = vpop.xlane.xlu1 %699  ;;  %v1018_v14 = vmul.f32 %v3458_v46, %v998_v4  ;;  %v3627_v4 = vld [vmem:[%s3558_s27 + $0x10] sm:$0xff] }
 0x119   : > { %v850_v24 = vsub.f32 1.5, %v849_v47  ;;  %v1016_v26 = vmul.f32 %v3458_v46, %v996_v16  ;;  %v723_v27 = vmul.f32 %v3283_v20, %v700_v21 }
 0x11a   : > { %v3477_v28 = vpop.eup %3023  ;;  %v3487_v30 = vadd.f32 1e-05, %v808_v18  ;;  %v3490_v31 = vsub.f32 %v3346_v55, %v718_v19  ;;  %v3571_v19 = vld [vmem:[%s3558_s27] sm:$0xff] }
 0x11b   : > { %v851_v40 = vmul.f32 %v3022_v60, %v850_v24  ;;  %v867_v41 = vmul.f32 %v3477_v28, %v3446_v63  ;;  %v1036_v42 = vadd.f32 %v3465_v17, %v1016_v26  ;;  %v3499_v34 = vsub.f32 %v3351_v56, %v723_v27  ;;  %v3599_v56 = vld [vmem:[%s3558_s27 + $0x8] sm:$0xff] }
 0x11c   : > { %3025 = vrsqrt.f32 %v3487_v30  ;;  %v750_v55 = vmul.f32 %v3490_v31, %v3490_v31  ;;  %vm873_vm11 = vweird.f32 %v3477_v28  ;;  %vm882_vm14 = vweird.f32 %v3487_v30 }
 0x11d   : > { %v868_v45 = vmul.f32 %v3477_v28, %v867_v41  ;;  %2762 = vmatmul.msk.f32.vlgmr.msra.gmra.mxu0 %vm652_vm0, %v1036_v42  ;;  %2778 = vmatmul.msk.f32.vlgmr.msra.gmra.mxu1 %vm652_vm0, %v1036_v42  ;;  %v855_v49 = vsel %vm3483_vm9, %v3022_v60, %v851_v40  ;;  %vm3560_vm13 = vmor %vm872_vm12, %vm873_vm11  ;;  %v1038_v27 = vadd.f32 %v3465_v17, %v1018_v14 }
 0x11e   : > { %v786_v50 = vsel %vm652_vm0, %v750_v55, 0.0  ;;  %v997_v51 = vmul.f32 %v855_v49, %v3304_v36  ;;  %v755_v36 = vmul.f32 %v3499_v34, %v3499_v34 }
 0x11f   : > { %v869_v52 = vmul.f32 0.5, %v868_v45  ;;  %799 = vadd.xlane.f32.xlu0 %v798_v44  ;;  %v773_v53 = vpop.xlane.xlu2 %772  ;;  %787 = vadd.xlane.f32.xlu2 %v786_v50  ;;  %v688_v54 = vpop.xlane.xlu0 %687 }
 0x120   : > { %v809_v23 = vmul.f32 %v773_v53, %v3283_v20  ;;  %v719_v58 = vmul.f32 %v3283_v20, %v688_v54  ;;  %v1017_v37 = vmul.f32 %v3458_v46, %v997_v51  ;;  %v801_v9 = vsel %vm652_vm0, %v755_v36, 0.0 }
 0x121   : > { %v870_v59 = vsub.f32 1.5, %v869_v52 }
 0x122   : > { %v3530_v60 = vpop.eup %3025  ;;  %v3532_v33 = vadd.f32 1e-05, %v809_v23  ;;  %v3535_v61 = vsub.f32 %v3367_v0, %v719_v58  ;;  %v1037_v2 = vadd.f32 %v3465_v17, %v1017_v37  ;;  %v1055_v37 = vsel %vm652_vm0, %v3599_v56, 0.0 }
 0x123   : > { %v877_v3 = vmul.f32 %v3530_v60, %v3487_v30  ;;  %v871_v7 = vmul.f32 %v3477_v28, %v870_v59  ;;  %vm883_vm15 = vweird.f32 %v3530_v60  ;;  %v1052_v30 = vsel %vm652_vm0, %v3571_v19, 0.0 }
 0x124   : > { %3027 = vrsqrt.f32 %v3532_v33  ;;  %v751_v0 = vmul.f32 %v3535_v61, %v3535_v61  ;;  %vm3586_vm1 = vmor %vm882_vm14, %vm883_vm15  ;;  %vm892_vm2 = vweird.f32 %v3532_v33 }
 0x125   : > { %v878_v10 = vmul.f32 %v3530_v60, %v877_v3  ;;  %2763 = vmatmul.msk.f32.gmra.mxu0 %vm652_vm0, %v1037_v2  ;;  %2779 = vmatmul.msk.f32.gmra.mxu1 %vm652_vm0, %v1037_v2  ;;  %v875_v63 = vsel %vm3560_vm13, %v3477_v28, %v871_v7  ;;  %v3630_v7 = vld [vmem:[%s3558_s27 + $0x20] sm:$0xff] }
 0x126   : > { %v789_v25 = vsel %vm652_vm0, %v751_v0, 0.0  ;;  %v999_v28 = vmul.f32 %v875_v63, %v3311_v39  ;;  %v1064_v11 = vsel %vm652_vm0, %v3630_v7, 0.0 }
 0x127   : > { %v879_v12 = vmul.f32 0.5, %v878_v10  ;;  %v776_v13 = vpop.xlane.xlu2 %775  ;;  %802 = vadd.xlane.f32.xlu2 %v801_v9  ;;  %790 = vadd.xlane.f32.xlu1 %v789_v25  ;;  %v691_v47 = vpop.xlane.xlu0 %690  ;;  %v1058_v25 = vsel %vm652_vm0, %v3627_v4, 0.0 }
 0x128   : > { %v810_v15 = vmul.f32 %v776_v13, %v3283_v20  ;;  %v720_v16 = vmul.f32 %v3283_v20, %v691_v47  ;;  %v1019_v44 = vmul.f32 %v3458_v46, %v999_v28  ;;  %v3642_v47 = vld [vmem:[%s3558_s27 + $0x28] sm:$0xff] }
 0x129   : > { %v880_v18 = vsub.f32 1.5, %v879_v12 }
 0x12a   : > { %v3028_v21 = vpop.eup %3027  ;;  %v826_v22 = vadd.f32 1e-05, %v810_v15  ;;  %v3576_v24 = vsub.f32 %v3380_v5, %v720_v16  ;;  %v1039_v53 = vadd.f32 %v3465_v17, %v1019_v44  ;;  %v1067_v15 = vsel %vm652_vm0, %v3642_v47, 0.0 }
 0x12b   : > { %v887_v26 = vmul.f32 %v3028_v21, %v3532_v33  ;;  %v881_v29 = vmul.f32 %v3530_v60, %v880_v18  ;;  %vm893_vm3 = vweird.f32 %v3028_v21 }
 0x12c   : > { %3029 = vrsqrt.f32 %v826_v22  ;;  %v752_v32 = vmul.f32 %v3576_v24, %v3576_v24  ;;  %vm3614_vm4 = vmor %vm892_vm2, %vm893_vm3  ;;  %vm902_vm5 = vweird.f32 %v826_v22 }
 0x12d   : > { %v888_v5 = vmul.f32 %v3028_v21, %v887_v26  ;;  %2764 = vmatmul.msk.f32.gmra.mxu0 %vm652_vm0, %v1038_v27  ;;  %2780 = vmatmul.msk.f32.gmra.mxu1 %vm652_vm0, %v1038_v27  ;;  %v885_v45 = vsel %vm3586_vm1, %v3530_v60, %v881_v29 }
 0x12e   : > { %v792_v39 = vsel %vm652_vm0, %v752_v32, 0.0  ;;  %v1000_v54 = vmul.f32 %v885_v45, %v3333_v48  ;;  %v1061_v48 = vsel %vm652_vm0, %v3606_v35, 0.0 }
 0x12f   : > { %v889_v41 = vmul.f32 0.5, %v888_v5  ;;  %v694_v42 = vpop.xlane.xlu2 %693  ;;  %793 = vadd.xlane.f32.xlu0 %v792_v39  ;;  %1053 = vadd.xlane.f32.xlu2 %v1052_v30 }
 0x130   : > { %v721_v55 = vmul.f32 %v3283_v20, %v694_v42  ;;  %v1020_v33 = vmul.f32 %v3458_v46, %v1000_v54 }
 0x131   : > { %v890_v49 = vsub.f32 1.5, %v889_v41 }
 0x132   : > { %v3030_v50 = vpop.eup %3029  ;;  %v3603_v51 = vsub.f32 %v3388_v8, %v721_v55  ;;  %v1040_v9 = vadd.f32 %v3465_v17, %v1020_v33 }
 0x133   : > { %v897_v52 = vmul.f32 %v3030_v50, %v826_v22  ;;  %v891_v23 = vmul.f32 %v3028_v21, %v890_v49  ;;  %vm903_vm6 = vweird.f32 %v3030_v50 }
 0x134   : > { %v753_v58 = vmul.f32 %v3603_v51, %v3603_v51  ;;  %vm904_vm7 = vmor %vm902_vm5, %vm903_vm6 }
 0x135   : > { %v898_v8 = vmul.f32 %v3030_v50, %v897_v52  ;;  %2765 = vmatmul.msk.f32.gmra.mxu0 %vm652_vm0, %v1039_v53  ;;  %2781 = vmatmul.msk.f32.gmra.mxu1 %vm652_vm0, %v1039_v53  ;;  %v895_v2 = vsel %vm3614_vm4, %v3028_v21, %v891_v23 }
 0x136   : > { %v795_v59 = vsel %vm652_vm0, %v753_v58, 0.0  ;;  %v1001_v0 = vmul.f32 %v895_v2, %v3354_v57  ;;  %v3645_v57 = vld [vmem:[%s3558_s27 + $0x30] sm:$0xff] }
 0x137   : > { %v899_v60 = vmul.f32 0.5, %v898_v8  ;;  %796 = vadd.xlane.f32.xlu1 %v795_v59  ;;  %1056 = vadd.xlane.f32.xlu0 %v1055_v37  ;;  %v1070_v16 = vsel %vm652_vm0, %v3645_v57, 0.0 }
 0x138   : > { %1062 = vadd.xlane.f32.xlu2 %v1061_v48  ;;  %v1021_v12 = vmul.f32 %v3458_v46, %v1001_v0 }
 0x139   : > { %v900_v3 = vsub.f32 1.5, %v899_v60 }
 0x13a   : > { %v1041_v14 = vadd.f32 %v3465_v17, %v1021_v12 }
 0x13b   : > { %v901_v10 = vmul.f32 %v3030_v50, %v900_v3 }
 0x13d   : > { %2766 = vmatmul.msk.f32.gmra.mxu0 %vm652_vm0, %v1040_v9  ;;  %2782 = vmatmul.msk.f32.gmra.mxu1 %vm652_vm0, %v1040_v9  ;;  %v905_v13 = vsel %vm904_vm7, %v3030_v50, %v901_v10 }
 0x13e   : > { %v1002_v63 = vmul.f32 %v905_v13, %v3370_v1 }
 0x13f   : > { %1059 = vadd.xlane.f32.xlu1 %v1058_v25  ;;  %1065 = vadd.xlane.f32.xlu0 %v1064_v11 }
 0x140   : > { %v1022_v18 = vmul.f32 %v3458_v46, %v1002_v63 }
 0x142   : > { %v1042_v21 = vadd.f32 %v3465_v17, %v1022_v18 }
 0x145   : > { %2767 = vmatmul.msk.f32.gmra.mxu0 %vm652_vm0, %v1041_v14  ;;  %2783 = vmatmul.msk.f32.gmra.mxu1 %vm652_vm0, %v1041_v14 }
 0x147   : > { %1068 = vadd.xlane.f32.xlu1 %v1067_v15  ;;  %1071 = vadd.xlane.f32.xlu0 %v1070_v16 }
 0x14d   : > { %2768 = vmatmul.msk.f32.gmra.mxu0 %vm652_vm0, %v1042_v21  ;;  %2784 = vmatmul.msk.f32.gmra.mxu1 %vm652_vm0, %v1042_v21 }
 0x182   : > { %v779_v1 = vpop.xlane.xlu1 %778 }
 0x183   : > { %v811_v22 = vmul.f32 %v779_v1, %v3283_v20 }
 0x185   : > { %v827_v26 = vadd.f32 1e-05, %v811_v22 }
 0x187   : > { %3031 = vrsqrt.f32 %v827_v26  ;;  %vm912_vm9 = vweird.f32 %v827_v26 }
 0x18a   : > { %v782_v27 = vpop.xlane.xlu0 %781  ;;  %v785_v28 = vpop.xlane.xlu1 %784 }
 0x18b   : > { %v812_v29 = vmul.f32 %v782_v27, %v3283_v20  ;;  %v813_v32 = vmul.f32 %v785_v28, %v3283_v20 }
 0x18d   : > { %v828_v30 = vadd.f32 1e-05, %v812_v29  ;;  %v3032_v40 = vpop.eup %3031  ;;  %v3662_v5 = vadd.f32 1e-05, %v813_v32 }
 0x18e   : > { %v907_v39 = vmul.f32 %v3032_v40, %v827_v26  ;;  %vm913_vm8 = vweird.f32 %v3032_v40 }
 0x18f   : > { %3033 = vrsqrt.f32 %v828_v30  ;;  %vm914_vm10 = vmor %vm912_vm9, %vm913_vm8  ;;  %vm922_vm11 = vweird.f32 %v828_v30  ;;  %vm932_vm15 = vweird.f32 %v3662_v5 }
 0x190   : > { %3035 = vrsqrt.f32 %v3662_v5  ;;  %v908_v41 = vmul.f32 %v3032_v40, %v907_v39 }
 0x192   : > { %v788_v42 = vpop.xlane.xlu2 %787  ;;  %v800_v44 = vpop.xlane.xlu0 %799  ;;  %v909_v55 = vmul.f32 0.5, %v908_v41 }
 0x193   : > { %v814_v45 = vmul.f32 %v788_v42, %v3283_v20  ;;  %v818_v49 = vmul.f32 %v800_v44, %v3283_v20 }
 0x194   : > { %v910_v52 = vsub.f32 1.5, %v909_v55 }
 0x195   : > { %v3034_v50 = vpop.eup %3033  ;;  %v3667_v53 = vadd.f32 1e-05, %v814_v45  ;;  %v3669_v54 = vadd.f32 1e-05, %v818_v49 }
 0x196   : > { %v3671_v23 = vpop.eup %3035  ;;  %v917_v58 = vmul.f32 %v3034_v50, %v828_v30  ;;  %v911_v37 = vmul.f32 %v3032_v40, %v910_v52  ;;  %vm923_vm12 = vweird.f32 %v3034_v50 }
 0x197   : > { %v927_v36 = vmul.f32 %v3671_v23, %v3662_v5  ;;  %3037 = vrsqrt.f32 %v3667_v53  ;;  %vm3683_vm13 = vmor %vm922_vm11, %vm923_vm12  ;;  %vm933_vm14 = vweird.f32 %v3671_v23  ;;  %vm982_vm3 = vweird.f32 %v3669_v54 }
 0x198   : > { %v918_v8 = vmul.f32 %v3034_v50, %v917_v58  ;;  %3039 = vrsqrt.f32 %v3669_v54  ;;  %v915_v48 = vsel %vm914_vm10, %v3032_v40, %v911_v37  ;;  %vm3712_vm1 = vmor %vm932_vm15, %vm933_vm14  ;;  %vm942_vm6 = vweird.f32 %v3667_v53 }
 0x199   : > { %v928_v59 = vmul.f32 %v3671_v23, %v927_v36  ;;  %v1003_v33 = vmul.f32 %v915_v48, %v3427_v38 }
 0x19a   : > { %v919_v60 = vmul.f32 0.5, %v918_v8  ;;  %v803_v3 = vpop.xlane.xlu2 %802  ;;  %v791_v9 = vpop.xlane.xlu1 %790 }
 0x19b   : > { %v929_v2 = vmul.f32 0.5, %v928_v59  ;;  %v819_v10 = vmul.f32 %v803_v3, %v3283_v20  ;;  %v815_v25 = vmul.f32 %v791_v9, %v3283_v20  ;;  %v1023_v13 = vmul.f32 %v3458_v46, %v1003_v33 }
 0x19c   : > { %v920_v0 = vsub.f32 1.5, %v919_v60 }
 0x19d   : > { %v3681_v11 = vpop.eup %3037  ;;  %v930_v63 = vsub.f32 1.5, %v929_v2  ;;  %v3690_v16 = vadd.f32 1e-05, %v819_v10  ;;  %v3693_v21 = vadd.f32 1e-05, %v815_v25  ;;  %v1043_v29 = vadd.f32 %v3465_v17, %v1023_v13 }
 0x19e   : > { %v3040_v14 = vpop.eup %3039  ;;  %v921_v15 = vmul.f32 %v3034_v50, %v920_v0  ;;  %v937_v38 = vmul.f32 %v3681_v11, %v3667_v53  ;;  %vm943_vm5 = vweird.f32 %v3681_v11 }
 0x19f   : > { %v977_v18 = vmul.f32 %v3040_v14, %v3669_v54  ;;  %3041 = vrsqrt.f32 %v3690_v16  ;;  %v931_v27 = vmul.f32 %v3671_v23, %v930_v63  ;;  %2769 = vmatmul.msk.f32.gmra.mxu0 %vm652_vm0, %v1043_v29  ;;  %2785 = vmatmul.msk.f32.gmra.mxu1 %vm652_vm0, %v1043_v29  ;;  %vm983_vm2 = vweird.f32 %v3040_v14  ;;  %vm3753_vm8 = vmor %vm942_vm6, %vm943_vm5 }
 0x1a0   : > { %v925_v1 = vsel %vm3683_vm13, %v3034_v50, %v921_v15  ;;  %v938_v22 = vmul.f32 %v3681_v11, %v937_v38  ;;  %3043 = vrsqrt.f32 %v3693_v21  ;;  %vm984_vm4 = vmor %vm982_vm3, %vm983_vm2  ;;  %vm992_vm7 = vweird.f32 %v3690_v16  ;;  %v3760_v15 = vld [vmem:[%s3558_s27 + $0x38] sm:$0xff] }
 0x1a1   : > { %v978_v26 = vmul.f32 %v3040_v14, %v977_v18  ;;  %v1004_v32 = vmul.f32 %v925_v1, %v3444_v62  ;;  %v935_v5 = vsel %vm3712_vm1, %v3671_v23, %v931_v27  ;;  %vm952_vm11 = vweird.f32 %v3693_v21 }
 0x1a2   : > { %v939_v28 = vmul.f32 0.5, %v938_v22  ;;  %v794_v40 = vpop.xlane.xlu0 %793  ;;  %v1054_v39 = vpop.xlane.xlu2 %1053  ;;  %v1005_v60 = vmul.f32 %v935_v5, %v3432_v43 }
 0x1a3   : > { %v979_v30 = vmul.f32 0.5, %v978_v26  ;;  %v816_v41 = vmul.f32 %v794_v40, %v3283_v20  ;;  %v1076_v42 = vmul.f32 %v1054_v39, %v3283_v20  ;;  %v1024_v44 = vmul.f32 %v3458_v46, %v1004_v32 }
 0x1a4   : > { %v940_v49 = vsub.f32 1.5, %v939_v28  ;;  %v1025_v63 = vmul.f32 %v3458_v46, %v1005_v60 }
 0x1a5   : > { %v980_v62 = vsub.f32 1.5, %v979_v30  ;;  %v3716_v45 = vpop.eup %3041  ;;  %v3721_v50 = vadd.f32 1e-05, %v816_v41  ;;  %v3724_v52 = vsub.f32 %v3571_v19, %v1076_v42  ;;  %v1044_v23 = vadd.f32 %v3465_v17, %v1024_v44 }
 0x1a6   : > { %v3726_v58 = vpop.eup %3043  ;;  %v987_v36 = vmul.f32 %v3716_v45, %v3690_v16  ;;  %v941_v54 = vmul.f32 %v3681_v11, %v940_v49  ;;  %vm993_vm9 = vweird.f32 %v3716_v45  ;;  %v1045_v16 = vadd.f32 %v3465_v17, %v1025_v63 }
 0x1a7   : > { %v981_v37 = vmul.f32 %v3040_v14, %v980_v62  ;;  %v947_v8 = vmul.f32 %v3726_v58, %v3693_v21  ;;  %3045 = vrsqrt.f32 %v3721_v50  ;;  %v1092_v59 = vmul.f32 %v3724_v52, %v3724_v52  ;;  %2770 = vmatmul.msk.f32.gmra.mxu0 %vm652_vm0, %v1044_v23  ;;  %2786 = vmatmul.msk.f32.gmra.mxu1 %vm652_vm0, %v1044_v23  ;;  %vm994_vm10 = vmor %vm992_vm7, %vm993_vm9 }
 0x1a8   : > { %v988_v19 = vmul.f32 %v3716_v45, %v987_v36  ;;  %v945_v1 = vsel %vm3753_vm8, %v3681_v11, %v941_v54  ;;  %v1073_v11 = vsel %vm652_vm0, %v3760_v15, 0.0  ;;  %vm953_vm12 = vweird.f32 %v3726_v58 }
 0x1a9   : > { %v985_v48 = vsel %vm984_vm4, %v3040_v14, %v981_v37  ;;  %v948_v33 = vmul.f32 %v3726_v58, %v947_v8  ;;  %v1100_v10 = vsel %vm652_vm0, %v1092_v59, 0.0  ;;  %v1006_v41 = vmul.f32 %v945_v1, %v3490_v31  ;;  %vm3802_vm13 = vmor %vm952_vm11, %vm953_vm12 }
 0x1aa   : > { %v1010_v2 = vmul.f32 %v985_v48, %v3450_v6  ;;  %v989_v3 = vmul.f32 0.5, %v988_v19  ;;  %v797_v9 = vpop.xlane.xlu1 %796  ;;  %v1057_v0 = vpop.xlane.xlu0 %1056  ;;  %1101 = vadd.xlane.f32.xlu2 %v1100_v10  ;;  %v4859_v37 = vmov 1   ;;  %vm962_vm14 = vweird.f32 %v3721_v50 }
 0x1ab   : > { %v949_v25 = vmul.f32 0.5, %v948_v33  ;;  %v817_v43 = vmul.f32 %v797_v9, %v3283_v20  ;;  %v1077_v12 = vmul.f32 %v1057_v0, %v3283_v20  ;;  %v1063_v53 = vpop.xlane.xlu2 %1062  ;;  %2946 = vset.pattern.permute.xlu1 %v4859_v37  ;;  %v1026_v48 = vmul.f32 %v3458_v46, %v1006_v41 }
 0x1ac   : > { %v1030_v6 = vmul.f32 %v3458_v46, %v1010_v2  ;;  %v990_v14 = vsub.f32 1.5, %v989_v3  ;;  %v1079_v38 = vmul.f32 %v1063_v53, %v3283_v20 }
 0x1ad   : > { %v3763_v18 = vpop.eup %3045  ;;  %v3768_v22 = vadd.f32 1e-05, %v817_v43  ;;  %v3771_v26 = vsub.f32 %v3599_v56, %v1077_v12  ;;  %v950_v29 = vsub.f32 1.5, %v949_v25 }
 0x1ae   : > { %v3774_v27 = vadd.f32 %v3465_v17, %v1030_v6  ;;  %v991_v28 = vmul.f32 %v3716_v45, %v990_v14  ;;  %v957_v32 = vmul.f32 %v3763_v18, %v3721_v50  ;;  %v3780_v30 = vsub.f32 %v3606_v35, %v1079_v38 }
 0x1af   : > { %3047 = vrsqrt.f32 %v3768_v22  ;;  %v1093_v56 = vmul.f32 %v3771_v26, %v3771_v26  ;;  %v951_v44 = vmul.f32 %v3726_v58, %v950_v29  ;;  %2771 = vmatmul.msk.f32.gmra.mxu0 %vm652_vm0, %v1045_v16  ;;  %2787 = vmatmul.msk.f32.gmra.mxu1 %vm652_vm0, %v1045_v16  ;;  %vm963_vm15 = vweird.f32 %v3763_v18  ;;  %v3890_v16 = vpop.f32.mrf.mxu1 }
 0x1b0   : > { %2776 = vmatmul.msk.f32.vlgmr.msra.gmra.mxu2 %vm652_vm0, %v3774_v27  ;;  %v995_v40 = vsel %vm994_vm10, %v3716_v45, %v991_v28  ;;  %v958_v35 = vmul.f32 %v3763_v18, %v957_v32  ;;  %v1095_v21 = vmul.f32 %v3780_v30, %v3780_v30  ;;  %vm3837_vm1 = vmor %vm962_vm14, %vm963_vm15  ;;  %vm972_vm2 = vweird.f32 %v3768_v22 }
 0x1b1   : > { %v1103_v39 = vsel %vm652_vm0, %v1093_v56, 0.0  ;;  %v1011_v42 = vmul.f32 %v995_v40, %v3499_v34  ;;  %v955_v59 = vsel %vm3802_vm13, %v3726_v58, %v951_v44  ;;  %v1046_v58 = vadd.f32 %v3465_v17, %v1026_v48  ;;  %v1441_v48 = vld [vmem:[%s4842_s5 + $0x18] sm:$0xff] }
 0x1b2   : > { %v959_v55 = vmul.f32 0.5, %v958_v35  ;;  %v1060_v62 = vpop.xlane.xlu1 %1059  ;;  %1104 = vadd.xlane.f32.xlu1 %v1103_v39  ;;  %v1066_v45 = vpop.xlane.xlu0 %1065  ;;  %1074 = vadd.xlane.f32.xlu2 %v1073_v11  ;;  %v1109_v33 = vsel %vm652_vm0, %v1095_v21, 0.0  ;;  %v1007_v0 = vmul.f32 %v955_v59, %v3535_v61  ;;  %v3885_v35 = vld [vmem:[%s3882_s21] sm:$0xff]  ;;  %v4865_v39 = vmov 4  }
 0x1b3   : > { %v1078_v31 = vmul.f32 %v1060_v62, %v3283_v20  ;;  %v1080_v34 = vmul.f32 %v1066_v45, %v3283_v20  ;;  %v1031_v49 = vmul.f32 %v3458_v46, %v1011_v42  ;;  %1482 = vmatpush.msra.mxu2 %v1441_v48 }
 0x1b4   : > { %v960_v60 = vsub.f32 1.5, %v959_v55  ;;  %v1027_v14 = vmul.f32 %v3458_v46, %v1007_v0 }
 0x1b5   : > { %v3048_v36 = vpop.eup %3047  ;;  %v3813_v8 = vsub.f32 %v3627_v4, %v1078_v31  ;;  %v3816_v23 = vsub.f32 %v3630_v7, %v1080_v34  ;;  %v1051_v19 = vadd.f32 %v3465_v17, %v1031_v49  ;;  %v3912_v31 = vld [vmem:[%s3882_s21 + $0x8] sm:$0xff] }
 0x1b6   : > { %v967_v54 = vmul.f32 %v3048_v36, %v3768_v22  ;;  %v961_v10 = vmul.f32 %v3763_v18, %v960_v60  ;;  %vm973_vm3 = vweird.f32 %v3048_v36  ;;  %v1440_v60 = vld [vmem:[%s4842_s5 + $0x10] sm:$0xff] }
 0x1b7   : > { %v1094_v4 = vmul.f32 %v3813_v8, %v3813_v8  ;;  %v1096_v7 = vmul.f32 %v3816_v23, %v3816_v23  ;;  %2772 = vmatmul.msk.f32.gmra.mxu0 %vm652_vm0, %v1046_v58  ;;  %2788 = vmatmul.msk.f32.gmra.mxu1 %vm652_vm0, %v1046_v58  ;;  %vm974_vm4 = vmor %vm972_vm2, %vm973_vm3  ;;  %v3896_v42 = vpop.f32.mrf.mxu1 }
 0x1b8   : > { %2777 = vmatmul.msk.f32.gmra.mxu2 %vm652_vm0, %v1051_v19  ;;  %v968_v2 = vmul.f32 %v3048_v36, %v967_v54  ;;  %v965_v63 = vsel %vm3837_vm1, %v3763_v18, %v961_v10  ;;  %v1439_v54 = vld [vmem:[%s4842_s5 + $0x8] sm:$0xff]  ;;  %v3949_v10 = vld [vmem:[%s3882_s21 + $0x10] sm:$0xff] }
 0x1b9   : > { %v1106_v3 = vsel %vm652_vm0, %v1094_v4, 0.0  ;;  %v1112_v9 = vsel %vm652_vm0, %v1096_v7, 0.0  ;;  %v1008_v18 = vmul.f32 %v965_v63, %v3576_v24  ;;  %1483 = vmatpush.msra.mxu2 %v1440_v60  ;;  %v4863_v4 = vmov 7   ;;  %v1438_v7 = vld [vmem:[%s4842_s5] sm:$0xff] }
 0x1ba   : > { %v969_v25 = vmul.f32 0.5, %v968_v2  ;;  %v1069_v43 = vpop.xlane.xlu1 %1068  ;;  %1107 = vadd.xlane.f32.xlu0 %v1106_v3  ;;  %v1072_v12 = vpop.xlane.xlu0 %1071  ;;  %1110 = vadd.xlane.f32.xlu1 %v1109_v33 }
 0x1bb   : > { %v1081_v6 = vmul.f32 %v1069_v43, %v3283_v20  ;;  %v1082_v53 = vmul.f32 %v1072_v12, %v3283_v20  ;;  %1113 = vadd.xlane.f32.xlu2 %v1112_v9  ;;  %v1028_v22 = vmul.f32 %v3458_v46, %v1008_v18  ;;  %1484 = vmatpush.msra.mxu2 %v1439_v54  ;;  %v3954_v43 = vld [vmem:[%s3882_s21 + $0x18] sm:$0xff] }
 0x1bc   : > { %v970_v38 = vsub.f32 1.5, %v969_v25 }
 0x1bd   : > { %v3846_v61 = vsub.f32 %v3642_v47, %v1081_v6  ;;  %v3849_v13 = vsub.f32 %v3645_v57, %v1082_v53  ;;  %v1047_v57 = vadd.f32 %v3465_v17, %v1027_v14  ;;  %v1048_v56 = vadd.f32 %v3465_v17, %v1028_v22  ;;  %1485 = vmatpush.msra.mxu2 %v1438_v7 }
 0x1be   : > { %v971_v32 = vmul.f32 %v3048_v36, %v970_v38 }
 0x1bf   : > { %v1097_v1 = vmul.f32 %v3846_v61, %v3846_v61  ;;  %v1098_v47 = vmul.f32 %v3849_v13, %v3849_v13  ;;  %2773 = vmatmul.msk.f32.gmra.mxu0 %vm652_vm0, %v1047_v57  ;;  %2789 = vmatmul.msk.f32.gmra.mxu1 %vm652_vm0, %v1047_v57  ;;  %v3901_v55 = vpop.f32.mrf.mxu1 }
 0x1c0   : > { %2792 = vmatmul.msk.f32.vlgmr.msrb.gmra.mxu2 %vm652_vm0, %v3774_v27  ;;  %v975_v27 = vsel %vm974_vm4, %v3048_v36, %v971_v32  ;;  %v4861_v36 = vmov 6  }
 0x1c1   : > { %v1115_v28 = vsel %vm652_vm0, %v1097_v1, 0.0  ;;  %v1118_v29 = vsel %vm652_vm0, %v1098_v47, 0.0  ;;  %v1009_v11 = vmul.f32 %v975_v27, %v3603_v51  ;;  %v3888_v51 = vpop.f32.mrf.mxu0  ;;  %2960 = vset.pattern.permute.xlu0 %v4861_v36  ;;  %v3136_v1 = vmov 2  }
 0x1c2   : > { %1116 = vadd.xlane.f32.xlu0 %v1115_v28  ;;  %1119 = vadd.xlane.f32.xlu1 %v1118_v29 }
 0x1c3   : > { %v1029_v24 = vmul.f32 %v3458_v46, %v1009_v11  ;;  %2947 = vset.pattern.permute.xlu2 %v3136_v1  ;;  %v3137_v11 = vmov 0  }
 0x1c5   : > { %v1049_v40 = vadd.f32 %v3465_v17, %v1029_v24 }
 0x1c7   : > { %2774 = vmatmul.msk.f32.gmra.mxu0 %vm652_vm0, %v1048_v56  ;;  %2790 = vmatmul.msk.f32.gmra.mxu1 %vm652_vm0, %v1048_v56  ;;  %v3905_v45 = vpop.f32.mrf.mxu1 }
 0x1c8   : > { %2793 = vmatmul.msk.f32.gmra.mxu2 %vm652_vm0, %v1051_v19 }
 0x1c9   : > { %v3894_v41 = vpop.f32.mrf.mxu0 }
 0x1cf   : > { %2775 = vmatmul.msk.f32.gmra.mxu0 %vm652_vm0, %v1049_v40  ;;  %2791 = vmatmul.msk.f32.gmra.mxu1 %vm652_vm0, %v1049_v40  ;;  %v3909_v5 = vpop.f32.mrf.mxu1 }
 0x1d1   : > { %v3899_v44 = vpop.f32.mrf.mxu0 }
 0x1d6   : > { %1974 = vperm.xlu0 %2960, %v3912_v31  }
 0x1d7   : > { %v3917_v49 = vpop.f32.mrf.mxu1 }
 0x1d9   : > { %v3903_v62 = vpop.f32.mrf.mxu0 }
 0x1db   : > { %1691 = vperm.xlu1 %2946, %v3885_v35  }
 0x1de   : > { %2965 = vset.pattern.permute.xlu0 %v4859_v37 }
 0x1df   : > { %v3928_v59 = vpop.f32.mrf.mxu1  ;;  %1700 = vperm.xlu0 %2965, %v3954_v43  }
 0x1e1   : > { %v3907_v21 = vpop.f32.mrf.mxu0 }
 0x1e3   : > { %2949 = vset.pattern.permute.xlu1 %v4865_v39 }
 0x1e4   : > { %1859 = vperm.xlu1 %2949, %v3885_v35  }
 0x1e7   : > { %2966 = vset.pattern.permute.xlu0 %v3137_v11 }
 0x1e8   : > { %1635 = vperm.xlu0 %2966, %v3885_v35  }
 0x1e9   : > { %v3915_v34 = vpop.f32.mrf.mxu0 }
 0x1ec   : > { %2951 = vset.pattern.permute.xlu1 %v4859_v37 }
 0x1ed   : > { %1694 = vperm.xlu1 %2951, %v3912_v31  }
 0x1f1   : > { %v3926_v19 = vpop.f32.mrf.mxu0 }
 0x1f5   : > { %2953 = vset.pattern.permute.xlu1 %v4861_v36 }
 0x1f6   : > { %1971 = vperm.xlu1 %2953, %v3885_v35  }
 0x1fe   : > { %2955 = vset.pattern.permute.xlu1 %v4863_v4 }
 0x1ff   : > { %2027 = vperm.xlu1 %2955, %v3885_v35  }
 0x207   : > { %2957 = vset.pattern.permute.xlu1 %v4859_v37 }
 0x208   : > { %1697 = vperm.xlu1 %2957, %v3949_v10  }
 0x210   : > { %2959 = vset.pattern.permute.xlu1 %v3136_v1 }
 0x211   : > { %1753 = vperm.xlu1 %2959, %v3949_v10  }
 0x219   : > { %2962 = vset.pattern.permute.xlu1 %v4863_v4 }
 0x21a   : > { %2030 = vperm.xlu1 %2962, %v3912_v31  }
 0x21c   : > { %v3942_v2 = vpop.f32.mrf.mxu0  ;;  %v3944_v58 = vpop.f32.mrf.mxu1 }
 0x21d   : > { %v1102_v33 = vpop.xlane.xlu2 %1101 }
 0x21e   : > { %v1124_v3 = vmul.f32 %v1102_v33, %v3283_v20 }
 0x220   : > { %v1132_v9 = vadd.f32 1e-05, %v1124_v3 }
 0x222   : > { %3049 = vrsqrt.f32 %v1132_v9  ;;  %vm1146_vm6 = vweird.f32 %v1132_v9  ;;  %2964 = vset.pattern.permute.xlu1 %v3137_v11 }
 0x223   : > { %1644 = vperm.xlu1 %2964, %v3954_v43  }
 0x224   : > { %v3957_v50 = vpop.f32.mrf.mxu0  ;;  %v3959_v6 = vpop.f32.mrf.mxu1 }
 0x225   : > { %v1105_v0 = vpop.xlane.xlu1 %1104  ;;  %v1075_v12 = vpop.xlane.xlu2 %1074 }
 0x226   : > { %v1125_v25 = vmul.f32 %v1105_v0, %v3283_v20  ;;  %v1083_v14 = vmul.f32 %v1075_v12, %v3283_v20 }
 0x228   : > { %v1133_v53 = vadd.f32 1e-05, %v1125_v25  ;;  %v3050_v63 = vpop.eup %3049  ;;  %v3963_v38 = vsub.f32 %v3760_v15, %v1083_v14 }
 0x229   : > { %v1141_v47 = vmul.f32 %v3050_v63, %v1132_v9  ;;  %vm1147_vm5 = vweird.f32 %v3050_v63 }
 0x22a   : > { %3051 = vrsqrt.f32 %v1133_v53  ;;  %v1099_v57 = vmul.f32 %v3963_v38, %v3963_v38  ;;  %vm1148_vm7 = vmor %vm1146_vm6, %vm1147_vm5  ;;  %vm1156_vm8 = vweird.f32 %v1133_v53 }
 0x22b   : > { %v1142_v28 = vmul.f32 %v3050_v63, %v1141_v47  ;;  %2968 = vset.pattern.permute.xlu1 %v3136_v1 }
 0x22c   : > { %v1121_v27 = vsel %vm652_vm0, %v1099_v57, 0.0  ;;  %v3973_v40 = vpop.f32.mrf.mxu0  ;;  %v3975_v48 = vpop.f32.mrf.mxu1  ;;  %1756 = vperm.xlu1 %2968, %v3954_v43  }
 0x22d   : > { %v1108_v29 = vpop.xlane.xlu0 %1107  ;;  %v1111_v18 = vpop.xlane.xlu1 %1110  ;;  %v1143_v15 = vmul.f32 0.5, %v1142_v28  ;;  %1122 = vadd.xlane.f32.xlu2 %v1121_v27 }
 0x22e   : > { %v1126_v32 = vmul.f32 %v1108_v29, %v3283_v20  ;;  %v1127_v22 = vmul.f32 %v1111_v18, %v3283_v20  ;;  %v1114_v56 = vpop.xlane.xlu2 %1113  ;;  %v3987_v29 = vld [vmem:[%s3882_s21 + $0x28] sm:$0xff] }
 0x22f   : > { %v1128_v7 = vmul.f32 %v1114_v56, %v3283_v20  ;;  %v1144_v33 = vsub.f32 1.5, %v1143_v15  ;;  %1650 = vperm.xlu0 %2966, %v3987_v29  }
 0x230   : > { %v3052_v24 = vpop.eup %3051  ;;  %v1134_v60 = vadd.f32 1e-05, %v1126_v32  ;;  %v3977_v54 = vadd.f32 1e-05, %v1127_v22 }
 0x231   : > { %v1151_v3 = vmul.f32 %v3052_v24, %v1133_v53  ;;  %v1145_v25 = vmul.f32 %v3050_v63, %v1144_v33  ;;  %v3983_v14 = vadd.f32 1e-05, %v1128_v7  ;;  %vm1157_vm9 = vweird.f32 %v3052_v24 }
 0x232   : > { %3053 = vrsqrt.f32 %v1134_v60  ;;  %vm3991_vm10 = vmor %vm1156_vm8, %vm1157_vm9  ;;  %vm1166_vm11 = vweird.f32 %v1134_v60  ;;  %vm1176_vm14 = vweird.f32 %v3977_v54 }
 0x233   : > { %v1359_v0 = vpop.f32.mrf.mxu2  ;;  %v1152_v12 = vmul.f32 %v3052_v24, %v1151_v3  ;;  %3055 = vrsqrt.f32 %v3977_v54  ;;  %v1149_v47 = vsel %vm1148_vm7, %v3050_v63, %v1145_v25  ;;  %vm1186_vm2 = vweird.f32 %v3983_v14 }
 0x234   : > { %3057 = vrsqrt.f32 %v3983_v14  ;;  %v1220_v9 = vmul.f32 %v1149_v47, %v3724_v52  ;;  %v3995_v15 = vpop.f32.mrf.mxu0  ;;  %v3997_v53 = vpop.f32.mrf.mxu1 }
 0x235   : > { %v1153_v57 = vmul.f32 0.5, %v1152_v12  ;;  %v1117_v28 = vpop.xlane.xlu0 %1116  ;;  %v1120_v3 = vpop.xlane.xlu1 %1119 }
 0x236   : > { %v1129_v18 = vmul.f32 %v1117_v28, %v3283_v20  ;;  %v1228_v52 = vmul.f32 %v3458_v46, %v1220_v9 }
 0x237   : > { %v1154_v32 = vsub.f32 1.5, %v1153_v57  ;;  %v4014_v57 = vld [vmem:[%s4845_s8] ss:$0 sm:$0xff] }
 0x238   : > { %v3054_v22 = vpop.eup %3053  ;;  %v3999_v63 = vadd.f32 1e-05, %v1129_v18  ;;  %v1130_v18 = vmul.f32 %v1120_v3, %v3283_v20  ;;  %v1236_v36 = vadd.f32 %v3465_v17, %v1228_v52  ;;  %v4039_v17 = vld [vmem:[%s4872_s22] ss:$0 sm:$0xff]  ;;  %v3138_v52 = vmov 3  }
 0x239   : > { %v4003_v56 = vpop.eup %3055  ;;  %v1155_v7 = vmul.f32 %v3052_v24, %v1154_v32  ;;  %v1161_v33 = vmul.f32 %v3054_v22, %v1134_v60  ;;  %vm1167_vm12 = vweird.f32 %v3054_v22  ;;  %2983 = vset.pattern.permute.xlu0 %v3138_v52  ;;  %2970 = vset.pattern.permute.xlu1 %v3138_v52 }
 0x23a   : > { %v1171_v25 = vmul.f32 %v4003_v56, %v3977_v54  ;;  %v4009_v47 = vpop.eup %3057  ;;  %3059 = vrsqrt.f32 %v3999_v63  ;;  %2794 = vmatmul.msk.f32.vlgmr.msra.gmra.mxu2 %vm652_vm0, %v1236_v36  ;;  %vm4028_vm13 = vmor %vm1166_vm11, %vm1167_vm12  ;;  %v4044_v3 = vadd.f32 1e-05, %v1130_v18  ;;  %1818 = vperm.xlu0 %2983, %v3987_v29   ;;  %vm1177_vm15 = vweird.f32 %v4003_v56 }
 0x23b   : > { %v1362_v12 = vpop.f32.mrf.mxu2  ;;  %v1159_v28 = vsel %vm3991_vm10, %v3052_v24, %v1155_v7  ;;  %v1162_v46 = vmul.f32 %v3054_v22, %v1161_v33  ;;  %v1181_v24 = vmul.f32 %v4009_v47, %v3983_v14  ;;  %vm4068_vm1 = vmor %vm1176_vm14, %vm1177_vm15  ;;  %vm1187_vm3 = vweird.f32 %v4009_v47  ;;  %1812 = vperm.xlu1 %2970, %v3954_v43  }
 0x23c   : > { %v1172_v9 = vmul.f32 %v4003_v56, %v1171_v25  ;;  %v1363_v37 = vadd.f32 %v4014_v57, %v1362_v12  ;;  %v1221_v4 = vmul.f32 %v1159_v28, %v3771_v26  ;;  %v4032_v7 = vpop.f32.mrf.mxu0  ;;  %v4034_v33 = vpop.f32.mrf.mxu1  ;;  %3061 = vrsqrt.f32 %v4044_v3  ;;  %vm4099_vm4 = vmor %vm1186_vm2, %vm1187_vm3 }
 0x23d   : > { %v1163_v32 = vmul.f32 0.5, %v1162_v46  ;;  %v1182_v28 = vmul.f32 %v4009_v47, %v1181_v24  ;;  %vm1196_vm5 = vweird.f32 %v3999_v63  ;;  %vm1206_vm8 = vweird.f32 %v4044_v3 }
 0x23e   : > { %v1173_v39 = vmul.f32 0.5, %v1172_v9  ;;  %2802 = vmatpush.xpose.msk.msra.mxu3 %vm652_vm0, %v1363_v37  ;;  %v1229_v26 = vmul.f32 %v4039_v17, %v1221_v4  ;;  %v1360_v37 = vadd.f32 %v4014_v57, %v1359_v0  ;;  %v4060_v0 = vld [vmem:[%s4841_s4] ss:$0 sm:$0xff] }
 0x23f   : > { %v1164_v27 = vsub.f32 1.5, %v1163_v32 }
 0x240   : > { %v4048_v25 = vpop.eup %3059  ;;  %v1174_v12 = vsub.f32 1.5, %v1173_v39  ;;  %v1237_v39 = vadd.f32 %v4060_v0, %v1229_v26  ;;  %v3139_v26 = vmov 5  }
 0x241   : > { %v1165_v36 = vmul.f32 %v3054_v22, %v1164_v27  ;;  %v1191_v32 = vmul.f32 %v4048_v25, %v3999_v63  ;;  %vm1197_vm6 = vweird.f32 %v4048_v25 }
 0x242   : > { %2803 = vmatpush.xpose.msk.msra.mxu3 %vm652_vm0, %v1360_v37  ;;  %v1175_v18 = vmul.f32 %v4003_v56, %v1174_v12  ;;  %2795 = vmatmul.msk.f32.gmra.mxu2 %vm652_vm0, %v1237_v39  ;;  %vm4126_vm7 = vmor %vm1196_vm5, %vm1197_vm6 }
 0x243   : > { %v1432_v46 = vpop.f32.mrf.mxu2  ;;  %v1169_v4 = vsel %vm4028_vm13, %v3054_v22, %v1165_v36  ;;  %v1183_v22 = vmul.f32 0.5, %v1182_v28  ;;  %2984 = vset.pattern.permute.xlu0 %v3139_v26  ;;  %v1192_v12 = vmul.f32 %v4048_v25, %v1191_v32  ;;  %2972 = vset.pattern.permute.xlu1 %v3137_v11 }
 0x244   : > { %v1222_v9 = vmul.f32 %v1169_v4, %v3813_v8  ;;  %v1353_v27 = vpop.f32.mrf.mxu0  ;;  %v1426_v60 = vpop.f32.mrf.mxu1  ;;  %v4078_v8 = vld [vmem:[%s4847_s10] ss:$0 sm:$0xff]  ;;  %v1179_v36 = vsel %vm4068_vm1, %v4003_v56, %v1175_v18  ;;  %1915 = vperm.xlu0 %2984, %v3885_v35  }
 0x245   : > { %1747 = vperm.xlu2 %2947, %v3885_v35   ;;  %v1184_v37 = vsub.f32 1.5, %v1183_v22  ;;  %v4087_v4 = vpop.eup %3061  ;;  %v1223_v56 = vmul.f32 %v1179_v36, %v3780_v30  ;;  %v1193_v22 = vmul.f32 0.5, %v1192_v12  ;;  %v1433_v54 = vadd.f32 %v4078_v8, %v1432_v46 }
 0x246   : > { %v1230_v24 = vmul.f32 %v4039_v17, %v1222_v9  ;;  %v1201_v32 = vmul.f32 %v4087_v4, %v4044_v3  ;;  %vm1207_vm9 = vweird.f32 %v4087_v4 }
 0x247   : > { %v1185_v18 = vmul.f32 %v4009_v47, %v1184_v37  ;;  %v1231_v37 = vmul.f32 %v4039_v17, %v1223_v56  ;;  %v1194_v12 = vsub.f32 1.5, %v1193_v22  ;;  %v1424_v22 = vadd.f32 %v4078_v8, %v4034_v33  ;;  %vm4163_vm10 = vmor %vm1206_vm8, %vm1207_vm9 }
 0x248   : > { %v1238_v9 = vadd.f32 %v4060_v0, %v1230_v24 }
 0x249   : > { %v1189_v46 = vsel %vm4099_vm4, %v4009_v47, %v1185_v18  ;;  %v1239_v47 = vadd.f32 %v4060_v0, %v1231_v37  ;;  %v1406_v37 = vadd.f32 %v4078_v8, %v3917_v49 }
 0x24a   : > { %2796 = vmatmul.msk.f32.gmra.mxu2 %vm652_vm0, %v1238_v9  ;;  %v1427_v9 = vadd.f32 %v4078_v8, %v1426_v60  ;;  %v1224_v56 = vmul.f32 %v1189_v46, %v3816_v23  ;;  %v1195_v60 = vmul.f32 %v4048_v25, %v1194_v12  ;;  %v1421_v23 = vadd.f32 %v4078_v8, %v3997_v53 }
 0x24b   : > { %v1435_v28 = vpop.f32.mrf.mxu2  ;;  %v4905_v53 = vmov 4  }
 0x24c   : > { %v1436_v39 = vadd.f32 %v4078_v8, %v1435_v28  ;;  %v1356_v14 = vpop.f32.mrf.mxu0  ;;  %v1429_v24 = vpop.f32.mrf.mxu1  ;;  %1930 = vperm.xlu0 %2984, %v3987_v29   ;;  %v1232_v33 = vmul.f32 %v4039_v17, %v1224_v56  ;;  %v4910_v56 = vmov 1  }
 0x24d   : > { %2948 = vset.pattern.permute.xlu2 %v3138_v52  ;;  %v1357_v30 = vadd.f32 %v4014_v57, %v1356_v14  ;;  %v1430_v36 = vadd.f32 %v4078_v8, %v1429_v24  ;;  %v1415_v14 = vadd.f32 %v4078_v8, %v3959_v6 }
 0x24e   : > { %2178 = vmatpush.msrb.mxu2 %v1436_v39  ;;  %1803 = vperm.xlu2 %2948, %v3885_v35   ;;  %v1202_v39 = vmul.f32 %v4087_v4, %v1201_v32  ;;  %v1354_v35 = vadd.f32 %v4014_v57, %v1353_v27  ;;  %v1351_v27 = vadd.f32 %v4014_v57, %v4032_v7  ;;  %v4148_v7 = vld [vmem:[%s3882_s21 + $0x20] sm:$0xff] }
 0x24f   : > { %2804 = vmatpush.xpose.msk.msra.mxu3 %vm652_vm0, %v1357_v30  ;;  %v1418_v32 = vadd.f32 %v4078_v8, %v3975_v48  ;;  %v1348_v48 = vadd.f32 %v4014_v57, %v3995_v15  ;;  %v1412_v30 = vadd.f32 %v4078_v8, %v3944_v58  ;;  %1647 = vperm.xlu1 %2972, %v4148_v7   ;;  %v4172_v15 = vld [vmem:[%s3882_s21 + $0x30] sm:$0xff] }
 0x250   : > { %2179 = vmatpush.msrb.mxu2 %v1433_v54  ;;  %v1203_v18 = vmul.f32 0.5, %v1202_v39  ;;  %v1199_v54 = vsel %vm4126_vm7, %v4048_v25, %v1195_v60  ;;  %v1240_v25 = vadd.f32 %v4060_v0, %v1232_v33  ;;  %v1345_v58 = vadd.f32 %v4014_v57, %v3973_v40 }
 0x251   : > { %v1225_v24 = vmul.f32 %v1199_v54, %v3846_v61  ;;  %v1409_v61 = vadd.f32 %v4078_v8, %v3928_v59  ;;  %v1403_v59 = vadd.f32 %v4078_v8, %v3909_v5  ;;  %v1342_v40 = vadd.f32 %v4014_v57, %v3957_v50 }
 0x252   : > { %2180 = vmatpush.msrb.mxu2 %v1430_v36  ;;  %v1204_v28 = vsub.f32 1.5, %v1203_v18  ;;  %v1397_v5 = vadd.f32 %v4078_v8, %v3901_v55  ;;  %v1339_v50 = vadd.f32 %v4014_v57, %v3942_v2  ;;  %v1391_v55 = vadd.f32 %v4078_v8, %v3890_v16 }
 0x253   : > { %2797 = vmatmul.msk.f32.gmra.mxu2 %vm652_vm0, %v1239_v47  ;;  %2805 = vmatpush.xpose.msk.msra.mxu3 %vm652_vm0, %v1354_v35  ;;  %v1233_v36 = vmul.f32 %v4039_v17, %v1225_v24  ;;  %v1336_v2 = vadd.f32 %v4014_v57, %v3926_v19  ;;  %v1333_v16 = vadd.f32 %v4014_v57, %v3915_v34  ;;  %v1632_v47 = vlaneseq }
 0x254   : > { %2181 = vmatpush.msrb.mxu2 %v1427_v9  ;;  %2989 = vset.pattern.permute.xlu0 %v4905_v53  ;;  %v1205_v6 = vmul.f32 %v4087_v4, %v1204_v28  ;;  %v1330_v19 = vadd.f32 %v4014_v57, %v3907_v21  ;;  %v1327_v34 = vadd.f32 %v4014_v57, %v3903_v62  ;;  %v4908_v21 = vmov 7   ;;  %v1692_v9 = vpop.permute.xlu1 %1691 }
 0x255   : > { %1862 = vperm.xlu0 %2989, %v3912_v31   ;;  %v1241_v49 = vadd.f32 %v4060_v0, %v1233_v36  ;;  %v1321_v62 = vadd.f32 %v4014_v57, %v3894_v41  ;;  %v4909_v41 = vmov 6   ;;  %v4274_v18 = vand.u32 127, %v1632_v47 }
 0x256   : > { %2182 = vmatpush.msrb.mxu2 %v1424_v22  ;;  %2950 = vset.pattern.permute.xlu2 %v3137_v11  ;;  %v1209_v46 = vsel %vm4163_vm10, %v4087_v4, %v1205_v6  ;;  %v1400_v4 = vadd.f32 %v4078_v8, %v3905_v45  ;;  %v1394_v45 = vadd.f32 %v4078_v8, %v3896_v42  ;;  %v4222_v42 = vld [vmem:[%s3882_s21 + $0x38] sm:$0xff]  ;;  %v3140_v33 = vmov 0.0  }
 0x257   : > { %1638 = vperm.xlu2 %2950, %v3912_v31   ;;  %2806 = vmatpush.xpose.msk.msra.mxu3 %vm652_vm0, %v1351_v27  ;;  %v1226_v12 = vmul.f32 %v1209_v46, %v3849_v13  ;;  %v1324_v8 = vadd.f32 %v4014_v57, %v3899_v44  ;;  %v1318_v44 = vadd.f32 %v4014_v57, %v3888_v51  ;;  %v4264_v51 = vpop.permute.xlu0 %1974 }
 0x258   : > { %2183 = vmatpush.msrb.mxu2 %v1421_v23  ;;  %2974 = vset.pattern.permute.xlu1 %v3139_v26  ;;  %vm1714_vm11 = vcmp.eq.s32.totalorder %v4274_v18, %v1692_v9 }
 0x259   : > { %1924 = vperm.xlu1 %2974, %v3954_v43   ;;  %v1234_v13 = vmul.f32 %v4039_v17, %v1226_v12 }
 0x25a   : > { %2184 = vmatpush.msrb.mxu2 %v1418_v32  ;;  %v2834_v32 = vsel %vm1714_vm11, 1.0, %v3140_v33 }
 0x25b   : > { %2798 = vmatmul.msk.f32.gmra.mxu2 %vm652_vm0, %v1240_v25  ;;  %2807 = vmatpush.xpose.msk.msra.mxu3 %vm652_vm0, %v1348_v48  ;;  %v1242_v39 = vadd.f32 %v4060_v0, %v1234_v13 }
 0x25c   : > { %2185 = vmatpush.msrb.mxu2 %v1415_v14 }
 0x25d   : > { %1877 = vperm.xlu0 %2989, %v4172_v15  }
 0x25e   : > { %2186 = vmatpush.msrb.mxu2 %v1412_v30 }
 0x25f   : > { %2952 = vset.pattern.permute.xlu2 %v3136_v1  ;;  %2808 = vmatpush.xpose.msk.msra.mxu3 %vm652_vm0, %v1345_v58  ;;  %v4272_v60 = vpop.permute.xlu0 %1700 }
 0x260   : > { %2187 = vmatpush.msrb.mxu2 %v1409_v61  ;;  %1750 = vperm.xlu2 %2952, %v3912_v31   ;;  %vm1717_vm6 = vcmp.eq.s32.totalorder %v4274_v18, %v4272_v60 }
 0x261   : > { %2976 = vset.pattern.permute.xlu1 %v3138_v52 }
 0x262   : > { %2188 = vmatpush.msrb.mxu2 %v1406_v37  ;;  %1815 = vperm.xlu1 %2976, %v4148_v7  }
 0x263   : > { %2799 = vmatmul.msk.f32.gmra.mxu2 %vm652_vm0, %v1241_v49  ;;  %2809 = vmatpush.xpose.msk.msra.mxu3 %vm652_vm0, %v1342_v40 }
 0x264   : > { %2189 = vmatpush.msrb.mxu2 %v1403_v59 }
 0x265   : > { %2994 = vset.pattern.permute.xlu0 %v3136_v1 }
 0x266   : > { %2190 = vmatpush.msrb.mxu2 %v1400_v4  ;;  %1759 = vperm.xlu0 %2994, %v4148_v7  }
 0x267   : > { %2810 = vmatpush.xpose.msk.msra.mxu3 %vm652_vm0, %v1339_v50  ;;  %v1636_v54 = vpop.permute.xlu0 %1635 }
 0x268   : > { %2191 = vmatpush.msrb.mxu2 %v1397_v5  ;;  %2954 = vset.pattern.permute.xlu2 %v3138_v52  ;;  %vm1658_vm12 = vcmp.eq.s32.totalorder %v4274_v18, %v1636_v54 }
 0x269   : > { %1806 = vperm.xlu2 %2954, %v3912_v31  }
 0x26a   : > { %2192 = vmatpush.msrb.mxu2 %v1394_v45  ;;  %2978 = vset.pattern.permute.xlu1 %v4905_v53 }
 0x26b   : > { %2800 = vmatmul.msk.f32.gmra.mxu2 %vm652_vm0, %v1242_v39  ;;  %2811 = vmatpush.xpose.msk.msra.mxu3 %vm652_vm0, %v1336_v2 }
 0x26c   : > { %2193 = vmatpush.msrb.mxu2 %v1391_v55  ;;  %1871 = vperm.xlu1 %2978, %v4148_v7  }
 0x26e   : > { %1768 = vperm.xlu0 %2994, %v4222_v42  }
 0x26f   : > { %2812 = vmatpush.xpose.msk.msra.mxu3 %vm652_vm0, %v1333_v16 }
 0x271   : > { %2956 = vset.pattern.permute.xlu2 %v3137_v11 }
 0x272   : > { %1641 = vperm.xlu2 %2956, %v3949_v10  }
 0x273   : > { %2813 = vmatpush.xpose.msk.msra.mxu3 %vm652_vm0, %v1330_v19 }
 0x274   : > { %2980 = vset.pattern.permute.xlu1 %v3139_v26 }
 0x275   : > { %1927 = vperm.xlu1 %2980, %v4148_v7  }
 0x276   : > { %2998 = vset.pattern.permute.xlu0 %v4908_v21 }
 0x277   : > { %2814 = vmatpush.xpose.msk.msra.mxu3 %vm652_vm0, %v1327_v34  ;;  %2033 = vperm.xlu0 %2998, %v3949_v10  }
 0x27a   : > { %2958 = vset.pattern.permute.xlu2 %v3139_v26 }
 0x27b   : > { %1918 = vperm.xlu2 %2958, %v3912_v31   ;;  %2815 = vmatpush.xpose.msk.msra.mxu3 %vm652_vm0, %v1324_v8  ;;  %v4254_v31 = vpop.permute.xlu1 %1859  ;;  %v4332_v8 = vld [vmem:[%s4843_s6] ss:$0 sm:$0xff] }
 0x27c   : > { %vm1882_vm3 = vcmp.eq.s32.totalorder %v4274_v18, %v4254_v31 }
 0x27d   : > { %2982 = vset.pattern.permute.xlu1 %v4909_v41  ;;  %v2858_v50 = vsel %vm1882_vm3, 1.0, %v3140_v33 }
 0x27e   : > { %1983 = vperm.xlu1 %2982, %v4148_v7  }
 0x27f   : > { %2816 = vmatpush.xpose.msk.msra.mxu3 %vm652_vm0, %v1321_v62  ;;  %2045 = vperm.xlu0 %2998, %v4172_v15  }
 0x283   : > { %2961 = vset.pattern.permute.xlu2 %v3138_v52  ;;  %2817 = vmatpush.xpose.msk.msra.mxu3 %vm652_vm0, %v1318_v44  ;;  %v4260_v35 = vpop.permute.xlu1 %1694 }
 0x284   : > { %1809 = vperm.xlu2 %2961, %v3949_v10   ;;  %vm1715_vm4 = vcmp.eq.s32.totalorder %v4274_v18, %v4260_v35 }
 0x285   : > { %v2835_v13 = vsel %vm1715_vm4, 1.0, %v3140_v33  ;;  %vm1995_vm4 = vcmp.eq.s32.totalorder %v4274_v18, %v4264_v51 }
 0x286   : > { %2986 = vset.pattern.permute.xlu1 %v4905_v53 }
 0x287   : > { %1874 = vperm.xlu1 %2986, %v3987_v29  }
 0x28b   : > { %v4267_v57 = vpop.permute.xlu1 %1971 }
 0x28c   : > { %2963 = vset.pattern.permute.xlu2 %v4905_v53  ;;  %vm1994_vm7 = vcmp.eq.s32.totalorder %v4274_v18, %v4267_v57 }
 0x28d   : > { %1865 = vperm.xlu2 %2963, %v3949_v10  }
 0x28f   : > { %2988 = vset.pattern.permute.xlu1 %v4910_v56 }
 0x290   : > { %1709 = vperm.xlu1 %2988, %v4172_v15  }
 0x293   : > { %v4276_v22 = vpop.permute.xlu1 %2027 }
 0x294   : > { %vm2050_vm8 = vcmp.eq.s32.totalorder %v4274_v18, %v4276_v22 }
 0x295   : > { %2967 = vset.pattern.permute.xlu2 %v3139_v26  ;;  %v2882_v35 = vsel %vm2050_vm8, 1.0, %v3140_v33 }
 0x296   : > { %1921 = vperm.xlu2 %2967, %v3949_v10  }
 0x298   : > { %2991 = vset.pattern.permute.xlu1 %v4909_v41 }
 0x299   : > { %1986 = vperm.xlu1 %2991, %v3987_v29  }
 0x29b   : > { %v4286_v28 = vpop.permute.xlu1 %1697 }
 0x29e   : > { %2969 = vset.pattern.permute.xlu2 %v4909_v41 }
 0x29f   : > { %1977 = vperm.xlu2 %2969, %v3949_v10   ;;  %v2826_v10 = vsel %vm1658_vm12, 1.0, %v3140_v33 }
 0x2a0   : > { %v1123_v63 = vpop.xlane.xlu2 %1122  ;;  %v1738_v14 = vadd.f32 %v2834_v32, %v2826_v10 }
 0x2a1   : > { %v1131_v23 = vmul.f32 %v1123_v63, %v3283_v20  ;;  %v4293_v3 = vpop.permute.xlu0 %1650  ;;  %2993 = vset.pattern.permute.xlu1 %v4908_v21 }
 0x2a2   : > { %2042 = vperm.xlu1 %2993, %v3987_v29  }
 0x2a3   : > { %v1139_v27 = vadd.f32 1e-05, %v1131_v23  ;;  %v4296_v61 = vpop.permute.xlu1 %1753 }
 0x2a5   : > { %3063 = vrsqrt.f32 %v1139_v27  ;;  %vm1216_vm14 = vweird.f32 %v1139_v27 }
 0x2a7   : > { %2971 = vset.pattern.permute.xlu2 %v4905_v53 }
 0x2a8   : > { %1868 = vperm.xlu2 %2971, %v3954_v43   ;;  %v1748_v48 = vpop.permute.xlu2 %1747 }
 0x2a9   : > { %vm1770_vm13 = vcmp.eq.s32.totalorder %v4274_v18, %v1748_v48 }
 0x2aa   : > { %v2842_v25 = vsel %vm1770_vm13, 1.0, %v3140_v33  ;;  %2996 = vset.pattern.permute.xlu1 %v4910_v56 }
 0x2ab   : > { %v3064_v24 = vpop.eup %3063  ;;  %v1794_v30 = vadd.f32 %v2842_v25, %v1738_v14  ;;  %v4308_v49 = vpop.permute.xlu1 %2030  ;;  %1712 = vperm.xlu1 %2996, %v4222_v42  }
 0x2ac   : > { %v1211_v6 = vmul.f32 %v3064_v24, %v1139_v27  ;;  %vm1217_vm15 = vweird.f32 %v3064_v24  ;;  %v4302_v40 = vpop.permute.xlu0 %1818 }
 0x2ad   : > { %vm1218_vm1 = vmor %vm1216_vm14, %vm1217_vm15  ;;  %vm1716_vm14 = vcmp.eq.s32.totalorder %v4274_v18, %v4286_v28 }
 0x2ae   : > { %v1212_v58 = vmul.f32 %v3064_v24, %v1211_v6 }
 0x2b0   : > { %v1213_v36 = vmul.f32 0.5, %v1212_v58  ;;  %2973 = vset.pattern.permute.xlu2 %v4910_v56  ;;  %v1804_v37 = vpop.permute.xlu2 %1803 }
 0x2b1   : > { %1703 = vperm.xlu2 %2973, %v4148_v7   ;;  %vm1826_vm2 = vcmp.eq.s32.totalorder %v4274_v18, %v1804_v37 }
 0x2b2   : > { %v1214_v46 = vsub.f32 1.5, %v1213_v36  ;;  %v2850_v4 = vsel %vm1826_vm2, 1.0, %v3140_v33 }
 0x2b3   : > { %v1850_v2 = vadd.f32 %v2850_v4, %v1794_v30  ;;  %v1645_v9 = vpop.permute.xlu1 %1644  ;;  %3004 = vset.pattern.permute.xlu1 %v4908_v21 }
 0x2b4   : > { %v1215_v59 = vmul.f32 %v3064_v24, %v1214_v46  ;;  %vm1661_vm10 = vcmp.eq.s32.totalorder %v4274_v18, %v1645_v9  ;;  %v2836_v46 = vsel %vm1716_vm14, 1.0, %v3140_v33 }
 0x2b5   : > { %v1906_v19 = vadd.f32 %v2858_v50, %v1850_v2  ;;  %v2829_v31 = vsel %vm1661_vm10, 1.0, %v3140_v33 }
 0x2b6   : > { %v1219_v12 = vsel %vm1218_vm1, %v3064_v24, %v1215_v59  ;;  %v1916_v34 = vpop.permute.xlu0 %1915  ;;  %vm1772_vm1 = vcmp.eq.s32.totalorder %v4274_v18, %v4296_v61 }
 0x2b7   : > { %v1227_v5 = vmul.f32 %v1219_v12, %v3963_v38  ;;  %vm1938_vm9 = vcmp.eq.s32.totalorder %v4274_v18, %v1916_v34  ;;  %v2844_v28 = vsel %vm1772_vm1, 1.0, %v3140_v33 }
 0x2b8   : > { %v1639_v45 = vpop.permute.xlu2 %1638  ;;  %v2866_v62 = vsel %vm1938_vm9, 1.0, %v3140_v33 }
 0x2b9   : > { %2975 = vset.pattern.permute.xlu2 %v4909_v41  ;;  %v1235_v55 = vmul.f32 %v4039_v17, %v1227_v5  ;;  %vm1659_vm5 = vcmp.eq.s32.totalorder %v4274_v18, %v1639_v45  ;;  %v2837_v17 = vsel %vm1717_vm6, 1.0, %v3140_v33  ;;  %v1962_v44 = vadd.f32 %v2866_v62, %v1906_v19 }
 0x2ba   : > { %1980 = vperm.xlu2 %2975, %v3954_v43   ;;  %v2827_v38 = vsel %vm1659_vm5, 1.0, %v3140_v33  ;;  %v1741_v60 = vadd.f32 %v2837_v17, %v2829_v31  ;;  %vm2051_vm5 = vcmp.eq.s32.totalorder %v4274_v18, %v4308_v49 }
 0x2bb   : > { %v1243_v39 = vadd.f32 %v4060_v0, %v1235_v55  ;;  %v1739_v16 = vadd.f32 %v2835_v13, %v2827_v38  ;;  %v2874_v0 = vsel %vm1994_vm7, 1.0, %v3140_v33  ;;  %v1757_v10 = vpop.permute.xlu1 %1756  ;;  %v2883_v19 = vsel %vm2051_vm5, 1.0, %v3140_v33 }
 0x2bc   : > { %v2018_v63 = vadd.f32 %v2874_v0, %v1962_v44  ;;  %vm1773_vm12 = vcmp.eq.s32.totalorder %v4274_v18, %v1757_v10 }
 0x2bd   : > { %2801 = vmatmul.msk.f32.gmra.mxu2 %vm652_vm0, %v1243_v39  ;;  %v1487_v57 = vpop.f32.mrf.mxu2  ;;  %v2845_v14 = vsel %vm1773_vm12, 1.0, %v3140_v33  ;;  %v2875_v39 = vsel %vm1995_vm4, 1.0, %v3140_v33 }
 0x2be   : > { %v1488_v22 = vadd.f32 %v4332_v8, %v1487_v57  ;;  %v4348_v32 = vadd.f32 %v2882_v35, %v2018_v63  ;;  %v4350_v54 = vpop.permute.xlu0 %1930  ;;  %v1797_v24 = vadd.f32 %v2845_v14, %v1741_v60 }
 0x2c0   : > { %v1751_v47 = vpop.permute.xlu2 %1750  ;;  %2818 = vmatmul.msk.f32.vlgmr.msra.gmra.mxu3 %vm652_vm0, %v1488_v22 }
 0x2c1   : > { %vm1771_vm11 = vcmp.eq.s32.totalorder %v4274_v18, %v1751_v47 }
 0x2c2   : > { %2977 = vset.pattern.permute.xlu2 %v4908_v21  ;;  %v2843_v23 = vsel %vm1771_vm11, 1.0, %v3140_v33 }
 0x2c3   : > { %2036 = vperm.xlu2 %2977, %v3954_v43   ;;  %v1795_v27 = vadd.f32 %v2843_v23, %v1739_v16  ;;  %v1813_v58 = vpop.permute.xlu1 %1812 }
 0x2c4   : > { %vm1829_vm15 = vcmp.eq.s32.totalorder %v4274_v18, %v1813_v58 }
 0x2c5   : > { %v1490_v48 = vpop.f32.mrf.mxu2  ;;  %v2853_v37 = vsel %vm1829_vm15, 1.0, %v3140_v33 }
 0x2c6   : > { %v1491_v30 = vadd.f32 %v4332_v8, %v1490_v48 }
 0x2c7   : > { %v1863_v36 = vpop.permute.xlu0 %1862 }
 0x2c8   : > { %v1807_v25 = vpop.permute.xlu2 %1806  ;;  %2819 = vmatmul.msk.f32.gmra.mxu3 %vm652_vm0, %v1491_v30  ;;  %vm1883_vm3 = vcmp.eq.s32.totalorder %v4274_v18, %v1863_v36 }
 0x2c9   : > { %vm1827_vm13 = vcmp.eq.s32.totalorder %v4274_v18, %v1807_v25  ;;  %v2859_v50 = vsel %vm1883_vm3, 1.0, %v3140_v33 }
 0x2ca   : > { %v2851_v6 = vsel %vm1827_vm13, 1.0, %v3140_v33 }
 0x2cb   : > { %2979 = vset.pattern.permute.xlu2 %v4910_v56  ;;  %v1851_v43 = vadd.f32 %v2851_v6, %v1795_v27  ;;  %v4367_v56 = vadd.f32 %v2853_v37, %v1797_v24  ;;  %v1648_v23 = vpop.permute.xlu1 %1647 }
 0x2cc   : > { %1706 = vperm.xlu2 %2979, %v3987_v29   ;;  %vm1662_vm15 = vcmp.eq.s32.totalorder %v4274_v18, %v1648_v23 }
 0x2cd   : > { %v1493_v59 = vpop.f32.mrf.mxu2  ;;  %v1907_v45 = vadd.f32 %v2859_v50, %v1851_v43 }
 0x2ce   : > { %v1494_v4 = vadd.f32 %v4332_v8, %v1493_v59 }
 0x2d0   : > { %v1642_v12 = vpop.permute.xlu2 %1641  ;;  %2820 = vmatmul.msk.f32.gmra.mxu3 %vm652_vm0, %v1494_v4 }
 0x2d1   : > { %vm1660_vm2 = vcmp.eq.s32.totalorder %v4274_v18, %v1642_v12 }
 0x2d2   : > { %v2828_v5 = vsel %vm1660_vm2, 1.0, %v3140_v33  ;;  %vm2082_vm2 = vcmp.gt.f32.partialorder %v4348_v32, 0.0 }
 0x2d3   : > { %v1740_v61 = vadd.f32 %v2836_v46, %v2828_v5  ;;  %v1925_v14 = vpop.permute.xlu1 %1924 }
 0x2d4   : > { %2981 = vset.pattern.permute.xlu2 %v3136_v1  ;;  %vm1941_vm11 = vcmp.eq.s32.totalorder %v4274_v18, %v1925_v14 }
 0x2d5   : > { %1762 = vperm.xlu2 %2981, %v3987_v29   ;;  %v1796_v13 = vadd.f32 %v2844_v28, %v1740_v61  ;;  %v2869_v25 = vsel %vm1941_vm11, 1.0, %v3140_v33  ;;  %v4437_v28 = vpop.permute.xlu0 %1877 }
 0x2d6   : > { %v1496_v55 = vpop.f32.mrf.mxu2 }
 0x2d7   : > { %v1497_v38 = vadd.f32 %v4332_v8, %v1496_v55 }
 0x2d8   : > { %v1919_v2 = vpop.permute.xlu2 %1918 }
 0x2d9   : > { %vm1939_vm6 = vcmp.eq.s32.totalorder %v4274_v18, %v1919_v2  ;;  %2821 = vmatmul.msk.f32.gmra.mxu3 %vm652_vm0, %v1497_v38 }
 0x2da   : > { %v2867_v16 = vsel %vm1939_vm6, 1.0, %v3140_v33 }
 0x2db   : > { %v1963_v29 = vadd.f32 %v2867_v16, %v1907_v45  ;;  %v1816_v37 = vpop.permute.xlu1 %1815 }
 0x2dc   : > { %vm1830_vm4 = vcmp.eq.s32.totalorder %v4274_v18, %v1816_v37 }
 0x2dd   : > { %2985 = vset.pattern.permute.xlu2 %v4908_v21  ;;  %v2019_v51 = vadd.f32 %v2875_v39, %v1963_v29  ;;  %v1760_v50 = vpop.permute.xlu0 %1759 }
 0x2de   : > { %2039 = vperm.xlu2 %2985, %v4148_v7   ;;  %v1499_v49 = vpop.f32.mrf.mxu2  ;;  %vm1774_vm3 = vcmp.eq.s32.totalorder %v4274_v18, %v1760_v50 }
 0x2df   : > { %v4390_v34 = vadd.f32 %v2883_v19, %v2019_v51  ;;  %v1500_v9 = vadd.f32 %v4332_v8, %v1499_v49  ;;  %v2846_v29 = vsel %vm1774_vm3, 1.0, %v3140_v33  ;;  %vm1943_vm3 = vcmp.eq.s32.totalorder %v4274_v18, %v4350_v54 }
 0x2e0   : > { %v1810_v17 = vpop.permute.xlu2 %1809  ;;  %v2871_v37 = vsel %vm1943_vm3, 1.0, %v3140_v33 }
 0x2e1   : > { %vm1828_vm7 = vcmp.eq.s32.totalorder %v4274_v18, %v1810_v17  ;;  %2822 = vmatmul.msk.f32.gmra.mxu3 %vm652_vm0, %v1500_v9  ;;  %vm2083_vm6 = vcmp.gt.f32.partialorder %v4390_v34, 0.0  ;;  %v2854_v17 = vsel %vm1830_vm4, 1.0, %v3140_v33 }
 0x2e2   : > { %v2852_v0 = vsel %vm1828_vm7, 1.0, %v3140_v33  ;;  %vm1663_vm7 = vcmp.eq.s32.totalorder %v4274_v18, %v4293_v3 }
 0x2e3   : > { %v1852_v62 = vadd.f32 %v2852_v0, %v1796_v13 }
 0x2e6   : > { %2987 = vset.pattern.permute.xlu2 %v3137_v11  ;;  %v1502_v21 = vpop.f32.mrf.mxu2 }
 0x2e7   : > { %1653 = vperm.xlu2 %2987, %v4172_v15   ;;  %v1503_v7 = vadd.f32 %v4332_v8, %v1502_v21 }
 0x2e8   : > { %v1866_v44 = vpop.permute.xlu2 %1865 }
 0x2e9   : > { %vm1884_vm8 = vcmp.eq.s32.totalorder %v4274_v18, %v1866_v44  ;;  %2823 = vmatmul.msk.f32.gmra.mxu3 %vm652_vm0, %v1503_v7  ;;  %v2831_v44 = vsel %vm1663_vm7, 1.0, %v3140_v33 }
 0x2ea   : > { %v2860_v31 = vsel %vm1884_vm8, 1.0, %v3140_v33 }
 0x2eb   : > { %v1908_v35 = vadd.f32 %v2860_v31, %v1852_v62 }
 0x2ee   : > { %v1505_v57 = vpop.f32.mrf.mxu2 }
 0x2ef   : > { %2990 = vset.pattern.permute.xlu2 %v3136_v1  ;;  %v1506_v60 = vadd.f32 %v4332_v8, %v1505_v57 }
 0x2f0   : > { %1765 = vperm.xlu2 %2990, %v4172_v15   ;;  %v1922_v47 = vpop.permute.xlu2 %1921 }
 0x2f1   : > { %vm1940_vm9 = vcmp.eq.s32.totalorder %v4274_v18, %v1922_v47  ;;  %2824 = vmatmul.msk.f32.gmra.mxu3 %vm652_vm0, %v1506_v60 }
 0x2f2   : > { %v2868_v22 = vsel %vm1940_vm9, 1.0, %v3140_v33 }
 0x2f3   : > { %v1964_v63 = vadd.f32 %v2868_v22, %v1908_v35 }
 0x2f8   : > { %2992 = vset.pattern.permute.xlu2 %v3138_v52 }
 0x2f9   : > { %1821 = vperm.xlu2 %2992, %v4172_v15   ;;  %v1978_v27 = vpop.permute.xlu2 %1977 }
 0x2fa   : > { %vm1996_vm10 = vcmp.eq.s32.totalorder %v4274_v18, %v1978_v27 }
 0x2fb   : > { %v2876_v1 = vsel %vm1996_vm10, 1.0, %v3140_v33  ;;  %vm1831_vm10 = vcmp.eq.s32.totalorder %v4274_v18, %v4302_v40 }
 0x2fc   : > { %v4412_v10 = vadd.f32 %v2876_v1, %v1964_v63  ;;  %v2855_v22 = vsel %vm1831_vm10, 1.0, %v3140_v33 }
 0x301   : > { %2995 = vset.pattern.permute.xlu2 %v3137_v11 }
 0x302   : > { %1656 = vperm.xlu2 %2995, %v4222_v42   ;;  %v1869_v48 = vpop.permute.xlu2 %1868 }
 0x303   : > { %vm1885_vm12 = vcmp.eq.s32.totalorder %v4274_v18, %v1869_v48 }
 0x304   : > { %v2861_v24 = vsel %vm1885_vm12, 1.0, %v3140_v33 }
 0x305   : > { %v1909_v30 = vadd.f32 %v2861_v24, %v4367_v56  ;;  %v1872_v56 = vpop.permute.xlu1 %1871 }
 0x306   : > { %vm1886_vm8 = vcmp.eq.s32.totalorder %v4274_v18, %v1872_v56 }
 0x307   : > { %v1965_v6 = vadd.f32 %v2869_v25, %v1909_v30  ;;  %v2862_v7 = vsel %vm1886_vm8, 1.0, %v3140_v33  ;;  %vm1888_vm8 = vcmp.eq.s32.totalorder %v4274_v18, %v4437_v28 }
 0x30a   : > { %2997 = vset.pattern.permute.xlu2 %v3139_v26 }
 0x30b   : > { %1933 = vperm.xlu2 %2997, %v4172_v15   ;;  %v1704_v43 = vpop.permute.xlu2 %1703 }
 0x30c   : > { %vm1718_vm1 = vcmp.eq.s32.totalorder %v4274_v18, %v1704_v43 }
 0x30d   : > { %v1928_v4 = vpop.permute.xlu1 %1927  ;;  %v2838_v2 = vsel %vm1718_vm1, 1.0, %v3140_v33 }
 0x30e   : > { %vm1942_vm11 = vcmp.eq.s32.totalorder %v4274_v18, %v1928_v4 }
 0x30f   : > { %v2870_v63 = vsel %vm1942_vm11, 1.0, %v3140_v33 }
 0x313   : > { %2999 = vset.pattern.permute.xlu2 %v4909_v41 }
 0x314   : > { %1989 = vperm.xlu2 %2999, %v4172_v15   ;;  %v1981_v11 = vpop.permute.xlu2 %1980 }
 0x315   : > { %vm1997_vm13 = vcmp.eq.s32.totalorder %v4274_v18, %v1981_v11  ;;  %v1984_v61 = vpop.permute.xlu1 %1983 }
 0x316   : > { %v2877_v58 = vsel %vm1997_vm13, 1.0, %v3140_v33 }
 0x317   : > { %v2021_v36 = vadd.f32 %v2877_v58, %v1965_v6 }
 0x31c   : > { %3000 = vset.pattern.permute.xlu2 %v3138_v52 }
 0x31d   : > { %1824 = vperm.xlu2 %3000, %v4222_v42   ;;  %v2037_v46 = vpop.permute.xlu2 %2036  ;;  %v1875_v55 = vpop.permute.xlu1 %1874 }
 0x31e   : > { %vm2053_vm14 = vcmp.eq.s32.totalorder %v4274_v18, %v2037_v46  ;;  %vm1887_vm1 = vcmp.eq.s32.totalorder %v4274_v18, %v1875_v55 }
 0x31f   : > { %v2885_v59 = vsel %vm2053_vm14, 1.0, %v3140_v33  ;;  %v2863_v30 = vsel %vm1887_vm1, 1.0, %v3140_v33 }
 0x320   : > { %v4431_v12 = vadd.f32 %v2885_v59, %v2021_v36 }
 0x325   : > { %3001 = vset.pattern.permute.xlu2 %v4905_v53  ;;  %v1710_v19 = vpop.permute.xlu1 %1709 }
 0x326   : > { %1880 = vperm.xlu2 %3001, %v4222_v42   ;;  %v1707_v15 = vpop.permute.xlu2 %1706  ;;  %vm1720_vm13 = vcmp.eq.s32.totalorder %v4274_v18, %v1710_v19 }
 0x327   : > { %vm1719_vm5 = vcmp.eq.s32.totalorder %v4274_v18, %v1707_v15  ;;  %v2840_v1 = vsel %vm1720_vm13, 1.0, %v3140_v33 }
 0x328   : > { %v2839_v0 = vsel %vm1719_vm5, 1.0, %v3140_v33 }
 0x329   : > { %v1743_v3 = vadd.f32 %v2839_v0, %v2831_v44 }
 0x32d   : > { %v1987_v23 = vpop.permute.xlu1 %1986 }
 0x32e   : > { %3002 = vset.pattern.permute.xlu2 %v3139_v26  ;;  %vm1999_vm7 = vcmp.eq.s32.totalorder %v4274_v18, %v1987_v23 }
 0x32f   : > { %1936 = vperm.xlu2 %3002, %v4222_v42   ;;  %v1763_v52 = vpop.permute.xlu2 %1762 }
 0x330   : > { %vm1775_vm9 = vcmp.eq.s32.totalorder %v4274_v18, %v1763_v52 }
 0x331   : > { %v2847_v31 = vsel %vm1775_vm9, 1.0, %v3140_v33 }
 0x332   : > { %v1799_v47 = vadd.f32 %v2847_v31, %v1743_v3 }
 0x334   : > { %v1855_v14 = vadd.f32 %v2855_v22, %v1799_v47 }
 0x335   : > { %v2043_v59 = vpop.permute.xlu1 %2042 }
 0x336   : > { %v1911_v58 = vadd.f32 %v2863_v30, %v1855_v14  ;;  %vm2055_vm9 = vcmp.eq.s32.totalorder %v4274_v18, %v2043_v59 }
 0x337   : > { %3003 = vset.pattern.permute.xlu2 %v4909_v41  ;;  %v2830_v41 = vsel %vm1662_vm15, 1.0, %v3140_v33  ;;  %vm1998_vm15 = vcmp.eq.s32.totalorder %v4274_v18, %v1984_v61 }
 0x338   : > { %1992 = vperm.xlu2 %3003, %v4222_v42   ;;  %v4441_v5 = vpop.permute.xlu2 %2039  ;;  %v1742_v39 = vadd.f32 %v2838_v2, %v2830_v41  ;;  %v2878_v24 = vsel %vm1998_vm15, 1.0, %v3140_v33  ;;  %v1967_v15 = vadd.f32 %v2871_v37, %v1911_v58 }
 0x339   : > { %vm2054_vm4 = vcmp.eq.s32.totalorder %v4274_v18, %v4441_v5  ;;  %v2879_v5 = vsel %vm1999_vm7, 1.0, %v3140_v33 }
 0x33a   : > { %v1798_v51 = vadd.f32 %v2846_v29, %v1742_v39  ;;  %v2886_v46 = vsel %vm2054_vm4, 1.0, %v3140_v33  ;;  %vm2085_vm4 = vcmp.gt.f32.partialorder %v4431_v12, 0.0 }
 0x33c   : > { %v1854_v21 = vadd.f32 %v2854_v17, %v1798_v51 }
 0x33e   : > { %v1910_v57 = vadd.f32 %v2862_v7, %v1854_v21 }
 0x340   : > { %v1508_v53 = vpop.f32.mrf.mxu2  ;;  %v1966_v40 = vadd.f32 %v2870_v63, %v1910_v57 }
 0x341   : > { %v1509_v13 = vadd.f32 %v4332_v8, %v1508_v53  ;;  %v1654_v45 = vpop.permute.xlu2 %1653  ;;  %v4453_v8 = vpop.permute.xlu0 %1768  ;;  %v2864_v53 = vsel %vm1888_vm8, 1.0, %v3140_v33 }
 0x342   : > { %vm1664_vm14 = vcmp.eq.s32.totalorder %v4274_v18, %v1654_v45  ;;  %v2022_v11 = vadd.f32 %v2878_v24, %v1966_v40  ;;  %v2887_v45 = vsel %vm2055_vm9, 1.0, %v3140_v33  ;;  %vm1777_vm13 = vcmp.eq.s32.totalorder %v4274_v18, %v4453_v8 }
 0x343   : > { %2825 = vmatmul.msk.f32.gmra.mxu3 %vm652_vm0, %v1509_v13  ;;  %v1600_v26 = vpop.f32.mrf.mxu3  ;;  %v2832_v48 = vsel %vm1664_vm14, 1.0, %v3140_v33  ;;  %v2023_v13 = vadd.f32 %v2879_v5, %v1967_v15  ;;  %v2849_v29 = vsel %vm1777_vm13, 1.0, %v3140_v33 }
 0x344   : > { %v4450_v38 = vsel %vm2082_vm2, %v1600_v26, -1e+30  ;;  %v1744_v43 = vadd.f32 %v2840_v1, %v2832_v48  ;;  %v4505_v4 = vadd.f32 %v2886_v46, %v2022_v11 }
 0x345   : > { %2098 = vmax.xlane.f32.xlu1 %v4450_v38  ;;  %v4522_v26 = vadd.f32 %v2887_v45, %v2023_v13 }
 0x346   : > { %vm2086_vm10 = vcmp.gt.f32.partialorder %v4505_v4, 0.0 }
 0x347   : > { %vm2087_vm1 = vcmp.gt.f32.partialorder %v4522_v26, 0.0 }
 0x349   : > { %v2034_v62 = vpop.permute.xlu0 %2033 }
 0x34a   : > { %v1766_v16 = vpop.permute.xlu2 %1765  ;;  %vm2052_vm12 = vcmp.eq.s32.totalorder %v4274_v18, %v2034_v62 }
 0x34b   : > { %v1603_v49 = vpop.f32.mrf.mxu3  ;;  %v2884_v27 = vsel %vm2052_vm12, 1.0, %v3140_v33  ;;  %vm1776_vm2 = vcmp.eq.s32.totalorder %v4274_v18, %v1766_v16  ;;  %v1713_v16 = vpop.permute.xlu1 %1712 }
 0x34c   : > { %v4461_v9 = vsel %vm2083_vm6, %v1603_v49, -1e+30  ;;  %v4486_v25 = vadd.f32 %v2884_v27, %v4412_v10  ;;  %v2848_v36 = vsel %vm1776_vm2, 1.0, %v3140_v33  ;;  %vm1721_vm14 = vcmp.eq.s32.totalorder %v4274_v18, %v1713_v16 }
 0x34d   : > { %2100 = vmax.xlane.f32.xlu0 %v4461_v9  ;;  %v1800_v56 = vadd.f32 %v2848_v36, %v1744_v43  ;;  %v2841_v51 = vsel %vm1721_vm14, 1.0, %v3140_v33 }
 0x34e   : > { %vm2084_vm6 = vcmp.gt.f32.partialorder %v4486_v25, 0.0 }
 0x351   : > { %v2046_v2 = vpop.permute.xlu0 %2045 }
 0x352   : > { %vm2056_vm15 = vcmp.eq.s32.totalorder %v4274_v18, %v2046_v2 }
 0x353   : > { %v1822_v35 = vpop.permute.xlu2 %1821  ;;  %v1606_v60 = vpop.f32.mrf.mxu3  ;;  %v2888_v21 = vsel %vm2056_vm15, 1.0, %v3140_v33 }
 0x354   : > { %vm1832_vm5 = vcmp.eq.s32.totalorder %v4274_v18, %v1822_v35  ;;  %v4501_v54 = vsel %vm2084_vm6, %v1606_v60, -1e+30 }
 0x355   : > { %v2856_v52 = vsel %vm1832_vm5, 1.0, %v3140_v33 }
 0x356   : > { %v1856_v61 = vadd.f32 %v2856_v52, %v1800_v56 }
 0x358   : > { %v1912_v28 = vadd.f32 %v2864_v53, %v1856_v61 }
 0x35c   : > { %v1657_v6 = vpop.permute.xlu2 %1656  ;;  %v1609_v10 = vpop.f32.mrf.mxu3 }
 0x35d   : > { %vm1665_vm12 = vcmp.eq.s32.totalorder %v4274_v18, %v1657_v6  ;;  %v4544_v57 = vsel %vm2085_vm4, %v1609_v10, -1e+30 }
 0x35e   : > { %2048 = vperm.xlu1 %3004, %v4222_v42   ;;  %v2833_v39 = vsel %vm1665_vm12, 1.0, %v3140_v33 }
 0x35f   : > { %v1745_v17 = vadd.f32 %v2841_v51, %v2833_v39 }
 0x361   : > { %2102 = vmax.xlane.f32.xlu2 %v4501_v54  ;;  %v1801_v44 = vadd.f32 %v2849_v29, %v1745_v17 }
 0x364   : > { %v1612_v42 = vpop.f32.mrf.mxu3 }
 0x365   : > { %v1934_v50 = vpop.permute.xlu2 %1933  ;;  %v4515_v55 = vsel %vm2086_vm10, %v1612_v42, -1e+30 }
 0x366   : > { %vm1944_vm11 = vcmp.eq.s32.totalorder %v4274_v18, %v1934_v50  ;;  %2106 = vmax.xlane.f32.xlu0 %v4515_v55 }
 0x367   : > { %v2872_v41 = vsel %vm1944_vm11, 1.0, %v3140_v33 }
 0x368   : > { %v1968_v19 = vadd.f32 %v2872_v41, %v1912_v28 }
 0x36c   : > { %v1615_v49 = vpop.f32.mrf.mxu3 }
 0x36d   : > { %v4531_v0 = vsel %vm2087_vm1, %v1615_v49, -1e+30 }
 0x36e   : > { %v1990_v8 = vpop.permute.xlu2 %1989  ;;  %2108 = vmax.xlane.f32.xlu2 %v4531_v0 }
 0x36f   : > { %vm2000_vm2 = vcmp.eq.s32.totalorder %v4274_v18, %v1990_v8 }
 0x370   : > { %v2880_v62 = vsel %vm2000_vm2, 1.0, %v3140_v33 }
 0x371   : > { %v2024_v7 = vadd.f32 %v2880_v62, %v1968_v19 }
 0x373   : > { %v4537_v31 = vadd.f32 %v2888_v21, %v2024_v7 }
 0x374   : > { %v1618_v35 = vpop.f32.mrf.mxu3 }
 0x375   : > { %vm2088_vm3 = vcmp.gt.f32.partialorder %v4537_v31, 0.0 }
 0x376   : > { %v4540_v3 = vsel %vm2088_vm3, %v1618_v35, -1e+30 }
 0x377   : > { %2110 = vmax.xlane.f32.xlu0 %v4540_v3  ;;  %v1825_v47 = vpop.permute.xlu2 %1824 }
 0x378   : > { %vm1833_vm5 = vcmp.eq.s32.totalorder %v4274_v18, %v1825_v47 }
 0x379   : > { %v2857_v14 = vsel %vm1833_vm5, 1.0, %v3140_v33 }
 0x37a   : > { %v1857_v6 = vadd.f32 %v2857_v14, %v1801_v44 }
 0x380   : > { %v1881_v60 = vpop.permute.xlu2 %1880 }
 0x381   : > { %vm1889_vm6 = vcmp.eq.s32.totalorder %v4274_v18, %v1881_v60 }
 0x388   : > { %2104 = vmax.xlane.f32.xlu1 %v4544_v57 }
 0x389   : > { %v1937_v27 = vpop.permute.xlu2 %1936 }
 0x38a   : > { %vm1945_vm7 = vcmp.eq.s32.totalorder %v4274_v18, %v1937_v27  ;;  %v2221_v27 = vld [vmem:[%s4848_s11 + $0x10] sm:$0xff] }
 0x392   : > { %v1993_v43 = vpop.permute.xlu2 %1992 }
 0x393   : > { %vm2001_vm8 = vcmp.eq.s32.totalorder %v4274_v18, %v1993_v43 }
 0x3b8   : > { %v2099_v22 = vpop.xlane.xlu1 %2098 }
 0x3b9   : > { %v2114_v63 = vsub.f32 %v4450_v38, %v2099_v22  ;;  %v2865_v38 = vsel %vm1889_vm6, 1.0, %v3140_v33 }
 0x3ba   : > { %v1913_v11 = vadd.f32 %v2865_v38, %v1857_v6 }
 0x3bb   : > { %v2122_v23 = vmul.f32 1.442695, %v2114_v63  ;;  %v2222_v63 = vld [vmem:[%s4848_s11 + $0x18] sm:$0xff] }
 0x3bc   : > { %2259 = vmatpush.msra.mxu2 %v2222_v63  ;;  %2924 = vmatpush.msrb.mxu3 %v2222_v63 }
 0x3bd   : > { %3065 = vpow2.f32 %v2122_v23 }
 0x3be   : > { %2260 = vmatpush.msra.mxu2 %v2221_v27  ;;  %2925 = vmatpush.msrb.mxu3 %v2221_v27 }
 0x3c0   : > { %v2101_v40 = vpop.xlane.xlu0 %2100 }
 0x3c1   : > { %v2115_v1 = vsub.f32 %v4461_v9, %v2101_v40  ;;  %v2873_v9 = vsel %vm1945_vm7, 1.0, %v3140_v33  ;;  %v2220_v40 = vld [vmem:[%s4848_s11 + $0x8] sm:$0xff] }
 0x3c2   : > { %v1969_v10 = vadd.f32 %v2873_v9, %v1913_v11  ;;  %2261 = vmatpush.msra.mxu2 %v2220_v40  ;;  %2926 = vmatpush.msrb.mxu3 %v2220_v40 }
 0x3c3   : > { %v3066_v48 = vpop.eup %3065  ;;  %v2124_v24 = vmul.f32 1.442695, %v2115_v1 }
 0x3c4   : > { %v4553_v30 = vmul.f32 %v3066_v48, %v4348_v32  ;;  %v2881_v32 = vsel %vm2001_vm8, 1.0, %v3140_v33 }
 0x3c5   : > { %3067 = vpow2.f32 %v2124_v24  ;;  %v2025_v46 = vadd.f32 %v2881_v32, %v1969_v10 }
 0x3c6   : > { %2146 = vadd.xlane.f32.xlu2 %v4553_v30  ;;  %v1621_v61 = vpop.f32.mrf.mxu3 }
 0x3cb   : > { %v3068_v58 = vpop.eup %3067 }
 0x3cc   : > { %v2139_v36 = vmul.f32 %v3068_v58, %v4390_v34 }
 0x3ce   : > { %2148 = vadd.xlane.f32.xlu2 %v2139_v36 }
 0x3d0   : > { %v2049_v37 = vpop.permute.xlu1 %2048 }
 0x3d1   : > { %vm2057_vm9 = vcmp.eq.s32.totalorder %v4274_v18, %v2049_v37 }
 0x3d2   : > { %v2889_v56 = vsel %vm2057_vm9, 1.0, %v3140_v33 }
 0x3d3   : > { %v2081_v52 = vadd.f32 %v2889_v56, %v2025_v46 }
 0x3d4   : > { %v2103_v59 = vpop.xlane.xlu2 %2102 }
 0x3d5   : > { %v2116_v15 = vsub.f32 %v4501_v54, %v2103_v59  ;;  %vm2089_vm10 = vcmp.gt.f32.partialorder %v2081_v52, 0.0 }
 0x3d6   : > { %v2097_v50 = vsel %vm2089_vm10, %v1621_v61, -1e+30 }
 0x3d7   : > { %v2126_v5 = vmul.f32 1.442695, %v2116_v15  ;;  %2112 = vmax.xlane.f32.xlu0 %v2097_v50 }
 0x3d9   : > { %3069 = vpow2.f32 %v2126_v5  ;;  %v2107_v34 = vpop.xlane.xlu0 %2106 }
 0x3da   : > { %v2118_v53 = vsub.f32 %v4515_v55, %v2107_v34 }
 0x3dc   : > { %v2130_v13 = vmul.f32 1.442695, %v2118_v53  ;;  %v3115_v53 = vld [vmem:[%s3558_s27 + $0x8] sm:$0xff] }
 0x3de   : > { %3071 = vpow2.f32 %v2130_v13 }
 0x3df   : > { %v3070_v42 = vpop.eup %3069 }
 0x3e0   : > { %v2140_v18 = vmul.f32 %v3070_v42, %v4486_v25 }
 0x3e1   : > { %v2109_v45 = vpop.xlane.xlu2 %2108 }
 0x3e2   : > { %2150 = vadd.xlane.f32.xlu0 %v2140_v18  ;;  %v2119_v33 = vsub.f32 %v4531_v0, %v2109_v45 }
 0x3e4   : > { %v3072_v54 = vpop.eup %3071  ;;  %v2132_v28 = vmul.f32 1.442695, %v2119_v33 }
 0x3e5   : > { %v2142_v41 = vmul.f32 %v3072_v54, %v4505_v4  ;;  %v3116_v54 = vld [vmem:[%s3558_s27] sm:$0xff] }
 0x3e6   : > { %3073 = vpow2.f32 %v2132_v28 }
 0x3e7   : > { %2154 = vadd.xlane.f32.xlu2 %v2142_v41 }
 0x3ea   : > { %v2111_v55 = vpop.xlane.xlu0 %2110 }
 0x3eb   : > { %v2120_v25 = vsub.f32 %v4540_v3, %v2111_v55 }
 0x3ec   : > { %v3074_v2 = vpop.eup %3073 }
 0x3ed   : > { %v2143_v39 = vmul.f32 %v3074_v2, %v4522_v26  ;;  %v2134_v51 = vmul.f32 1.442695, %v2120_v25 }
 0x3ef   : > { %2156 = vadd.xlane.f32.xlu0 %v2143_v39 }
 0x3fb   : > { %v2105_v16 = vpop.xlane.xlu1 %2104 }
 0x3fc   : > { %v2117_v29 = vsub.f32 %v4544_v57, %v2105_v16 }
 0x3fe   : > { %v2128_v19 = vmul.f32 1.442695, %v2117_v29 }
 0x400   : > { %3075 = vpow2.f32 %v2128_v19 }
 0x401   : > { %3077 = vpow2.f32 %v2134_v51  ;;  %v3118_v51 = vld [vmem:[%s3558_s27 + $0x18] sm:$0xff] }
 0x406   : > { %v3076_v49 = vpop.eup %3075 }
 0x407   : > { %v2141_v8 = vmul.f32 %v3076_v49, %v4431_v12  ;;  %v3078_v4 = vpop.eup %3077 }
 0x408   : > { %v2144_v17 = vmul.f32 %v3078_v4, %v4537_v31 }
 0x409   : > { %2152 = vadd.xlane.f32.xlu1 %v2141_v8 }
 0x411   : > { %2158 = vadd.xlane.f32.xlu1 %v2144_v17 }
 0x439   : > { %v2147_v26 = vpop.xlane.xlu2 %2146 }
 0x43a   : > { %3079 = vrcp.f32 %v2147_v26  ;;  %v3119_v26 = vld [vmem:[%s3558_s27 + $0x20] sm:$0xff] }
 0x440   : > { %v3080_v0 = vpop.eup %3079 }
 0x441   : > { %v2149_v62 = vpop.xlane.xlu2 %2148  ;;  %v2170_v21 = vmul.f32 %v3080_v0, %v4553_v30 }
 0x442   : > { %3081 = vrcp.f32 %v2149_v62 }
 0x443   : > { %2194 = vmatmul.f32.vlgmr.msrb.gmra.mxu2 %v2170_v21 }
 0x448   : > { %v3082_v44 = vpop.eup %3081 }
 0x449   : > { %v2171_v7 = vmul.f32 %v3082_v44, %v2139_v36  ;;  %v2219_v36 = vld [vmem:[%s4848_s11] sm:$0xff] }
 0x44a   : > { %v2113_v35 = vpop.xlane.xlu0 %2112  ;;  %2262 = vmatpush.msra.mxu2 %v2219_v36  ;;  %2927 = vmatpush.msrb.mxu3 %v2219_v36 }
 0x44b   : > { %v2121_v3 = vsub.f32 %v2097_v50, %v2113_v35  ;;  %2197 = vmatmul.f32.gmra.mxu2 %v2171_v7  ;;  %v4597_v50 = vld [vmem:[%s4849_s12] ss:$0 sm:$0xff]  ;;  %v3120_v7 = vld [vmem:[%s3558_s27 + $0x28] sm:$0xff] }
 0x44d   : > { %v2136_v57 = vmul.f32 1.442695, %v2121_v3 }
 0x44f   : > { %3083 = vpow2.f32 %v2136_v57 }
 0x455   : > { %v2151_v12 = vpop.xlane.xlu0 %2150  ;;  %v3084_v47 = vpop.eup %3083 }
 0x456   : > { %3085 = vrcp.f32 %v2151_v12  ;;  %v2145_v31 = vmul.f32 %v3084_v47, %v2081_v52  ;;  %v3121_v47 = vld [vmem:[%s3558_s27 + $0x30] sm:$0xff] }
 0x458   : > { %2160 = vadd.xlane.f32.xlu2 %v2145_v31 }
 0x45a   : > { %v2155_v1 = vpop.xlane.xlu2 %2154 }
 0x45c   : > { %v3086_v60 = vpop.eup %3085 }
 0x45d   : > { %v2172_v22 = vmul.f32 %v3086_v60, %v2140_v18 }
 0x45f   : > { %2200 = vmatmul.f32.gmra.mxu2 %v2172_v22 }
 0x462   : > { %v2157_v24 = vpop.xlane.xlu0 %2156 }
 0x47c   : > { %v2153_v23 = vpop.xlane.xlu1 %2152 }
 0x47d   : > { %3087 = vrcp.f32 %v2153_v23 }
 0x47e   : > { %3089 = vrcp.f32 %v2155_v1 }
 0x47f   : > { %3091 = vrcp.f32 %v2157_v24 }
 0x483   : > { %v3088_v14 = vpop.eup %3087 }
 0x484   : > { %v2173_v48 = vmul.f32 %v3088_v14, %v2141_v8  ;;  %v3090_v30 = vpop.eup %3089  ;;  %v2159_v38 = vpop.xlane.xlu1 %2158 }
 0x485   : > { %v2174_v6 = vmul.f32 %v3090_v30, %v2142_v41  ;;  %v3092_v43 = vpop.eup %3091  ;;  %3093 = vrcp.f32 %v2159_v38 }
 0x486   : > { %2203 = vmatmul.f32.gmra.mxu2 %v2173_v48  ;;  %v2175_v11 = vmul.f32 %v3092_v43, %v2143_v39  ;;  %v3117_v39 = vld [vmem:[%s3558_s27 + $0x10] sm:$0xff] }
 0x48b   : > { %v3094_v9 = vpop.eup %3093 }
 0x48c   : > { %v2176_v58 = vmul.f32 %v3094_v9, %v2144_v17  ;;  %v3122_v9 = vld [vmem:[%s3558_s27 + $0x38] sm:$0xff] }
 0x48e   : > { %2206 = vmatmul.f32.gmra.mxu2 %v2174_v6 }
 0x496   : > { %2209 = vmatmul.f32.gmra.mxu2 %v2175_v11 }
 0x49e   : > { %2212 = vmatmul.f32.gmra.mxu2 %v2176_v58 }
 0x4c6   : > { %v2195_v10 = vpop.f32.mrf.mxu2 }
 0x4cb   : > { %v2161_v32 = vpop.xlane.xlu2 %2160 }
 0x4cc   : > { %3095 = vrcp.f32 %v2161_v32 }
 0x4ce   : > { %v2198_v37 = vpop.f32.mrf.mxu2 }
 0x4cf   : > { %2891 = vmatmul.msk.f32.vlgmr.msrb.gmra.mxu3 %vm652_vm0, %v2198_v37 }
 0x4d2   : > { %v3096_v46 = vpop.eup %3095 }
 0x4d3   : > { %v2177_v59 = vmul.f32 %v3096_v46, %v2145_v31 }
 0x4d5   : > { %2215 = vmatmul.f32.gmra.mxu2 %v2177_v59 }
 0x4dd   : > { %2890 = vmatmul.msk.f32.vlgmr.msra.gmra.mxu2 %vm652_vm0, %v2195_v10 }
 0x4e2   : > { %v2201_v56 = vpop.f32.mrf.mxu2 }
 0x4e3   : > { %2892 = vmatmul.msk.f32.gmra.mxu3 %vm652_vm0, %v2201_v56 }
 0x509   : > { %v2204_v15 = vpop.f32.mrf.mxu2 }
 0x50a   : > { %2893 = vmatmul.msk.f32.gmra.mxu3 %vm652_vm0, %v2204_v15 }
 0x511   : > { %v2207_v52 = vpop.f32.mrf.mxu2 }
 0x512   : > { %2894 = vmatmul.msk.f32.gmra.mxu3 %vm652_vm0, %v2207_v52 }
 0x519   : > { %v2210_v5 = vpop.f32.mrf.mxu2 }
 0x51a   : > { %2895 = vmatmul.msk.f32.gmra.mxu3 %vm652_vm0, %v2210_v5 }
 0x521   : > { %v2213_v61 = vpop.f32.mrf.mxu2 }
 0x522   : > { %2896 = vmatmul.msk.f32.gmra.mxu3 %vm652_vm0, %v2213_v61 }
 0x552   : > { %v2267_v34 = vpop.f32.mrf.mxu3 }
 0x553   : > { %v2289_v13 = vadd.f32 %v3115_v53, %v2267_v34 }
 0x555   : > { %v4601_v42 = vadd.f32 %v4597_v50, %v2289_v13 }
 0x557   : > { %v2311_v18 = vsel %vm652_vm0, %v4601_v42, 0.0 }
 0x558   : > { %2312 = vadd.xlane.f32.xlu1 %v2311_v18  ;;  %v2216_v45 = vpop.f32.mrf.mxu2 }
 0x559   : > { %2897 = vmatmul.msk.f32.gmra.mxu3 %vm652_vm0, %v2216_v45 }
 0x560   : > { %v2264_v33 = vpop.f32.mrf.mxu2 }
 0x561   : > { %v2288_v28 = vadd.f32 %v3116_v54, %v2264_v33 }
 0x563   : > { %v4608_v41 = vadd.f32 %v4597_v50, %v2288_v28 }
 0x565   : > { %v2308_v16 = vsel %vm652_vm0, %v4608_v41, 0.0 }
 0x566   : > { %v2270_v2 = vpop.f32.mrf.mxu3  ;;  %2309 = vadd.xlane.f32.xlu0 %v2308_v16 }
 0x567   : > { %v2290_v55 = vadd.f32 %v3117_v39, %v2270_v2 }
 0x569   : > { %v4614_v29 = vadd.f32 %v4597_v50, %v2290_v55 }
 0x56b   : > { %v2314_v25 = vsel %vm652_vm0, %v4614_v29, 0.0 }
 0x56c   : > { %2315 = vadd.xlane.f32.xlu2 %v2314_v25 }
 0x58d   : > { %v2273_v19 = vpop.f32.mrf.mxu3 }
 0x58e   : > { %v2291_v49 = vadd.f32 %v3118_v51, %v2273_v19  ;;  %v2511_v19 = vld [vmem:[%s4852_s15 + $0x18] sm:$0xff] }
 0x58f   : > { %2552 = vmatpush.msrb.mxu0 %v2511_v19 }
 0x590   : > { %v4620_v8 = vadd.f32 %v4597_v50, %v2291_v49 }
 0x592   : > { %v2317_v4 = vsel %vm652_vm0, %v4620_v8, 0.0 }
 0x593   : > { %2318 = vadd.xlane.f32.xlu0 %v2317_v4 }
 0x595   : > { %v2276_v17 = vpop.f32.mrf.mxu3 }
 0x596   : > { %v2292_v0 = vadd.f32 %v3119_v26, %v2276_v17  ;;  %v2510_v17 = vld [vmem:[%s4852_s15 + $0x10] sm:$0xff]  ;;  %v2509_v26 = vld [vmem:[%s4852_s15 + $0x8] sm:$0xff] }
 0x597   : > { %2553 = vmatpush.msrb.mxu0 %v2510_v17 }
 0x598   : > { %v4626_v62 = vadd.f32 %v4597_v50, %v2292_v0  ;;  %v2508_v0 = vld [vmem:[%s4852_s15] sm:$0xff] }
 0x599   : > { %2554 = vmatpush.msrb.mxu0 %v2509_v26 }
 0x59a   : > { %v2320_v21 = vsel %vm652_vm0, %v4626_v62, 0.0 }
 0x59b   : > { %2321 = vadd.xlane.f32.xlu1 %v2320_v21  ;;  %2555 = vmatpush.msrb.mxu0 %v2508_v0 }
 0x59d   : > { %v2279_v44 = vpop.f32.mrf.mxu3 }
 0x59e   : > { %v2293_v35 = vadd.f32 %v3120_v7, %v2279_v44 }
 0x5a0   : > { %v4632_v3 = vadd.f32 %v4597_v50, %v2293_v35 }
 0x5a2   : > { %v2323_v57 = vsel %vm652_vm0, %v4632_v3, 0.0 }
 0x5a3   : > { %2324 = vadd.xlane.f32.xlu2 %v2323_v57 }
 0x5a5   : > { %v2282_v12 = vpop.f32.mrf.mxu3 }
 0x5a6   : > { %v2294_v31 = vadd.f32 %v3121_v47, %v2282_v12 }
 0x5a8   : > { %v4638_v60 = vadd.f32 %v4597_v50, %v2294_v31 }
 0x5aa   : > { %v2326_v22 = vsel %vm652_vm0, %v4638_v60, 0.0 }
 0x5ab   : > { %2327 = vadd.xlane.f32.xlu1 %v2326_v22 }
 0x5cb   : > { %v2313_v63 = vpop.xlane.xlu1 %2312 }
 0x5cc   : > { %v2333_v23 = vmul.f32 %v2313_v63, %v3283_v20 }
 0x5ce   : > { %v4644_v27 = vsub.f32 %v4601_v42, %v2333_v23 }
 0x5d0   : > { %v2349_v40 = vmul.f32 %v4644_v27, %v4644_v27 }
 0x5d2   : > { %v2359_v1 = vsel %vm652_vm0, %v2349_v40, 0.0 }
 0x5d3   : > { %2360 = vadd.xlane.f32.xlu2 %v2359_v1 }
 0x5d9   : > { %v2310_v14 = vpop.xlane.xlu0 %2309 }
 0x5da   : > { %v2332_v48 = vmul.f32 %v2310_v14, %v3283_v20 }
 0x5dc   : > { %v4651_v24 = vsub.f32 %v4608_v41, %v2332_v48  ;;  %v2285_v6 = vpop.f32.mrf.mxu3 }
 0x5dd   : > { %v2295_v58 = vadd.f32 %v3122_v9, %v2285_v6 }
 0x5de   : > { %v2348_v43 = vmul.f32 %v4651_v24, %v4651_v24 }
 0x5df   : > { %v2316_v30 = vpop.xlane.xlu2 %2315  ;;  %v4665_v37 = vadd.f32 %v4597_v50, %v2295_v58 }
 0x5e0   : > { %v2334_v38 = vmul.f32 %v2316_v30, %v3283_v20  ;;  %v2356_v36 = vsel %vm652_vm0, %v2348_v43, 0.0 }
 0x5e1   : > { %2357 = vadd.xlane.f32.xlu0 %v2356_v36  ;;  %v2329_v46 = vsel %vm652_vm0, %v4665_v37, 0.0 }
 0x5e2   : > { %v4657_v11 = vsub.f32 %v4614_v29, %v2334_v38 }
 0x5e4   : > { %v2350_v10 = vmul.f32 %v4657_v11, %v4657_v11 }
 0x5e6   : > { %v2362_v32 = vsel %vm652_vm0, %v2350_v10, 0.0 }
 0x5e7   : > { %2363 = vadd.xlane.f32.xlu1 %v2362_v32 }
 0x5e9   : > { %2330 = vadd.xlane.f32.xlu0 %v2329_v46 }
 0x606   : > { %v2319_v59 = vpop.xlane.xlu0 %2318 }
 0x607   : > { %v2335_v56 = vmul.f32 %v2319_v59, %v3283_v20 }
 0x609   : > { %v4671_v15 = vsub.f32 %v4620_v8, %v2335_v56 }
 0x60b   : > { %v2351_v52 = vmul.f32 %v4671_v15, %v4671_v15 }
 0x60d   : > { %v2365_v5 = vsel %vm652_vm0, %v2351_v52, 0.0 }
 0x60e   : > { %v2322_v61 = vpop.xlane.xlu1 %2321  ;;  %2366 = vadd.xlane.f32.xlu2 %v2365_v5 }
 0x60f   : > { %v2336_v50 = vmul.f32 %v2322_v61, %v3283_v20  ;;  %v4723_v61 = vld [vmem:[%s4850_s13] ss:$0 sm:$0xff] }
 0x611   : > { %v4678_v34 = vsub.f32 %v4626_v62, %v2336_v50 }
 0x613   : > { %v2352_v53 = vmul.f32 %v4678_v34, %v4678_v34 }
 0x615   : > { %v2368_v13 = vsel %vm652_vm0, %v2352_v53, 0.0 }
 0x616   : > { %2369 = vadd.xlane.f32.xlu0 %v2368_v13  ;;  %v2325_v18 = vpop.xlane.xlu2 %2324 }
 0x617   : > { %v2337_v45 = vmul.f32 %v2325_v18, %v3283_v20  ;;  %v4729_v18 = vld [vmem:[%s4851_s14] ss:$0 sm:$0xff] }
 0x619   : > { %v4685_v33 = vsub.f32 %v4632_v3, %v2337_v45 }
 0x61b   : > { %v2353_v54 = vmul.f32 %v4685_v33, %v4685_v33 }
 0x61d   : > { %v2371_v28 = vsel %vm652_vm0, %v2353_v54, 0.0 }
 0x61e   : > { %v2328_v2 = vpop.xlane.xlu1 %2327  ;;  %2372 = vadd.xlane.f32.xlu1 %v2371_v28 }
 0x61f   : > { %v2338_v39 = vmul.f32 %v2328_v2, %v3283_v20 }
 0x621   : > { %v4692_v55 = vsub.f32 %v4638_v60, %v2338_v39 }
 0x623   : > { %v2354_v16 = vmul.f32 %v4692_v55, %v4692_v55 }
 0x625   : > { %v2374_v25 = vsel %vm652_vm0, %v2354_v16, 0.0 }
 0x626   : > { %2375 = vadd.xlane.f32.xlu2 %v2374_v25 }
 0x646   : > { %v2361_v51 = vpop.xlane.xlu2 %2360 }
 0x647   : > { %v2381_v49 = vmul.f32 %v2361_v51, %v3283_v20 }
 0x649   : > { %v2389_v4 = vadd.f32 1e-05, %v2381_v49 }
 0x64b   : > { %3097 = vrsqrt.f32 %v2389_v4  ;;  %vm2412_vm15 = vweird.f32 %v2389_v4 }
 0x651   : > { %v3098_v44 = vpop.eup %3097 }
 0x652   : > { %v2407_v12 = vmul.f32 %v3098_v44, %v2389_v4  ;;  %vm2413_vm12 = vweird.f32 %v3098_v44 }
 0x653   : > { %vm2414_vm1 = vmor %vm2412_vm15, %vm2413_vm12 }
 0x654   : > { %v2358_v21 = vpop.xlane.xlu0 %2357  ;;  %v2408_v22 = vmul.f32 %v3098_v44, %v2407_v12 }
 0x655   : > { %v2380_v7 = vmul.f32 %v2358_v21, %v3283_v20 }
 0x656   : > { %v2409_v14 = vmul.f32 0.5, %v2408_v22 }
 0x657   : > { %v2388_v35 = vadd.f32 1e-05, %v2380_v7 }
 0x658   : > { %v2410_v58 = vsub.f32 1.5, %v2409_v14 }
 0x659   : > { %3099 = vrsqrt.f32 %v2388_v35  ;;  %vm2402_vm13 = vweird.f32 %v2388_v35 }
 0x65a   : > { %v2364_v57 = vpop.xlane.xlu1 %2363  ;;  %v2411_v46 = vmul.f32 %v3098_v44, %v2410_v58 }
 0x65b   : > { %v2382_v47 = vmul.f32 %v2364_v57, %v3283_v20 }
 0x65c   : > { %v2331_v63 = vpop.xlane.xlu0 %2330  ;;  %v2415_v50 = vsel %vm2414_vm1, %v3098_v44, %v2411_v46 }
 0x65d   : > { %v2390_v31 = vadd.f32 1e-05, %v2382_v47  ;;  %v2339_v23 = vmul.f32 %v2331_v63, %v3283_v20  ;;  %v2477_v54 = vmul.f32 %v2415_v50, %v4644_v27  ;;  %v2596_v63 = vld [vmem:[%s4854_s17 + $0x38] sm:$0xff] }
 0x65e   : > { %2634 = vmatpush.msrb.mxu1 %v2596_v63  ;;  %v3013_v63 = vld [vmem:[%s4853_s16] ss:$0 sm:$0xff] }
 0x65f   : > { %3101 = vrsqrt.f32 %v2390_v31  ;;  %v3100_v40 = vpop.eup %3099  ;;  %v4714_v1 = vsub.f32 %v4665_v37, %v2339_v23  ;;  %vm2422_vm3 = vweird.f32 %v2390_v31 }
 0x660   : > { %v2397_v48 = vmul.f32 %v3100_v40, %v2388_v35  ;;  %vm2403_vm11 = vweird.f32 %v3100_v40 }
 0x661   : > { %v2355_v30 = vmul.f32 %v4714_v1, %v4714_v1  ;;  %vm2404_vm14 = vmor %vm2402_vm13, %vm2403_vm11 }
 0x662   : > { %v2398_v38 = vmul.f32 %v3100_v40, %v2397_v48 }
 0x663   : > { %v2377_v9 = vsel %vm652_vm0, %v2355_v30, 0.0 }
 0x664   : > { %v2399_v36 = vmul.f32 0.5, %v2398_v38  ;;  %2378 = vadd.xlane.f32.xlu0 %v2377_v9 }
 0x665   : > { %v3102_v6 = vpop.eup %3101 }
 0x666   : > { %v2417_v43 = vmul.f32 %v3102_v6, %v2390_v31  ;;  %v2400_v32 = vsub.f32 1.5, %v2399_v36  ;;  %vm2423_vm2 = vweird.f32 %v3102_v6 }
 0x667   : > { %vm2424_vm4 = vmor %vm2422_vm3, %vm2423_vm2 }
 0x668   : > { %v2418_v10 = vmul.f32 %v3102_v6, %v2417_v43  ;;  %v2401_v59 = vmul.f32 %v3100_v40, %v2400_v32 }
 0x66a   : > { %v2419_v56 = vmul.f32 0.5, %v2418_v10  ;;  %v2405_v52 = vsel %vm2404_vm14, %v3100_v40, %v2401_v59 }
 0x66b   : > { %v2476_v5 = vmul.f32 %v2405_v52, %v4651_v24  ;;  %v2489_v24 = vmul.f32 %v4723_v61, %v2477_v54 }
 0x66c   : > { %v2420_v53 = vsub.f32 1.5, %v2419_v56 }
 0x66d   : > { %v2488_v13 = vmul.f32 %v4723_v61, %v2476_v5  ;;  %v2501_v39 = vadd.f32 %v4729_v18, %v2489_v24 }
 0x66e   : > { %v2421_v28 = vmul.f32 %v3102_v6, %v2420_v53 }
 0x66f   : > { %v2500_v45 = vadd.f32 %v4729_v18, %v2488_v13 }
 0x670   : > { %v2425_v2 = vsel %vm2424_vm4, %v3102_v6, %v2421_v28 }
 0x671   : > { %2898 = vmatmul.msk.f32.vlgmr.msrb.gmra.mxu0 %vm652_vm0, %v2500_v45  ;;  %v2478_v16 = vmul.f32 %v2425_v2, %v4657_v11 }
 0x673   : > { %v2490_v25 = vmul.f32 %v4723_v61, %v2478_v16 }
 0x675   : > { %v2502_v19 = vadd.f32 %v4729_v18, %v2490_v25 }
 0x679   : > { %2899 = vmatmul.msk.f32.gmra.mxu0 %vm652_vm0, %v2501_v39 }
 0x681   : > { %2900 = vmatmul.msk.f32.gmra.mxu0 %vm652_vm0, %v2502_v19  ;;  %v2367_v27 = vpop.xlane.xlu2 %2366 }
 0x682   : > { %v2383_v51 = vmul.f32 %v2367_v27, %v3283_v20 }
 0x684   : > { %v2391_v49 = vadd.f32 1e-05, %v2383_v51 }
 0x686   : > { %3103 = vrsqrt.f32 %v2391_v49  ;;  %vm2432_vm6 = vweird.f32 %v2391_v49 }
 0x689   : > { %v2370_v4 = vpop.xlane.xlu0 %2369 }
 0x68a   : > { %v2384_v17 = vmul.f32 %v2370_v4, %v3283_v20  ;;  %v2594_v4 = vld [vmem:[%s4854_s17 + $0x28] sm:$0xff] }
 0x68c   : > { %v3104_v26 = vpop.eup %3103  ;;  %v2392_v0 = vadd.f32 1e-05, %v2384_v17  ;;  %v2592_v17 = vld [vmem:[%s4854_s17 + $0x18] sm:$0xff] }
 0x68d   : > { %v2427_v21 = vmul.f32 %v3104_v26, %v2391_v49  ;;  %vm2433_vm5 = vweird.f32 %v3104_v26 }
 0x68e   : > { %3105 = vrsqrt.f32 %v2392_v0  ;;  %vm2434_vm7 = vmor %vm2432_vm6, %vm2433_vm5  ;;  %vm2442_vm9 = vweird.f32 %v2392_v0  ;;  %vm2601_vm5 = vcmask 523264  }
 0x68f   : > { %v2428_v11 = vmul.f32 %v3104_v26, %v2427_v21  ;;  %v2589_v21 = vld [vmem:[%s4854_s17] sm:$0xff] }
 0x691   : > { %v2429_v44 = vmul.f32 0.5, %v2428_v11  ;;  %v2373_v7 = vpop.xlane.xlu1 %2372 }
 0x692   : > { %v2385_v35 = vmul.f32 %v2373_v7, %v3283_v20 }
 0x693   : > { %v2430_v57 = vsub.f32 1.5, %v2429_v44 }
 0x694   : > { %v3106_v12 = vpop.eup %3105  ;;  %v2393_v47 = vadd.f32 1e-05, %v2385_v35 }
 0x695   : > { %v2431_v31 = vmul.f32 %v3104_v26, %v2430_v57  ;;  %v2437_v22 = vmul.f32 %v3106_v12, %v2392_v0  ;;  %vm2443_vm8 = vweird.f32 %v3106_v12  ;;  %v2590_v0 = vld [vmem:[%s4854_s17 + $0x8] sm:$0xff] }
 0x696   : > { %3107 = vrsqrt.f32 %v2393_v47  ;;  %vm2444_vm10 = vmor %vm2442_vm9, %vm2443_vm8  ;;  %vm2452_vm12 = vweird.f32 %v2393_v47 }
 0x697   : > { %v2435_v23 = vsel %vm2434_vm7, %v3104_v26, %v2431_v31  ;;  %v2438_v40 = vmul.f32 %v3106_v12, %v2437_v22  ;;  %v2591_v26 = vld [vmem:[%s4854_s17 + $0x10] sm:$0xff] }
 0x698   : > { %v2479_v14 = vmul.f32 %v2435_v23, %v4671_v15 }
 0x699   : > { %v2439_v48 = vmul.f32 0.5, %v2438_v40  ;;  %v2376_v30 = vpop.xlane.xlu2 %2375 }
 0x69a   : > { %v2386_v6 = vmul.f32 %v2376_v30, %v3283_v20  ;;  %v2491_v38 = vmul.f32 %v4723_v61, %v2479_v14 }
 0x69b   : > { %v2440_v43 = vsub.f32 1.5, %v2439_v48 }
 0x69c   : > { %v3108_v9 = vpop.eup %3107  ;;  %v2394_v58 = vadd.f32 1e-05, %v2386_v6  ;;  %v2503_v36 = vadd.f32 %v4729_v18, %v2491_v38 }
 0x69d   : > { %v2441_v10 = vmul.f32 %v3106_v12, %v2440_v43  ;;  %v2447_v32 = vmul.f32 %v3108_v9, %v2393_v47  ;;  %vm2453_vm11 = vweird.f32 %v3108_v9 }
 0x69e   : > { %3109 = vrsqrt.f32 %v2394_v58  ;;  %2901 = vmatmul.msk.f32.gmra.mxu0 %vm652_vm0, %v2503_v36  ;;  %vm2454_vm13 = vmor %vm2452_vm12, %vm2453_vm11  ;;  %vm2462_vm15 = vweird.f32 %v2394_v58 }
 0x69f   : > { %v2445_v15 = vsel %vm2444_vm10, %v3106_v12, %v2441_v10  ;;  %v2448_v46 = vmul.f32 %v3108_v9, %v2447_v32 }
 0x6a0   : > { %v2480_v59 = vmul.f32 %v2445_v15, %v4678_v34 }
 0x6a1   : > { %v2449_v56 = vmul.f32 0.5, %v2448_v46 }
 0x6a2   : > { %v2492_v52 = vmul.f32 %v4723_v61, %v2480_v59 }
 0x6a3   : > { %v2450_v5 = vsub.f32 1.5, %v2449_v56 }
 0x6a4   : > { %v3110_v50 = vpop.eup %3109  ;;  %v2504_v53 = vadd.f32 %v4729_v18, %v2492_v52 }
 0x6a5   : > { %v2451_v13 = vmul.f32 %v3108_v9, %v2450_v5  ;;  %v2457_v45 = vmul.f32 %v3110_v50, %v2394_v58  ;;  %vm2463_vm14 = vweird.f32 %v3110_v50 }
 0x6a6   : > { %2902 = vmatmul.msk.f32.gmra.mxu0 %vm652_vm0, %v2504_v53  ;;  %vm2464_vm1 = vmor %vm2462_vm15, %vm2463_vm14 }
 0x6a7   : > { %v2455_v54 = vsel %vm2454_vm13, %v3108_v9, %v2451_v13  ;;  %v2458_v28 = vmul.f32 %v3110_v50, %v2457_v45  ;;  %v3014_v13 = vld [vmem:[%s4855_s18] ss:$0 sm:$0xff] }
 0x6a8   : > { %v2481_v24 = vmul.f32 %v2455_v54, %v4685_v33  ;;  %v2595_v33 = vld [vmem:[%s4854_s17 + $0x30] sm:$0xff] }
 0x6a9   : > { %v2459_v2 = vmul.f32 0.5, %v2458_v28  ;;  %2635 = vmatpush.msrb.mxu1 %v2595_v33 }
 0x6aa   : > { %v2493_v34 = vmul.f32 %v4723_v61, %v2481_v24 }
 0x6ab   : > { %v2460_v39 = vsub.f32 1.5, %v2459_v2  ;;  %2636 = vmatpush.msrb.mxu1 %v2594_v4 }
 0x6ac   : > { %v2505_v16 = vadd.f32 %v4729_v18, %v2493_v34 }
 0x6ad   : > { %v2461_v25 = vmul.f32 %v3110_v50, %v2460_v39 }
 0x6ae   : > { %2903 = vmatmul.msk.f32.gmra.mxu0 %vm652_vm0, %v2505_v16 }
 0x6af   : > { %v2465_v19 = vsel %vm2464_vm1, %v3110_v50, %v2461_v25 }
 0x6b0   : > { %v2482_v27 = vmul.f32 %v2465_v19, %v4692_v55  ;;  %v2593_v55 = vld [vmem:[%s4854_s17 + $0x20] sm:$0xff] }
 0x6b1   : > { %2637 = vmatpush.msrb.mxu1 %v2593_v55 }
 0x6b2   : > { %v2494_v51 = vmul.f32 %v4723_v61, %v2482_v27 }
 0x6b3   : > { %2638 = vmatpush.msrb.mxu1 %v2592_v17 }
 0x6b4   : > { %v2506_v49 = vadd.f32 %v4729_v18, %v2494_v51 }
 0x6b5   : > { %2639 = vmatpush.msrb.mxu1 %v2591_v26 }
 0x6b6   : > { %2904 = vmatmul.msk.f32.gmra.mxu0 %vm652_vm0, %v2506_v49 }
 0x6b7   : > { %2640 = vmatpush.msrb.mxu1 %v2590_v0 }
 0x6b9   : > { %2641 = vmatpush.msrb.mxu1 %v2589_v21 }
 0x6d7   : > { %v2379_v11 = vpop.xlane.xlu0 %2378 }
 0x6d8   : > { %v2387_v44 = vmul.f32 %v2379_v11, %v3283_v20 }
 0x6da   : > { %v2395_v7 = vadd.f32 1e-05, %v2387_v44 }
 0x6dc   : > { %3111 = vrsqrt.f32 %v2395_v7  ;;  %vm2472_vm3 = vweird.f32 %v2395_v7 }
 0x6e2   : > { %v3112_v35 = vpop.eup %3111 }
 0x6e3   : > { %v2467_v57 = vmul.f32 %v3112_v35, %v2395_v7  ;;  %vm2473_vm2 = vweird.f32 %v3112_v35 }
 0x6e4   : > { %vm2474_vm4 = vmor %vm2472_vm3, %vm2473_vm2 }
 0x6e5   : > { %v2468_v12 = vmul.f32 %v3112_v35, %v2467_v57 }
 0x6e7   : > { %v2469_v47 = vmul.f32 0.5, %v2468_v12 }
 0x6e9   : > { %v2470_v31 = vsub.f32 1.5, %v2469_v47 }
 0x6eb   : > { %v2471_v22 = vmul.f32 %v3112_v35, %v2470_v31 }
 0x6ed   : > { %v2475_v23 = vsel %vm2474_vm4, %v3112_v35, %v2471_v22 }
 0x6ee   : > { %v2557_v40 = vpop.f32.mrf.mxu0  ;;  %v2483_v14 = vmul.f32 %v2475_v23, %v4714_v1 }
 0x6ef   : > { %v2558_v20 = vadd.f32 %v3013_v63, %v2557_v40 }
 0x6f0   : > { %v2495_v48 = vmul.f32 %v4723_v61, %v2483_v14 }
 0x6f1   : > { %v2581_v30 = vmax.f32 %v2558_v20, 0.0 }
 0x6f2   : > { %v2507_v6 = vadd.f32 %v4729_v18, %v2495_v48 }
 0x6f3   : > { %2906 = vmatmul.msk.f32.vlgmr.msrb.gmra.mxu1 %vm2601_vm5, %v2581_v30 }
 0x6f4   : > { %2905 = vmatmul.msk.f32.gmra.mxu0 %vm652_vm0, %v2507_v6 }
 0x6f6   : > { %v2560_v38 = vpop.f32.mrf.mxu0 }
 0x6f7   : > { %v2561_v43 = vadd.f32 %v3013_v63, %v2560_v38 }
 0x6f9   : > { %v2582_v9 = vmax.f32 %v2561_v43, 0.0 }
 0x6fb   : > { %2907 = vmatmul.msk.f32.gmra.mxu1 %vm2601_vm5, %v2582_v9 }
 0x6fe   : > { %v2563_v58 = vpop.f32.mrf.mxu0 }
 0x6ff   : > { %v2564_v36 = vadd.f32 %v3013_v63, %v2563_v58 }
 0x701   : > { %v2583_v10 = vmax.f32 %v2564_v36, 0.0 }
 0x703   : > { %2908 = vmatmul.msk.f32.gmra.mxu1 %vm2601_vm5, %v2583_v10 }
 0x71b   : > { %v2566_v1 = vpop.f32.mrf.mxu0 }
 0x71c   : > { %v2567_v32 = vadd.f32 %v3013_v63, %v2566_v1 }
 0x71e   : > { %v2584_v61 = vmax.f32 %v2567_v32, 0.0 }
 0x720   : > { %2909 = vmatmul.msk.f32.gmra.mxu1 %vm2601_vm5, %v2584_v61 }
 0x723   : > { %v2569_v18 = vpop.f32.mrf.mxu0 }
 0x724   : > { %v2570_v15 = vadd.f32 %v3013_v63, %v2569_v18 }
 0x726   : > { %v2585_v46 = vmax.f32 %v2570_v15, 0.0 }
 0x728   : > { %2910 = vmatmul.msk.f32.gmra.mxu1 %vm2601_vm5, %v2585_v46 }
 0x72b   : > { %v2572_v59 = vpop.f32.mrf.mxu0 }
 0x72c   : > { %v2573_v56 = vadd.f32 %v3013_v63, %v2572_v59 }
 0x72e   : > { %v2586_v52 = vmax.f32 %v2573_v56, 0.0 }
 0x730   : > { %2911 = vmatmul.msk.f32.gmra.mxu1 %vm2601_vm5, %v2586_v52 }
 0x733   : > { %v2575_v5 = vpop.f32.mrf.mxu0 }
 0x734   : > { %v2576_v50 = vadd.f32 %v3013_v63, %v2575_v5 }
 0x736   : > { %v2587_v53 = vmax.f32 %v2576_v50, 0.0 }
 0x738   : > { %2912 = vmatmul.msk.f32.gmra.mxu1 %vm2601_vm5, %v2587_v53 }
 0x770   : > { %v2643_v45 = vpop.f32.mrf.mxu1 }
 0x771   : > { %v2644_v54 = vadd.f32 %v3014_v13, %v2643_v45  ;;  %v2578_v28 = vpop.f32.mrf.mxu0 }
 0x772   : > { %v2579_v24 = vadd.f32 %v3013_v63, %v2578_v28 }
 0x773   : > { %v2667_v2 = vadd.f32 %v2644_v54, %v4608_v41 }
 0x774   : > { %v2588_v34 = vmax.f32 %v2579_v24, 0.0 }
 0x775   : > { %2675 = vst.msk [vmem:[%s4807_s20] sm:$0xff] %vm652_vm0, %v2667_v2 }
 0x776   : > { %2913 = vmatmul.msk.f32.gmra.mxu1 %vm2601_vm5, %v2588_v34 }
 0x778   : > { %v2646_v39 = vpop.f32.mrf.mxu1 }
 0x779   : > { %v2647_v16 = vadd.f32 %v3014_v13, %v2646_v39 }
 0x77b   : > { %v2668_v25 = vadd.f32 %v2647_v16, %v4601_v42 }
 0x77d   : > { %2676 = vst.msk [vmem:[%s4807_s20 + $0x8] sm:$0xff] %vm652_vm0, %v2668_v25 }
 0x780   : > { %v2649_v19 = vpop.f32.mrf.mxu1 }
 0x781   : > { %v2650_v27 = vadd.f32 %v3014_v13, %v2649_v19 }
 0x783   : > { %v2669_v51 = vadd.f32 %v2650_v27, %v4614_v29 }
 0x785   : > { %2677 = vst.msk [vmem:[%s4807_s20 + $0x10] sm:$0xff] %vm652_vm0, %v2669_v51 }
 0x79d   : > { %v2652_v41 = vpop.f32.mrf.mxu1 }
 0x79e   : > { %v2653_v49 = vadd.f32 %v3014_v13, %v2652_v41 }
 0x7a0   : > { %v2670_v33 = vadd.f32 %v2653_v49, %v4620_v8 }
 0x7a2   : > { %2678 = vst.msk [vmem:[%s4807_s20 + $0x18] sm:$0xff] %vm652_vm0, %v2670_v33 }
 0x7a5   : > { %v2655_v4 = vpop.f32.mrf.mxu1 }
 0x7a6   : > { %v2656_v55 = vadd.f32 %v3014_v13, %v2655_v4 }
 0x7a8   : > { %v2671_v42 = vadd.f32 %v2656_v55, %v4626_v62 }
 0x7aa   : > { %2679 = vst.msk [vmem:[%s4807_s20 + $0x20] sm:$0xff] %vm652_vm0, %v2671_v42 }
 0x7ad   : > { %v2658_v17 = vpop.f32.mrf.mxu1 }
 0x7ae   : > { %v2659_v26 = vadd.f32 %v3014_v13, %v2658_v17 }
 0x7b0   : > { %v2672_v29 = vadd.f32 %v2659_v26, %v4632_v3 }
 0x7b2   : > { %2680 = vst.msk [vmem:[%s4807_s20 + $0x28] sm:$0xff] %vm652_vm0, %v2672_v29 }
 0x7b5   : > { %v2661_v0 = vpop.f32.mrf.mxu1 }
 0x7b6   : > { %v2662_v21 = vadd.f32 %v3014_v13, %v2661_v0 }
 0x7b8   : > { %v2673_v11 = vadd.f32 %v2662_v21, %v4638_v60 }
 0x7ba   : > { %2681 = vst.msk [vmem:[%s4807_s20 + $0x30] sm:$0xff] %vm652_vm0, %v2673_v11 }
 0x7f3   : > { %v2664_v8 = vpop.f32.mrf.mxu1 }
 0x7f4   : > { %v2665_v44 = vadd.f32 %v3014_v13, %v2664_v8 }
 0x7f6   : > { %v2674_v7 = vadd.f32 %v2665_v44, %v4665_v37 }
 0x7f8   : > { %2682 = vst.msk [vmem:[%s4807_s20 + $0x38] sm:$0xff] %vm652_vm0, %v2674_v7 }
 0x7f9 PF: > { %s29_s0 = sadd.s32 1, %s3129_s0  }
 0x7fa   : > { %p26_p4 = scmp.ge.s32.totalorder %s29_s0, 4  }
 0x7fc   :  { %28 = sbr.rel (!%p26_p4) target bundleno = 5 (0x5), region = 129 }

</bundles_post_ra>
